<compile_context>
chip_gen: v7x
topology: tpu7x:2x2x1
jax: 0.10.0
libtpu: 0.0.40
codegen_flags: <defaults>
</compile_context>

<pallas_src>
import functools
import math

import jax
import jax.numpy as jnp
from jax.experimental import pallas as pl
from jax.experimental.pallas import tpu as pltpu


def _pair(v):
    return (v, v) if isinstance(v, int) else tuple(v)


def _round_up(n, m):
    return ((n + m - 1) // m) * m


def _vmem_capacity_bytes():
    try:
        info = pltpu.get_tpu_info()
        cap = int(getattr(info, "vmem_capacity_bytes", 0) or 0)
        if cap > 0:
            return cap
    except Exception:
        pass
    return 64 << 20  # conservative fallback (v7x per-TC VMEM)


# ----------------------------------------------------------------------------
# Kernel A: fused Q / K / mixture-of-values 1x1 projection, NHWC row tiles.
# ----------------------------------------------------------------------------
def _proj_mix_kernel(x_ref, w_ref, pm_ref, q_ref, k_ref, v_ref):
    """x:(1,tph,pws,C)  w:(C,(2+mix)*OCp)  pm:(tph,pws,mix) -> q,k,v:(1,tph,pws,OCp)."""
    _, tph, pws, c = x_ref.shape
    ocp = q_ref.shape[-1]
    mix = pm_ref.shape[-1]

    # Native-dtype operands on the MXU (no f32 pre-cast); f32 accumulation.
    x2 = x_ref[0].reshape(tph * pws, c)
    proj = jnp.dot(x2, w_ref[...], preferred_element_type=jnp.float32)

    q_ref[0] = proj[:, :ocp].reshape(tph, pws, ocp).astype(q_ref.dtype)
    k_ref[0] = proj[:, ocp:2 * ocp].reshape(tph, pws, ocp).astype(k_ref.dtype)

    # Collapse the `mix` value maps with the per-pixel softmax gate so the
    # (mix*OCp)-wide intermediate never leaves VMEM.
    pm = pm_ref[...].reshape(tph * pws, mix).astype(jnp.float32)
    acc = pm[:, 0:1] * proj[:, 2 * ocp:3 * ocp]
    for m in range(1, mix):                                       # static unroll
        acc = acc + pm[:, m:m + 1] * proj[:, (2 + m) * ocp:(3 + m) * ocp]
    v_ref[0] = acc.reshape(tph, pws, ocp).astype(v_ref.dtype)


def _proj_mix_pallas(x_nhwc, w_all, pm_map, *, oc_p, tph, qkv_dtype, vmem_limit):
    b, phs, pws, c = x_nhwc.shape
    ncols = w_all.shape[1]
    mix = pm_map.shape[-1]
    out_sds = jax.ShapeDtypeStruct((b, phs, pws, oc_p), qkv_dtype)
    return pl.pallas_call(
        _proj_mix_kernel,
        out_shape=(out_sds, out_sds, out_sds),
        grid_spec=pltpu.PrefetchScalarGridSpec(
            num_scalar_prefetch=0,
            grid=(b, phs // tph),
            in_specs=[
                pl.BlockSpec((1, tph, pws, c), lambda bi, ri: (bi, ri, 0, 0)),
                pl.BlockSpec((c, ncols), lambda bi, ri: (0, 0)),     # resident weight
                pl.BlockSpec((tph, pws, mix), lambda bi, ri: (ri, 0, 0)),  # spatial gate
            ],
            out_specs=(
                pl.BlockSpec((1, tph, pws, oc_p), lambda bi, ri: (bi, ri, 0, 0)),
                pl.BlockSpec((1, tph, pws, oc_p), lambda bi, ri: (bi, ri, 0, 0)),
                pl.BlockSpec((1, tph, pws, oc_p), lambda bi, ri: (bi, ri, 0, 0)),
            ),
        ),
        compiler_params=pltpu.CompilerParams(
            dimension_semantics=("parallel", "parallel"),
            vmem_limit_bytes=vmem_limit),
    )(x_nhwc, w_all, pm_map)


# ----------------------------------------------------------------------------
# Kernel B: fh-tiled kh*kw windowed attention with halo DMA, MXU rel-pos,
#           hoisted column shifts, EUP reciprocal and fused bias.
# ----------------------------------------------------------------------------
def _local_attn_kernel(q_hbm, k_hbm, v_hbm, rxy_ref, bias_ref, o_ref,
                       qbuf, kbuf, vbuf, sem, *, kh, kw, tfh):
    bi = pl.program_id(0)
    ti = pl.program_id(1)
    q0, q1 = (kh - 1) // 2, (kw - 1) // 2
    _, _, fw, ocp = o_ref.shape
    row0 = pl.multiple_of(ti * tfh, 8)        # tfh is a multiple of 8

    # Halo DMA of this tile's Q/K/V rows from HBM into VMEM scratch.
    # TODO(synk): double-buffer across grid steps to hide the copy latency.
    cq = pltpu.make_async_copy(q_hbm.at[bi, pl.ds(row0 + q0, tfh)], qbuf, sem.at[0])
    ck = pltpu.make_async_copy(k_hbm.at[bi, pl.ds(row0, tfh + kh - 1)], kbuf, sem.at[1])
    cv = pltpu.make_async_copy(v_hbm.at[bi, pl.ds(row0, tfh + kh - 1)], vbuf, sem.at[2])
    cq.start(); ck.start(); cv.start()
    cq.wait(); ck.wait(); cv.wait()

    q = qbuf[:, q1:q1 + fw, :].astype(jnp.float32)                 # (tfh, fw, OCp)

    # Relative-position logits on the MXU: (tfh*fw, OCp) @ (OCp, kh*kw).
    rel = jnp.dot(q.reshape(tfh * fw, ocp),
                  rxy_ref[...].astype(jnp.float32),
                  preferred_element_type=jnp.float32).reshape(tfh, fw, kh * kw)

    # Hoist the pw-axis (sublane) shift out of the (u, v) loop:
    # 2*kw relayout slices instead of 2*kh*kw.
    k_cols = [kbuf[:, c0:c0 + fw, :].astype(jnp.float32) for c0 in range(kw)]
    v_cols = [vbuf[:, c0:c0 + fw, :].astype(jnp.float32) for c0 in range(kw)]

    logits = []
    for u in range(kh):
        for v in range(kw):
            logits.append(jnp.sum(q * k_cols[v][u:u + tfh], axis=-1)
                          + rel[:, :, u * kw + v])
    lg = jnp.stack(logits, axis=0)                                  # (kh*kw, tfh, fw)
    m = lg.max(axis=0)
    e = jnp.exp(lg - m[None, :, :])
    z = e.sum(axis=0)
    inv_z = pl.reciprocal(z, approx=True)                           # EUP slot

    acc = None
    idx = 0
    for u in range(kh):
        for v in range(kw):
            term = e[idx][:, :, None] * v_cols[v][u:u + tfh]
            acc = term if acc is None else acc + term
            idx += 1

    bias = bias_ref[...].astype(jnp.float32)                        # (1, OCp)
    out = acc * inv_z[:, :, None] + bias[None, :, :]
    o_ref[0] = out.astype(o_ref.dtype)


def _local_attn_pallas(q4, k4, v4, rxy_t, bias_vec, *, kh, kw, fh_pad, fw, tfh,
                       out_dtype, vmem_limit):
    b, phs, pws, oc_p = q4.shape
    assert fh_pad % tfh == 0
    n_ft = fh_pad // tfh
    kernel = functools.partial(_local_attn_kernel, kh=kh, kw=kw, tfh=tfh)
    return pl.pallas_call(
        kernel,
        out_shape=jax.ShapeDtypeStruct((b, fh_pad, fw, oc_p), out_dtype),
        grid_spec=pltpu.PrefetchScalarGridSpec(
            num_scalar_prefetch=0,
            grid=(b, n_ft),
            in_specs=[
                pl.BlockSpec(memory_space=pl.ANY),     # Q  (HBM, manual halo DMA)
                pl.BlockSpec(memory_space=pl.ANY),     # K
                pl.BlockSpec(memory_space=pl.ANY),     # V (mixed)
                pl.BlockSpec((oc_p, kh * kw), lambda bi, ti: (0, 0)),   # rel-pos
                pl.BlockSpec((1, oc_p), lambda bi, ti: (0, 0)),         # bias
            ],
            out_specs=pl.BlockSpec((1, tfh, fw, oc_p), lambda bi, ti: (bi, ti, 0, 0)),
            scratch_shapes=[
                pltpu.VMEM((tfh, pws, oc_p), q4.dtype),
                pltpu.VMEM((tfh + kh - 1, pws, oc_p), k4.dtype),
                pltpu.VMEM((tfh + kh - 1, pws, oc_p), v4.dtype),
                pltpu.SemaphoreType.DMA((3,)),
            ],
        ),
        compiler_params=pltpu.CompilerParams(
            dimension_semantics=("parallel", "parallel"),
            vmem_limit_bytes=vmem_limit),
    )(q4, k4, v4, rxy_t, bias_vec)


# ----------------------------------------------------------------------------
# Full forward pass (mirrors SAMixtureConv2d.forward).
# ----------------------------------------------------------------------------
def sa_mixture_conv2d(x, wq, wk, wv, relative_x, relative_y, emb_x, emb_y,
                      emb_m, bias, *, kernel_size, stride=1, padding=0,
                      groups=1, qkv_dtype=None, row_tile=None, fh_tile=None):
    """x: (B, C, H, W) -> (B, OC, fh, fw)."""
    kh, kw = _pair(kernel_size)
    sh, sw = _pair(stride)
    px, py = _pair(padding)
    assert (sh, sw) == (1, 1), "only stride=1 implemented"  # TODO(synk): general stride

    b, c, h, w = x.shape
    oc = wq.shape[0]
    mix = wv.shape[0]
    og = oc // groups
    rel_size = og // 2
    ph, pw = h + 2 * px, w + 2 * py
    fh, fw = ph - kh + 1, pw - kw + 1

    if qkv_dtype is None:
        qkv_dtype = x.dtype
    qkv_dtype = jnp.dtype(qkv_dtype)
    oc_p = _round_up(oc, 128)                      # lane-dense output channels
    w_align = 16 if qkv_dtype.itemsize < 4 else 8  # bf16 packs rows in pairs
    pw_s = _round_up(pw, w_align)                  # sublane-aligned stored width

    # ---- generation-aware tile sizing and VMEM limits -------------------------
    cap = _vmem_capacity_bytes()
    vmem_limit = int(min(cap, 128 << 20) * 3 // 4)
    budget = vmem_limit // 2                       # 2x headroom vs. the limit
    xb = jnp.dtype(x.dtype).itemsize
    qb = qkv_dtype.itemsize
    ob = jnp.dtype(x.dtype).itemsize
    ncols = (2 + mix) * oc_p

    # Kernel B fh tile.
    if fh_tile is None:
        per_row_b = (3 * pw_s * oc_p * qb
                     + fw * oc_p * (2 * ob + 4 * (2 * kw + 2))
                     + 3 * kh * kw * fw * 4)
        fh_tile = budget // max(per_row_b, 1)
    tfh = int(max(8, min(128, int(fh_tile))))
    tfh = (tfh // 8) * 8
    tfh = min(tfh, _round_up(fh, 8))
    if b == 1 and fh >= 16:                        # keep >=2 grid steps at B=1
        tfh = min(tfh, _round_up(-(-fh // 2), 8))
    n_ft = -(-fh // tfh)
    fh_pad = n_ft * tfh

    # Kernel A row tile; q/k/v row storage must cover Kernel B's halo reads.
    ph_need = fh_pad + kh - 1
    if row_tile is None:
        per_row_a = pw_s * (2 * c * xb + 2 * mix * 4 + 6 * oc_p * qb
                            + (ncols + oc_p) * 4)
        row_tile = (budget - 2 * c * ncols * xb) // max(per_row_a, 1)
    tph = int(max(8, min(256, int(row_tile))))
    tph = (tph // 8) * 8
    if b == 1 and ph_need >= 16:
        tph = min(tph, _round_up(-(-ph_need // 2), 8))
    tph = min(tph, _round_up(ph_need, 8))
    ph_store = _round_up(ph_need, tph)

    # ---- tiny host-side parameter packing -------------------------------------
    def dense_1x1(wt):                 # (OC, C//groups) -> (C, OCp) block-diagonal
        cg = c // groups
        full = jnp.zeros((c, oc_p), jnp.float32)
        for g in range(groups):
            full = full.at[g * cg:(g + 1) * cg, g * og:(g + 1) * og].set(
                wt[g * og:(g + 1) * og, :].T)
        return full

    w_all = jnp.concatenate(
        [dense_1x1(wq), dense_1x1(wk)] + [dense_1x1(wv[m]) for m in range(mix)],
        axis=1).astype(x.dtype)                               # (C, (2+mix)*OCp)

    # Spatial mixture gate p_abm[m, y, x]; stored per spatial position only.
    pm = jax.nn.softmax(
        (emb_m @ emb_x)[:, None, :] + (emb_m @ emb_y)[:, :, None], axis=0)
    pm_map = jnp.zeros((ph_store, pw_s, mix), jnp.float32)
    pm_map = pm_map.at[:ph, :pw, :].set(jnp.transpose(pm, (1, 2, 0)))

    # Relative-position table for the in-kernel MXU matmul:
    #   rxy_t[c, u*kw + v] = Ry[c, u] + Rx[c, v]   (expanded over groups).
    rx_full = jnp.zeros((oc_p, kw), jnp.float32)
    ry_full = jnp.zeros((oc_p, kh), jnp.float32)
    for g in range(groups):
        rx_full = rx_full.at[g * og:g * og + rel_size, :].set(relative_x)
        ry_full = ry_full.at[g * og + rel_size:(g + 1) * og, :].set(relative_y)
    rxy_t = (ry_full[:, :, None] + rx_full[:, None, :]).reshape(oc_p, kh * kw)
    rxy_t = rxy_t.astype(jnp.float32)

    bias_vec = jnp.zeros((1, oc_p), jnp.float32)
    if bias is not None:
        bias_vec = bias_vec.at[:, :oc].set(bias.reshape(1, oc).astype(jnp.float32))

    # ---- stage 1: fused Q / K / mixed-V projection (NHWC, channel-padded) -----
    x_nhwc = jnp.zeros((b, ph_store, pw_s, c), x.dtype)
    x_nhwc = x_nhwc.at[:, px:px + h, py:py + w, :].set(jnp.transpose(x, (0, 2, 3, 1)))

    q4, k4, v4 = _proj_mix_pallas(x_nhwc, w_all, pm_map, oc_p=oc_p, tph=tph,
                                  qkv_dtype=qkv_dtype, vmem_limit=vmem_limit)

    # ---- stage 2: fh-tiled windowed attention + bias ---------------------------
    out4 = _local_attn_pallas(q4, k4, v4, rxy_t, bias_vec, kh=kh, kw=kw,
                              fh_pad=fh_pad, fw=fw, tfh=tfh,
                              out_dtype=x.dtype, vmem_limit=vmem_limit)
    return jnp.transpose(out4[:, :fh, :, :oc], (0, 3, 1, 2))   # (B, OC, fh, fw)


# ----------------------------------------------------------------------------
if __name__ == "__main__":
    # Keep XLA matmuls in the reference at full f32 precision.
    jax.config.update("jax_default_matmul_precision", "highest")

    B, C, H, W = 2, 4, 16, 16
    OC, K, PAD, STRIDE, GROUPS, MIX = 8, 3, 1, 1, 1, 4
    kh = kw = K
    og = OC // GROUPS
    rel_size = og // 2
    ph, pw = H + 2 * PAD, W + 2 * PAD

    key = jax.random.PRNGKey(0)
    ks = jax.random.split(key, 10)
    scale = math.sqrt(2.0 / OC)                         # kaiming_normal_(fan_out)
    wq = jax.random.normal(ks[0], (OC, C // GROUPS), jnp.float32) * scale
    wk = jax.random.normal(ks[1], (OC, C // GROUPS), jnp.float32) * scale
    wv = jax.random.normal(ks[2], (MIX, OC, C // GROUPS), jnp.float32) * scale
    relative_x = jax.random.normal(ks[3], (rel_size, kw), jnp.float32)
    relative_y = jax.random.normal(ks[4], (og - rel_size, kh), jnp.float32)
    emb_x = jax.random.normal(ks[5], (og, pw), jnp.float32)
    emb_y = jax.random.normal(ks[6], (og, ph), jnp.float32)
    emb_m = jax.random.normal(ks[7], (MIX, og), jnp.float32)
    bound = 1.0 / math.sqrt(OC)
    bias = jax.random.uniform(ks[8], (1, OC, 1, 1), jnp.float32, -bound, bound)
    x = jax.random.normal(ks[9], (B, C, H, W), jnp.float32)

    # Small explicit tiles to exercise the multi-tile grids and the halo DMA.
    out = sa_mixture_conv2d(
        x, wq, wk, wv, relative_x, relative_y, emb_x, emb_y, emb_m, bias,
        kernel_size=K, stride=STRIDE, padding=PAD, groups=GROUPS,
        row_tile=8, fh_tile=8)
    out = jax.block_until_ready(out)

    # ---- pure-JAX reference of the PyTorch forward -----------------------------
    fh, fw = ph - kh + 1, pw - kw + 1

    def conv1x1(xin, wt):                   # xin:(B,C,ph,pw)  wt:(OC, C//groups)
        cg = C // GROUPS
        outs = []
        for g in range(GROUPS):
            outs.append(jnp.einsum('oc,bchw->bohw',
                                   wt[g * og:(g + 1) * og],
                                   xin[:, g * cg:(g + 1) * cg]))
        return jnp.concatenate(outs, axis=1)

    def unfold(t):                          # (B,CH,ph,pw) -> (B,CH,fh,fw,kh,kw)
        cols = []
        for u in range(kh):
            rows = [t[:, :, u:u + fh, v:v + fw] for v in range(kw)]
            cols.append(jnp.stack(rows, axis=-1))
        return jnp.stack(cols, axis=-2)

    xpad = jnp.pad(x, ((0, 0), (0, 0), (PAD, PAD), (PAD, PAD)))
    vq = conv1x1(xpad, wq)
    vk = conv1x1(xpad, wk)
    win_q = vq[:, :, (kh - 1) // 2:ph - kh // 2, (kw - 1) // 2:pw - kw // 2]
    win_q_b = win_q.reshape(B, GROUPS, -1, fh, fw)
    wqx = jnp.einsum('bgxhw,xk->bhwk', win_q_b[:, :, :rel_size], relative_x)
    wqy = jnp.einsum('bgyhw,yk->bhwk', win_q_b[:, :, rel_size:], relative_y)
    win_k = unfold(vk)
    vx = (win_q[:, :, :, :, None, None] * win_k).sum(axis=1)
    vx = vx + wqx[:, :, :, None, :] + wqy[:, :, :, :, None]
    vx = jax.nn.softmax(vx.reshape(B, fh, fw, kh * kw), axis=3)
    vx = vx.reshape(B, 1, fh, fw, kh, kw)
    p_abm = jax.nn.softmax(
        (emb_m @ emb_x)[:, None, :] + (emb_m @ emb_y)[:, :, None], axis=0)
    vv = jnp.stack([conv1x1(xpad, wv[m]) for m in range(MIX)], axis=0)
    vv = jnp.einsum('mbchw,mhw->bchw', vv, p_abm)
    win_v = unfold(vv)
    ref = jnp.einsum('bchwkl->bchw', vx * win_v) + bias

    assert out.shape == (B, OC, fh, fw) == ref.shape
    # Tolerance covers MXU rounding and the approx (EUP) softmax reciprocal.
    max_err = float(jnp.max(jnp.abs(out - ref)))
    assert jnp.allclose(out, ref, atol=2e-2, rtol=2e-2), max_err

    # bf16 inter-stage Q/K/V path (halves stage-1 <-> stage-2 HBM traffic);
    # looser check since Q/K/V are rounded to bf16 before the f32 attention math.
    out_bf = sa_mixture_conv2d(
        x, wq, wk, wv, relative_x, relative_y, emb_x, emb_y, emb_m, bias,
        kernel_size=K, stride=STRIDE, padding=PAD, groups=GROUPS,
        qkv_dtype=jnp.bfloat16)
    out_bf = jax.block_until_ready(out_bf)
    err_bf = jnp.abs(out_bf.astype(jnp.float32) - ref)
    assert bool(jnp.isfinite(out_bf).all())
    assert float(err_bf.max()) < 0.5 and float(err_bf.mean()) < 0.1, (
        float(err_bf.max()), float(err_bf.mean()))

    print("KERNEL_OK")
</pallas_src>

<mosaic_0001>
module attributes {stable_mosaic.version = 11 : i64} {
  func.func @_proj_mix_kernel(%arg0: i32, %arg1: i32, %arg2: memref<1x8x24x4xf32, #tpu.memory_space<vmem>>, %arg3: memref<4x768xf32, #tpu.memory_space<vmem>>, %arg4: memref<8x24x4xf32, #tpu.memory_space<vmem>>, %arg5: memref<1x8x24x128xf32, #tpu.memory_space<vmem>>, %arg6: memref<1x8x24x128xf32, #tpu.memory_space<vmem>>, %arg7: memref<1x8x24x128xf32, #tpu.memory_space<vmem>>) attributes {dimension_semantics = [#tpu.dimension_semantics<parallel>, #tpu.dimension_semantics<parallel>], iteration_bounds = array<i64: 2, 3>, scalar_prefetch = 0 : i64, scratch_operands = 0 : i64, tpu.core_type = #tpu.core_type<tc>, window_params = [{transform_indices = @transform_0, window_bounds = array<i64: 1, 8, 24, 4>}, {pipeline_mode = #tpu.pipeline_mode<synchronous>, transform_indices = @transform_1, window_bounds = array<i64: 4, 768>}, {transform_indices = @transform_2, window_bounds = array<i64: 8, 24, 4>}, {transform_indices = @transform_3, window_bounds = array<i64: 1, 8, 24, 128>}, {transform_indices = @transform_4, window_bounds = array<i64: 1, 8, 24, 128>}, {transform_indices = @transform_5, window_bounds = array<i64: 1, 8, 24, 128>}]} {
    %c0 = arith.constant 0 : index
    %c0_0 = arith.constant 0 : index
    %c0_1 = arith.constant 0 : index
    %c0_2 = arith.constant 0 : index
    %0 = vector.load %arg2[%c0, %c0_0, %c0_1, %c0_2] : memref<1x8x24x4xf32, #tpu.memory_space<vmem>>, vector<1x8x24x4xf32>
    %1 = vector.shape_cast %0 : vector<1x8x24x4xf32> to vector<8x24x4xf32>
    %2 = vector.shape_cast %1 : vector<8x24x4xf32> to vector<192x4xf32>
    %c0_3 = arith.constant 0 : index
    %c0_4 = arith.constant 0 : index
    %3 = vector.load %arg3[%c0_3, %c0_4] : memref<4x768xf32, #tpu.memory_space<vmem>>, vector<4x768xf32>
    %cst = arith.constant dense<0.000000e+00> : vector<192x768xf32>
    %4 = tpu.matmul %2, %3, %cst {dimension_numbers = #tpu.dot_dimension_numbers<[1], [0], [0], [1], [0, 0, 1, 1], [], []>, precision = #tpu.contract_precision<fp32>} : vector<192x4xf32>, vector<4x768xf32>, vector<192x768xf32> -> vector<192x768xf32>
    %5 = vector.extract_strided_slice %4 {offsets = [0, 0], sizes = [192, 128], strides = [1, 1]} : vector<192x768xf32> to vector<192x128xf32>
    %6 = vector.shape_cast %5 : vector<192x128xf32> to vector<8x24x128xf32>
    %c0_5 = arith.constant 0 : index
    %c0_6 = arith.constant 0 : index
    %c0_7 = arith.constant 0 : index
    %c0_8 = arith.constant 0 : index
    %7 = vector.load %arg5[%c0_5, %c0_6, %c0_7, %c0_8] : memref<1x8x24x128xf32, #tpu.memory_space<vmem>>, vector<1x8x24x128xf32>
    %8 = vector.shape_cast %7 : vector<1x8x24x128xf32> to vector<8x24x128xf32>
    %9 = vector.shape_cast %6 : vector<8x24x128xf32> to vector<1x8x24x128xf32>
    tpu.vector_store %arg5[%c0_5, %c0_6, %c0_7, %c0_8], %9 {strides = array<i32>} : memref<1x8x24x128xf32, #tpu.memory_space<vmem>>, vector<1x8x24x128xf32>,
    %10 = vector.extract_strided_slice %4 {offsets = [0, 128], sizes = [192, 128], strides = [1, 1]} : vector<192x768xf32> to vector<192x128xf32>
    %11 = vector.shape_cast %10 : vector<192x128xf32> to vector<8x24x128xf32>
    %c0_9 = arith.constant 0 : index
    %c0_10 = arith.constant 0 : index
    %c0_11 = arith.constant 0 : index
    %c0_12 = arith.constant 0 : index
    %12 = vector.load %arg6[%c0_9, %c0_10, %c0_11, %c0_12] : memref<1x8x24x128xf32, #tpu.memory_space<vmem>>, vector<1x8x24x128xf32>
    %13 = vector.shape_cast %12 : vector<1x8x24x128xf32> to vector<8x24x128xf32>
    %14 = vector.shape_cast %11 : vector<8x24x128xf32> to vector<1x8x24x128xf32>
    tpu.vector_store %arg6[%c0_9, %c0_10, %c0_11, %c0_12], %14 {strides = array<i32>} : memref<1x8x24x128xf32, #tpu.memory_space<vmem>>, vector<1x8x24x128xf32>,
    %c0_13 = arith.constant 0 : index
    %c0_14 = arith.constant 0 : index
    %c0_15 = arith.constant 0 : index
    %15 = vector.load %arg4[%c0_13, %c0_14, %c0_15] : memref<8x24x4xf32, #tpu.memory_space<vmem>>, vector<8x24x4xf32>
    %16 = vector.shape_cast %15 : vector<8x24x4xf32> to vector<192x4xf32>
    %17 = vector.extract_strided_slice %16 {offsets = [0, 0], sizes = [192, 1], strides = [1, 1]} : vector<192x4xf32> to vector<192x1xf32>
    %18 = vector.extract_strided_slice %4 {offsets = [0, 256], sizes = [192, 128], strides = [1, 1]} : vector<192x768xf32> to vector<192x128xf32>
    %19 = vector.broadcast %17 : vector<192x1xf32> to vector<192x128xf32>
    %20 = arith.mulf %19, %18 : vector<192x128xf32>
    %21 = vector.extract_strided_slice %16 {offsets = [0, 1], sizes = [192, 1], strides = [1, 1]} : vector<192x4xf32> to vector<192x1xf32>
    %22 = vector.extract_strided_slice %4 {offsets = [0, 384], sizes = [192, 128], strides = [1, 1]} : vector<192x768xf32> to vector<192x128xf32>
    %23 = vector.broadcast %21 : vector<192x1xf32> to vector<192x128xf32>
    %24 = arith.mulf %23, %22 : vector<192x128xf32>
    %25 = arith.addf %20, %24 : vector<192x128xf32>
    %26 = vector.extract_strided_slice %16 {offsets = [0, 2], sizes = [192, 1], strides = [1, 1]} : vector<192x4xf32> to vector<192x1xf32>
    %27 = vector.extract_strided_slice %4 {offsets = [0, 512], sizes = [192, 128], strides = [1, 1]} : vector<192x768xf32> to vector<192x128xf32>
    %28 = vector.broadcast %26 : vector<192x1xf32> to vector<192x128xf32>
    %29 = arith.mulf %28, %27 : vector<192x128xf32>
    %30 = arith.addf %25, %29 : vector<192x128xf32>
    %31 = vector.extract_strided_slice %16 {offsets = [0, 3], sizes = [192, 1], strides = [1, 1]} : vector<192x4xf32> to vector<192x1xf32>
    %32 = vector.extract_strided_slice %4 {offsets = [0, 640], sizes = [192, 128], strides = [1, 1]} : vector<192x768xf32> to vector<192x128xf32>
    %33 = vector.broadcast %31 : vector<192x1xf32> to vector<192x128xf32>
    %34 = arith.mulf %33, %32 : vector<192x128xf32>
    %35 = arith.addf %30, %34 : vector<192x128xf32>
    %36 = vector.shape_cast %35 : vector<192x128xf32> to vector<8x24x128xf32>
    %c0_16 = arith.constant 0 : index
    %c0_17 = arith.constant 0 : index
    %c0_18 = arith.constant 0 : index
    %c0_19 = arith.constant 0 : index
    %37 = vector.load %arg7[%c0_16, %c0_17, %c0_18, %c0_19] : memref<1x8x24x128xf32, #tpu.memory_space<vmem>>, vector<1x8x24x128xf32>
    %38 = vector.shape_cast %37 : vector<1x8x24x128xf32> to vector<8x24x128xf32>
    %39 = vector.shape_cast %36 : vector<8x24x128xf32> to vector<1x8x24x128xf32>
    tpu.vector_store %arg7[%c0_16, %c0_17, %c0_18, %c0_19], %39 {strides = array<i32>} : memref<1x8x24x128xf32, #tpu.memory_space<vmem>>, vector<1x8x24x128xf32>,
    return
  }
  func.func @transform_0(%arg0: i32, %arg1: i32) -> (i32, i32, i32, i32) {
    %c0_i32 = arith.constant 0 : i32
    %c0_i32_0 = arith.constant 0 : i32
    %c0_i32_1 = arith.constant 0 : i32
    return %arg0, %arg1, %c0_i32, %c0_i32_0 : i32, i32, i32, i32
  }
  func.func @transform_1(%arg0: i32, %arg1: i32) -> (i32, i32) {
    %c0_i32 = arith.constant 0 : i32
    %c0_i32_0 = arith.constant 0 : i32
    %c0_i32_1 = arith.constant 0 : i32
    return %c0_i32, %c0_i32_0 : i32, i32
  }
  func.func @transform_2(%arg0: i32, %arg1: i32) -> (i32, i32, i32) {
    %c0_i32 = arith.constant 0 : i32
    %c0_i32_0 = arith.constant 0 : i32
    %c0_i32_1 = arith.constant 0 : i32
    return %arg1, %c0_i32, %c0_i32_0 : i32, i32, i32
  }
  func.func @transform_3(%arg0: i32, %arg1: i32) -> (i32, i32, i32, i32) {
    %c0_i32 = arith.constant 0 : i32
    %c0_i32_0 = arith.constant 0 : i32
    %c0_i32_1 = arith.constant 0 : i32
    return %arg0, %arg1, %c0_i32, %c0_i32_0 : i32, i32, i32, i32
  }
  func.func @transform_4(%arg0: i32, %arg1: i32) -> (i32, i32, i32, i32) {
    %c0_i32 = arith.constant 0 : i32
    %c0_i32_0 = arith.constant 0 : i32
    %c0_i32_1 = arith.constant 0 : i32
    return %arg0, %arg1, %c0_i32, %c0_i32_0 : i32, i32, i32, i32
  }
  func.func @transform_5(%arg0: i32, %arg1: i32) -> (i32, i32, i32, i32) {
    %c0_i32 = arith.constant 0 : i32
    %c0_i32_0 = arith.constant 0 : i32
    %c0_i32_1 = arith.constant 0 : i32
    return %arg0, %arg1, %c0_i32, %c0_i32_0 : i32, i32, i32, i32
  }
}

</mosaic_0001>

<bundles_post_ra>
// kernel: tpu_custom_call.1
= control target key start
LH: loop header
LB: loop body
LE: loop exit
PB: predicated region body
PF: predicated region fallthrough
CT: control target
= control target key end

     0   :  { %s9200_s0 = inlined_call_operand.vmem [shape: f32[2,24,24,4], index: 0, kind: input, shape index: {}]   ;;  %s9201_s1 = inlined_call_operand.vmem [shape: f32[4,768], index: 1, kind: input, shape index: {}]   ;;  %s9202_s2 = inlined_call_operand.vmem [shape: f32[24,24,4], index: 2, kind: input, shape index: {}]   ;;  %s9203_s3 = inlined_call_operand.hbm [shape: f32[2,24,24,128], index: 3, kind: output, shape index: {0}]   ;;  %s9204_s4 = inlined_call_operand.hbm [shape: f32[2,24,24,128], index: 4, kind: output, shape index: {1}]   ;;  %s9205_s5 = inlined_call_operand.hbm [shape: f32[2,24,24,128], index: 5, kind: output, shape index: {2}]  }
   0x1   :  { %9316 = sst [smem:[#allocation60_spill]] %s9200_s0 }
   0x2   :  { %9317 = sst [smem:[#allocation61_spill]] %s9201_s1 }
   0x3   :  { %11 = vsyncpa [#allocation3], 0 }
   0x4   :  { %13 = vsyncpa [#allocation3 + $0x1], 0 }
   0x5   :  { %14 = vsyncpa [#allocation5], 0 }
   0x6   :  { %16 = vsyncpa [#allocation5 + $0x1], 0  ;;  %s7147_s18 = smov 0   ;;  %s7149_s19 = smov 0  }
   0x7   :  { %s7151_s20 = smov 0   ;;  %s7153_s21 = smov 0  }
   0x8   :  { %s7155_s22 = smov 0   ;;  %s7157_s23 = smov 0  }
   0x9   :  { %s7159_s24 = smov 0   ;;  %s7161_s25 = smov 0  }
   0xa LB: > { %s6102_s26 = sadd.s32 4294967295, %s7105_s25   ;;  %s9313_s27 = sadd.s32 4294967294, %s7105_s25   ;;  %s7105_s25 = sphi %s7161_s25, %s22_s25   ;;  %s7101_s24 = sphi %s7159_s24, %s9497_s24   ;;  %s7097_s23 = sphi %s7157_s23, %s9496_s23   ;;  %s7093_s22 = sphi %s7155_s22, %s9495_s22   ;;  %s7089_s21 = sphi %s7153_s21, %s9494_s21   ;;  %s7085_s20 = sphi %s7151_s20, %s9493_s20   ;;  %s7081_s19 = sphi %s7149_s19, %s9492_s19   ;;  %s7077_s18 = sphi %s7147_s18, %s9491_s18  }
   0xb   : > { %s31_s28 = sadd.s32 1, %s7097_s23  ;;  %s34_s29 = sadd.s32 1, %s7101_s24 }
   0xc   : > { %p32_p0 = scmp.ge.s32.totalorder %s31_s28, 3  ;;  %p128_p1 = scmp.ne.s32.totalorder %s7085_s20, %s7081_s19 }
   0xd   : > { %p129_p2 = scmp.eq.s32.totalorder %s6102_s26, 5  ;;  %p134_p5 = scmp.ne.s32.totalorder %s7081_s19, %s7077_s18 }
   0xe   : > { %s9499_s28 = smov (%p32_p0, %s31_s28), 0  ;;  %s9501_s29 = smov (!%p32_p0, %s34_s29), %s7101_s24 }
   0xf   : > { %s114_s30 = ssub.s32 %s7097_s23, %s9499_s28  ;;  %p7200_p3 = por %p129_p2, %p128_p1 }
  0x10   : > { %p36_p4 = scmp.ge.s32.totalorder %s9501_s29, 2  ;;  %p135_p6 = scmp.eq.s32.totalorder %s9313_s27, 5 }
  0x11   : > { %p6106_p7 = scmp.ge.s32.totalorder %s7105_s25, 1  ;;  %p236_p9 = scmp.lt.s32.totalorder %s7105_s25, 7 }
  0x12   : > { %s9503_s29 = smov (%p36_p4, %s9501_s29), 0  ;;  %p7211_p8 = por %p135_p6, %p134_p5 }
  0x13   : > { %s113_s8 = ssub.s32 %s7101_s24, %s9503_s29  ;;  %s118_s9 = sadd.s32 1, %s7085_s20 }
  0x14   : > { %s115_s10 = sor.u32 %s114_s30, %s113_s8  ;;  %p237_p10 = pnand %p6106_p7, %p236_p9 }
  0x15   : > { %p116_p11 = scmp.eq.s32.totalorder %s115_s10, 0 }
  0x16   : > { %240 = sbr.rel (%p237_p10) target bundleno = 1148 (0x47c), region = 32 }
  0x17   : > { %s7220_s11 = scalar_select %p116_p11, %s7085_s20, %s118_s9  }
  0x1d   : > { %s9320_s1 = sld [smem:[#allocation61_spill]]  ;;  %vm412_vm0 = vcmask 1043456   ;;  %s6107_s14 = sshll.u32 %s7089_s21, 3  ;;  %v9218_v3 = vmov 0.0   ;;  %vm339_vm1 = vcmask 31744  }
  0x1e   : > { %p286_p12 = scmp.lt.s32.totalorder %s7093_s22, 1  ;;  %1326 = vmatprep.mubr.f32.mxu0 %v9218_v3  ;;  %p288_p13 = scmp.lt.s32.totalorder %s6107_s14, 23  ;;  %491 = vmatprep.mubr.f32.mxu1 %v9218_v3 }
  0x1f   : > { %s9321_s0 = sld [smem:[#allocation60_spill]] }
  0x20   : > { %s287_s15 = scalar_select %p286_p12, %s7093_s22, 1 }
  0x21   : > { %s9505_s14 = smov (!%p288_p13, %s6107_s14), 23 }
  0x22   : > { %s6844_s16 = smul.u32 72, %s287_s15 }
  0x23   : > { %v330_v0 = vld [vmem:[%s9320_s1] sm:$0xff]  ;;  %s6843_s17 = smul.u32 3, %s9505_s14 }
  0x24   : > { %v336_v1 = vcombine.high %v330_v0, %v330_v0  ;;  %v413_v2 = vsel %vm412_vm0, %v330_v0, 0 }
  0x25   : > { %v7232_v5 = vand.u32 4294901760, %v413_v2  ;;  %s292_s30 = sadd.s32 %s6844_s16, %s6843_s17  ;;  %s6847_s17 = smul.u32 72, %s7093_s22 }
  0x26   : > { %v415_v4 = vsel %vm412_vm0, %v336_v1, 0  ;;  %s6108_s8 = sshll.u32 %s292_s30, 3  ;;  %s9314_s30 = sand.u32 1, %s7081_s19  }
  0x27   : > { %v425_v6 = vand.u32 4294901760, %v415_v4  ;;  %v7238_v8 = vsub.f32 %v413_v2, %v7232_v5  ;;  %s7245_s12 = scalar_lea.vmem %s9321_s0, %s6108_s8  ;;  %s8106_s8 = smul.u32 192, %s9314_s30 }
  0x28   : > { %v306_v10 = vld [vmem:[%s7245_s12] sm:$0xff]  ;;  %v307_v12 = vld [vmem:[%s7245_s12 + $0x8] sm:$0xff]  ;;  %v308_v13 = vld [vmem:[%s7245_s12 + $0x10] sm:$0xff] }
  0x29   : > { %1261 = vmatprep.subr.mxu0 %v425_v6  ;;  %426 = vmatprep.subr.mxu1 %v425_v6  ;;  %v757_v7 = vsub.f32 %v415_v4, %v425_v6  ;;  %v341_v14 = vsel %vm339_vm1, %v306_v10, 0  ;;  %v764_v15 = vand.u32 4294901760, %v7238_v8  ;;  %v344_v16 = vsel %vm339_vm1, %v307_v12, 0  ;;  %v309_v18 = vld [vmem:[%s7245_s12 + $0x18] sm:$0xff]  ;;  %v310_v19 = vld [vmem:[%s7245_s12 + $0x20] sm:$0xff]  ;;  %v311_v30 = vld [vmem:[%s7245_s12 + $0x28] sm:$0xff] }
  0x2a   : > { %1263 = vmatpush1.msra.mxu0 %v7232_v5  ;;  %428 = vmatpush1.msra.mxu1 %v7232_v5  ;;  %v347_v17 = vsel %vm339_vm1, %v308_v13, 0  ;;  %v7256_v20 = vand.u32 4294901760, %v341_v14  ;;  %v7258_v22 = vand.u32 4294901760, %v344_v16  ;;  %v350_v24 = vsel %vm339_vm1, %v309_v18, 0  ;;  %v312_v41 = vld [vmem:[%s7245_s12 + $0x30] sm:$0xff]  ;;  %v313_v49 = vld [vmem:[%s7245_s12 + $0x38] sm:$0xff] }
  0x2b   : > { %v758_v9 = vand.u32 4294901760, %v757_v7  ;;  %v7260_v23 = vand.u32 4294901760, %v347_v17  ;;  %v353_v25 = vsel %vm339_vm1, %v310_v19, 0  ;;  %v7273_v29 = vand.u32 4294901760, %v350_v24  ;;  %v314_v56 = vld [vmem:[%s7245_s12 + $0x40] sm:$0xff]  ;;  %v323_v0 = vld [vmem:[%s7245_s12 + $0x88] sm:$0xff] }
  0x2c   : > { %9322 = vst [vmem:[#allocation9_spill] sm:$0xff] %v7258_v22  ;;  %v7265_v26 = vsub.f32 %v341_v14, %v7256_v20  ;;  %v7268_v27 = vsub.f32 %v344_v16, %v7258_v22  ;;  %v765_v31 = vsub.f32 %v7238_v8, %v764_v15  ;;  %v7283_v34 = vand.u32 4294901760, %v353_v25  ;;  %v322_v63 = vld [vmem:[%s7245_s12 + $0x80] sm:$0xff]  ;;  %v324_v1 = vld [vmem:[%s7245_s12 + $0x90] sm:$0xff]  ;;  %v315_v2 = vld [vmem:[%s7245_s12 + $0x48] sm:$0xff]  ;;  %s8117_s9 = scalar_lea.vmem [#allocation2], %s8106_s8 }
  0x2d   : > { %v759_v11 = vsub.f32 %v757_v7, %v758_v9  ;;  %1546 = vmatprep.subr.mxu0 %v758_v9  ;;  %9323 = vst [vmem:[#allocation10_spill] sm:$0xff] %v7260_v23  ;;  %v7271_v28 = vsub.f32 %v347_v17, %v7260_v23  ;;  %9324 = vst [vmem:[#allocation11_spill] sm:$0xff] %v7273_v29  ;;  %v356_v35 = vsel %vm339_vm1, %v311_v30, 0  ;;  %v359_v48 = vsel %vm339_vm1, %v312_v41, 0  ;;  %v325_v10 = vld [vmem:[%s7245_s12 + $0x98] sm:$0xff]  ;;  %v327_v17 = vld [vmem:[%s7245_s12 + $0xa8] sm:$0xff] }
  0x2e   : > { %v7278_v32 = vand.u32 4294901760, %v7265_v26  ;;  %v7281_v33 = vand.u32 4294901760, %v7268_v27  ;;  %9327 = vst [vmem:[#allocation14_spill] sm:$0xff] %v7283_v34  ;;  %v7295_v39 = vsub.f32 %v350_v24, %v7273_v29  ;;  %v766_v40 = vand.u32 4294901760, %v765_v31  ;;  %v316_v18 = vld [vmem:[%s7245_s12 + $0x50] sm:$0xff]  ;;  %s8121_s10 = scalar_lea.vmem [#allocation4], %s8106_s8 }
  0x2f   : > { %v760_v21 = vand.u32 4294901760, %v759_v11  ;;  %v7292_v38 = vand.u32 4294901760, %v7271_v28  ;;  %v7302_v43 = vsub.f32 %v353_v25, %v7283_v34  ;;  %v7304_v44 = vand.u32 4294901760, %v356_v35  ;;  %v326_v11 = vld [vmem:[%s7245_s12 + $0xa0] sm:$0xff]  ;;  %v328_v24 = vld [vmem:[%s7245_s12 + $0xb0] sm:$0xff]  ;;  %s5919_s0 = sshll.u32 %s8121_s10, 4  ;;  %s8953_s0 = int_to_ptr.vmem [resolvable:$true] %s5919_s0 }
  0x30   : > { %9325 = vst [vmem:[#allocation12_spill] sm:$0xff] %v7278_v32  ;;  %9326 = vst [vmem:[#allocation13_spill] sm:$0xff] %v7281_v33  ;;  %1330 = vmatmul.mubr.f32.vlgmr.msra.gmra.mrb[0].mxu0 %v7278_v32  ;;  %v495_v36 = vsub.f32 %v7265_v26, %v7278_v32  ;;  %v506_v37 = vsub.f32 %v7268_v27, %v7281_v33  ;;  %v7313_v47 = vand.u32 4294901760, %v7295_v39  ;;  %v7325_v52 = vand.u32 4294901760, %v359_v48  ;;  %s6951_s22 = scalar_lea.vmem %s8953_s0, 3072 }
  0x31   : > { %761 = vmatprep.subr.mxu1 %v760_v21  ;;  %9328 = vst [vmem:[#allocation15_spill] sm:$0xff] %v7292_v38  ;;  %1335 = vmatprep.mubr.f32.mxu0 %v9218_v3  ;;  %9329 = vst [vmem:[#allocation16_spill] sm:$0xff] %v7304_v44  ;;  %v517_v46 = vsub.f32 %v7271_v28, %v7292_v38  ;;  %v7320_v50 = vand.u32 4294901760, %v7302_v43  ;;  %v7323_v51 = vsub.f32 %v356_v35, %v7304_v44  ;;  %p6952_p0 = scmp.ne.s32.totalorder %s8953_s0, %s6951_s22 }
  0x32   : > { %1550 = vmatpush1.msra.mxu0 %v764_v15  ;;  %v7299_v42 = vand.u32 4294901760, %v495_v36  ;;  %v7308_v45 = vand.u32 4294901760, %v506_v37  ;;  %9330 = vst [vmem:[#allocation17_spill] sm:$0xff] %v7313_v47  ;;  %v528_v54 = vsub.f32 %v7295_v39, %v7313_v47  ;;  %v362_v55 = vsel %vm339_vm1, %v313_v49, 0 }
  0x33   : > { %1783 = vmatprep.subr.mxu0 %v425_v6  ;;  %9331 = vst [vmem:[#allocation18_spill] sm:$0xff] %v7320_v50  ;;  %v7329_v53 = vand.u32 4294901760, %v517_v46  ;;  %v539_v57 = vsub.f32 %v7302_v43, %v7320_v50  ;;  %v7340_v58 = vand.u32 4294901760, %v7323_v51  ;;  %v7343_v59 = vsub.f32 %v359_v48, %v7325_v52  ;;  %v317_v46 = vld [vmem:[%s7245_s12 + $0x58] sm:$0xff]  ;;  %p6953_p1 = pnand %p6952_p0, %p7200_p3 }
  0x34   : > { %497 = vmatmul.mubr.f32.vlgmr.msra.gmra.mrb[0].mxu1 %v7299_v42  ;;  %1339 = vmatmul.mubr.f32.gmra.mrb[2].mxu0 %v7281_v33  ;;  %v7345_v60 = vand.u32 4294901760, %v362_v55  ;;  %v7349_v61 = vand.u32 4294901760, %v528_v54  ;;  %v365_v62 = vsel %vm339_vm1, %v314_v56, 0  ;;  %v7375_v13 = vsel %vm339_vm1, %v322_v63, 0 }
  0x35   : > { %767 = vmatpush1.msra.mxu1 %v766_v40  ;;  %502 = vmatprep.mubr.f32.mxu1 %v9218_v3  ;;  %9332 = vst [vmem:[#allocation19_spill] sm:$0xff] %v7329_v53  ;;  %9333 = vst [vmem:[#allocation20_spill] sm:$0xff] %v7340_v58  ;;  %v7358_v4 = vand.u32 4294901760, %v539_v57  ;;  %v550_v6 = vsub.f32 %v7323_v51, %v7340_v58  ;;  %v7372_v12 = vand.u32 4294901760, %v365_v62  ;;  %v7378_v14 = vsel %vm339_vm1, %v323_v0, 0  ;;  %v329_v40 = vld [vmem:[%s7245_s12 + $0xb8] sm:$0xff]  ;;  %p6954_p2 = pneg %p6953_p1 }
  0x36   : > { %1344 = vmatprep.mubr.f32.mxu0 %v9218_v3  ;;  %1001 = vmatprep.subr.mxu1 %v757_v7  ;;  %9334 = vst [vmem:[#allocation21_spill] sm:$0xff] %v7349_v61  ;;  %v7363_v7 = vand.u32 4294901760, %v7343_v59  ;;  %v7366_v9 = vsub.f32 %v362_v55, %v7345_v60  ;;  %v7381_v15 = vsel %vm339_vm1, %v324_v1, 0  ;;  %v368_v16 = vsel %vm339_vm1, %v315_v2, 0  ;;  %v318_v0 = vld [vmem:[%s7245_s12 + $0x60] sm:$0xff] }
  0x37   : > { %9335 = vst [vmem:[#allocation22_spill] sm:$0xff] %v7358_v4  ;;  %v7389_v19 = vsel %vm339_vm1, %v325_v10, 0  ;;  %v7392_v21 = vsel %vm339_vm1, %v326_v11, 0  ;;  %v7402_v31 = vand.u32 4294901760, %v550_v6  ;;  %v7405_v35 = vsub.f32 %v365_v62, %v7372_v12 }
  0x38   : > { %508 = vmatmul.mubr.f32.gmra.mrb[2].mxu1 %v7308_v45  ;;  %1348 = vmatmul.mubr.f32.gmra.mrb[4].mxu0 %v7292_v38  ;;  %9336 = vst [vmem:[#allocation23_spill] sm:$0xff] %v7363_v7  ;;  %v561_v25 = vsub.f32 %v7343_v59, %v7363_v7  ;;  %v7398_v30 = vand.u32 4294901760, %v7366_v9  ;;  %v7407_v36 = vand.u32 4294901760, %v368_v16  ;;  %v7410_v37 = vsel %vm339_vm1, %v327_v17, 0  ;;  %v319_v17 = vld [vmem:[%s7245_s12 + $0x68] sm:$0xff] }
  0x39   : > { %513 = vmatprep.mubr.f32.mxu1 %v9218_v3  ;;  %1353 = vmatprep.mubr.f32.mxu0 %v9218_v3  ;;  %9338 = vst [vmem:[#allocation25_spill] sm:$0xff] %v7402_v31  ;;  %v371_v41 = vsel %vm339_vm1, %v316_v18, 0  ;;  %v7418_v48 = vsel %vm339_vm1, %v328_v24, 0  ;;  %v7425_v55 = vsel %vm339_vm1, %v329_v40, 0  ;;  %v7430_v56 = vand.u32 4294901760, %v7405_v35 }
  0x3a   : > { %9337 = vst [vmem:[#allocation24_spill] sm:$0xff] %v7398_v30  ;;  %v7420_v49 = vand.u32 4294901760, %v561_v25  ;;  %v572_v54 = vsub.f32 %v7366_v9, %v7398_v30  ;;  %v7433_v57 = vsub.f32 %v368_v16, %v7407_v36  ;;  %v7435_v62 = vand.u32 4294901760, %v371_v41 }
  0x3b   : > { %9340 = vst [vmem:[#allocation27_spill] sm:$0xff] %v7430_v56  ;;  %v374_v63 = vsel %vm339_vm1, %v317_v46, 0  ;;  %v583_v6 = vsub.f32 %v7405_v35, %v7430_v56  ;;  %v377_v16 = vsel %vm339_vm1, %v318_v0, 0  ;;  %v380_v24 = vsel %vm339_vm1, %v319_v17, 0 }
  0x3c   : > { %519 = vmatmul.mubr.f32.gmra.mrb[4].mxu1 %v7329_v53  ;;  %1357 = vmatmul.mubr.f32.gmra.mrb[6].mxu0 %v7313_v47  ;;  %9339 = vst [vmem:[#allocation26_spill] sm:$0xff] %v7420_v49  ;;  %v7441_v1 = vand.u32 4294901760, %v572_v54  ;;  %v7443_v2 = vand.u32 4294901760, %v374_v63  ;;  %v7450_v10 = vand.u32 4294901760, %v7433_v57  ;;  %v7453_v11 = vsub.f32 %v371_v41, %v7435_v62  ;;  %v320_v54 = vld [vmem:[%s7245_s12 + $0x70] sm:$0xff] }
  0x3d   : > { %524 = vmatprep.mubr.f32.mxu1 %v9218_v3  ;;  %1362 = vmatprep.mubr.f32.mxu0 %v9218_v3  ;;  %v7459_v18 = vand.u32 4294901760, %v377_v16  ;;  %v7464_v25 = vand.u32 4294901760, %v583_v6  ;;  %v7477_v0 = vand.u32 4294901760, %v380_v24 }
  0x3e   : > { %9341 = vst [vmem:[#allocation28_spill] sm:$0xff] %v7441_v1  ;;  %9342 = vst [vmem:[#allocation29_spill] sm:$0xff] %v7450_v10  ;;  %v594_v40 = vsub.f32 %v7433_v57, %v7450_v10  ;;  %v7469_v41 = vand.u32 4294901760, %v7453_v11  ;;  %v7472_v46 = vsub.f32 %v374_v63, %v7443_v2 }
  0x3f   : > { %9343 = vst [vmem:[#allocation30_spill] sm:$0xff] %v7464_v25  ;;  %v7489_v63 = vsub.f32 %v377_v16, %v7459_v18 }
  0x40   : > { %530 = vmatmul.mubr.f32.gmra.mrb[6].mxu1 %v7349_v61  ;;  %1366 = vmatmul.mubr.f32.gmra.mrb[8].mxu0 %v7320_v50  ;;  %9344 = vst [vmem:[#allocation31_spill] sm:$0xff] %v7469_v41  ;;  %v7481_v6 = vand.u32 4294901760, %v594_v40  ;;  %v605_v17 = vsub.f32 %v7453_v11, %v7469_v41 }
  0x41   : > { %535 = vmatprep.mubr.f32.mxu1 %v9218_v3  ;;  %1371 = vmatprep.mubr.f32.mxu0 %v9218_v3  ;;  %v7506_v50 = vand.u32 4294901760, %v7489_v63 }
  0x42   : > { %9345 = vst [vmem:[#allocation32_spill] sm:$0xff] %v7481_v6 }
  0x43   : > { %9348 = vst [vmem:[#allocation35_spill] sm:$0xff] %v7506_v50 }
  0x44   : > { %541 = vmatmul.mubr.f32.gmra.mrb[8].mxu1 %v7358_v4  ;;  %1375 = vmatmul.mubr.f32.gmra.mrb[10].mxu0 %v7340_v58  ;;  %v7501_v58 = vand.u32 4294901760, %v605_v17  ;;  %v627_v17 = vsub.f32 %v7489_v63, %v7506_v50 }
  0x45   : > { %546 = vmatprep.mubr.f32.mxu1 %v9218_v3  ;;  %1380 = vmatprep.mubr.f32.mxu0 %v9218_v3 }
  0x46   : > { %9347 = vst [vmem:[#allocation34_spill] sm:$0xff] %v7501_v58 }
  0x48   : > { %552 = vmatmul.mubr.f32.gmra.mrb[10].mxu1 %v7402_v31  ;;  %1384 = vmatmul.mubr.f32.gmra.mrb[12].mxu0 %v7363_v7  ;;  %v383_v7 = vsel %vm339_vm1, %v320_v54, 0  ;;  %v9349_v54 = vmov 0.0   ;;  %v7667_v31 = vand.u32 4294901760, %v7425_v55 }
  0x49   : > { %557 = vmatprep.mubr.f32.mxu1 %v9218_v3  ;;  %1389 = vmatprep.mubr.f32.mxu0 %v9218_v3 }
  0x4c   : > { %563 = vmatmul.mubr.f32.gmra.mrb[12].mxu1 %v7420_v49  ;;  %1393 = vmatmul.mubr.f32.gmra.mrb[14].mxu0 %v7398_v30  ;;  %v321_v30 = vld [vmem:[%s7245_s12 + $0x78] sm:$0xff]  ;;  %s6845_s12 = smul.u32 24, %s9505_s14 }
  0x4d   : > { %568 = vmatprep.mubr.f32.mxu1 %v9218_v3  ;;  %1398 = vmatprep.mubr.f32.mxu0 %v9218_v3  ;;  %v386_v40 = vsel %vm339_vm1, %v321_v30, 0  ;;  %s6846_s14 = smul.u32 24, %s7089_s21 }
  0x4e   : > { %s8346_s16 = scalar_lea.vmem %s9202_s2, %s6845_s12  ;;  %s8940_s12 = sand.u32 1, %s6102_s26  }
  0x4f   : > { %s5897_s13 = sadd.s32 %s6847_s17, %s6846_s14  ;;  %s9315_s21 = scalar_lea.sflag [#allocation5], %s8940_s12 }
  0x50   : > { %574 = vmatmul.mubr.f32.gmra.mrb[14].mxu1 %v7441_v1  ;;  %1402 = vmatmul.mubr.f32.gmra.mrb[16].mxu0 %v7430_v56  ;;  %v7486_v56 = vand.u32 4294901760, %v7472_v46  ;;  %s8944_s15 = sshll.u32 %s5897_s13, 7  ;;  %s7112_s26 = smov [#allocation4]  }
  0x51   : > { %579 = vmatprep.mubr.f32.mxu1 %v9218_v3  ;;  %1407 = vmatprep.mubr.f32.mxu0 %v9218_v3  ;;  %s8950_s30 = scalar_lea.hbm %s9204_s4, %s8944_s15  ;;  %s6955_s14 = sshll.u32 %s7112_s26, 4  ;;  %s6956_s14 = int_to_ptr.vmem [resolvable:$false] %s6955_s14 }
  0x52   : > { %9346 = vst [vmem:[#allocation33_spill] sm:$0xff] %v7486_v56  ;;  %v616_v16 = vsub.f32 %v7472_v46, %v7486_v56  ;;  %s6957_s17 = scalar_lea.vmem %s6956_s14, 6144  ;;  %p6958_p4 = scmp.lt.s32.totalorder %s8953_s0, %s6956_s14 }
  0x53   : > { %p6959_p5 = scmp.lt.s32.totalorder %s6957_s17, %s6951_s22 }
  0x54   : > { %585 = vmatmul.mubr.f32.gmra.mrb[16].mxu1 %v7464_v25  ;;  %1411 = vmatmul.mubr.f32.gmra.mrb[18].mxu0 %v7450_v10  ;;  %v7496_v10 = vsub.f32 %v380_v24, %v7477_v0  ;;  %v7512_v24 = vand.u32 4294901760, %v386_v40  ;;  %v7516_v30 = vand.u32 4294901760, %v616_v16  ;;  %v7533_v16 = vand.u32 4294901760, %v627_v17 }
  0x55   : > { %590 = vmatprep.mubr.f32.mxu1 %v9218_v3  ;;  %1416 = vmatprep.mubr.f32.mxu0 %v9218_v3  ;;  %v7508_v3 = vand.u32 4294901760, %v383_v7  ;;  %p6960_p6 = por %p6959_p5, %p6958_p4 }
  0x56   : > { %9350 = vst [vmem:[#allocation36_spill] sm:$0xff] %v7516_v30  ;;  %v7529_v38 = vsub.f32 %v386_v40, %v7512_v24  ;;  %9352 = vst [vmem:[#allocation38_spill] sm:$0xff] %v7533_v16 }
  0x57   : > { %v7524_v47 = vsub.f32 %v383_v7, %v7508_v3  ;;  %v7541_v7 = vand.u32 4294901760, %v7375_v13  ;;  %p6961_p7 = pnand %p6960_p6, %p6954_p2 }
  0x58   : > { %596 = vmatmul.mubr.f32.gmra.mrb[18].mxu1 %v7481_v6  ;;  %1420 = vmatmul.mubr.f32.gmra.mrb[20].mxu0 %v7469_v41  ;;  %v7521_v41 = vand.u32 4294901760, %v7496_v10  ;;  %v7546_v40 = vand.u32 4294901760, %v7529_v38 }
  0x59   : > { %601 = vmatprep.mubr.f32.mxu1 %v9349_v54  ;;  %1425 = vmatprep.mubr.f32.mxu0 %v9349_v54  ;;  %v7538_v33 = vand.u32 4294901760, %v7524_v47  ;;  %v7556_v32 = vsub.f32 %v7375_v13, %v7541_v7 }
  0x5a   : > { %9351 = vst [vmem:[#allocation37_spill] sm:$0xff] %v7521_v41  ;;  %9354 = vst [vmem:[#allocation40_spill] sm:$0xff] %v7546_v40 }
  0x5b   : > { %9353 = vst [vmem:[#allocation39_spill] sm:$0xff] %v7538_v33 }
  0x5c   : > { %607 = vmatmul.mubr.f32.gmra.mrb[20].mxu1 %v7501_v58  ;;  %1429 = vmatmul.mubr.f32.gmra.mrb[22].mxu0 %v7486_v56  ;;  %v638_v56 = vsub.f32 %v7496_v10, %v7521_v41  ;;  %v7577_v58 = vand.u32 4294901760, %v7381_v15 }
  0x5d   : > { %612 = vmatprep.mubr.f32.mxu1 %v9349_v54  ;;  %1434 = vmatprep.mubr.f32.mxu0 %v9349_v54 }
  0x5e   : > { %v7550_v17 = vand.u32 4294901760, %v638_v56 }
  0x60   : > { %618 = vmatmul.mubr.f32.gmra.mrb[22].mxu1 %v7516_v30  ;;  %1438 = vmatmul.mubr.f32.gmra.mrb[24].mxu0 %v7506_v50  ;;  %9355 = vst [vmem:[#allocation41_spill] sm:$0xff] %v7550_v17  ;;  %v649_v50 = vsub.f32 %v7524_v47, %v7538_v33  ;;  %v7559_v30 = vand.u32 4294901760, %v7378_v14 }
  0x61   : > { %623 = vmatprep.mubr.f32.mxu1 %v9349_v54  ;;  %1443 = vmatprep.mubr.f32.mxu0 %v9349_v54 }
  0x62   : > { %v7567_v56 = vand.u32 4294901760, %v649_v50  ;;  %v7574_v13 = vsub.f32 %v7378_v14, %v7559_v30  ;;  %v7592_v14 = vsub.f32 %v7381_v15, %v7577_v58 }
  0x64   : > { %629 = vmatmul.mubr.f32.gmra.mrb[24].mxu1 %v7533_v16  ;;  %1447 = vmatmul.mubr.f32.gmra.mrb[26].mxu0 %v7521_v41  ;;  %v660_v16 = vsub.f32 %v7529_v38, %v7546_v40  ;;  %9356 = vst [vmem:[#allocation42_spill] sm:$0xff] %v7567_v56  ;;  %v7570_v41 = vand.u32 4294901760, %v7556_v32 }
  0x65   : > { %634 = vmatprep.mubr.f32.mxu1 %v9349_v54  ;;  %1452 = vmatprep.mubr.f32.mxu0 %v9349_v54 }
  0x66   : > { %9357 = vst [vmem:[#allocation43_spill] sm:$0xff] %v7570_v41  ;;  %v7581_v6 = vand.u32 4294901760, %v660_v16  ;;  %v671_v50 = vsub.f32 %v7556_v32, %v7570_v41  ;;  %v7600_v16 = vand.u32 4294901760, %v7392_v21 }
  0x68   : > { %640 = vmatmul.mubr.f32.gmra.mrb[26].mxu1 %v7550_v17  ;;  %1456 = vmatmul.mubr.f32.gmra.mrb[28].mxu0 %v7538_v33  ;;  %9358 = vst [vmem:[#allocation44_spill] sm:$0xff] %v7581_v6  ;;  %v7588_v33 = vand.u32 4294901760, %v7574_v13  ;;  %v7595_v17 = vand.u32 4294901760, %v7389_v19 }
  0x69   : > { %645 = vmatprep.mubr.f32.mxu1 %v9349_v54  ;;  %1461 = vmatprep.mubr.f32.mxu0 %v9349_v54 }
  0x6a   : > { %9359 = vst [vmem:[#allocation45_spill] sm:$0xff] %v7588_v33  ;;  %v682_v15 = vsub.f32 %v7574_v13, %v7588_v33  ;;  %v7613_v25 = vsub.f32 %v7389_v19, %v7595_v17  ;;  %v7631_v19 = vsub.f32 %v7392_v21, %v7600_v16 }
  0x6c   : > { %651 = vmatmul.mubr.f32.gmra.mrb[28].mxu1 %v7567_v56  ;;  %1465 = vmatmul.mubr.f32.gmra.mrb[30].mxu0 %v7546_v40  ;;  %v7604_v40 = vand.u32 4294901760, %v671_v50  ;;  %v7609_v56 = vand.u32 4294901760, %v7592_v14  ;;  %v7622_v50 = vand.u32 4294901760, %v682_v15  ;;  %v7627_v1 = vand.u32 4294901760, %v7613_v25 }
  0x6d   : > { %656 = vmatprep.mubr.f32.mxu1 %v9349_v54  ;;  %1470 = vmatprep.mubr.f32.mxu0 %v9349_v54  ;;  %v7645_v49 = vand.u32 4294901760, %v7631_v19 }
  0x6e   : > { %9360 = vst [vmem:[#allocation46_spill] sm:$0xff] %v7604_v40  ;;  %9361 = vst [vmem:[#allocation47_spill] sm:$0xff] %v7609_v56 }
  0x6f   : > { %9362 = vst [vmem:[#allocation48_spill] sm:$0xff] %v7622_v50  ;;  %9363 = vst [vmem:[#allocation49_spill] sm:$0xff] %v7627_v1 }
  0x70   : > { %662 = vmatmul.mubr.f32.gmra.mrb[30].mxu1 %v7581_v6  ;;  %1474 = vmatmul.mubr.f32.gmra.mrb[32].mxu0 %v7570_v41  ;;  %v7618_v6 = vand.u32 4294901760, %v7410_v37  ;;  %v693_v41 = vsub.f32 %v7592_v14, %v7609_v56  ;;  %9365 = vst [vmem:[#allocation51_spill] sm:$0xff] %v7645_v49 }
  0x71   : > { %667 = vmatprep.mubr.f32.mxu1 %v9349_v54  ;;  %1479 = vmatprep.mubr.f32.mxu0 %v9349_v54 }
  0x72   : > { %v7640_v15 = vand.u32 4294901760, %v693_v41  ;;  %v7649_v21 = vsub.f32 %v7410_v37, %v7618_v6 }
  0x74   : > { %673 = vmatmul.mubr.f32.gmra.mrb[32].mxu1 %v7604_v40  ;;  %1483 = vmatmul.mubr.f32.gmra.mrb[34].mxu0 %v7588_v33  ;;  %v7636_v40 = vand.u32 4294901760, %v7418_v48  ;;  %9364 = vst [vmem:[#allocation50_spill] sm:$0xff] %v7640_v15  ;;  %v704_v33 = vsub.f32 %v7613_v25, %v7627_v1  ;;  %v7664_v37 = vand.u32 4294901760, %v7649_v21 }
  0x75   : > { %678 = vmatprep.mubr.f32.mxu1 %v9349_v54  ;;  %1488 = vmatprep.mubr.f32.mxu0 %v9349_v54 }
  0x76   : > { %v7659_v41 = vand.u32 4294901760, %v704_v33  ;;  %9367 = vst [vmem:[#allocation53_spill] sm:$0xff] %v7664_v37  ;;  %v726_v33 = vsub.f32 %v7649_v21, %v7664_v37 }
  0x78   : > { %684 = vmatmul.mubr.f32.gmra.mrb[34].mxu1 %v7622_v50  ;;  %1492 = vmatmul.mubr.f32.gmra.mrb[36].mxu0 %v7609_v56  ;;  %v7655_v50 = vsub.f32 %v7418_v48, %v7636_v40  ;;  %9366 = vst [vmem:[#allocation52_spill] sm:$0xff] %v7659_v41  ;;  %v715_v56 = vsub.f32 %v7631_v19, %v7645_v49 }
  0x79   : > { %689 = vmatprep.mubr.f32.mxu1 %v9349_v54  ;;  %1497 = vmatprep.mubr.f32.mxu0 %v9349_v54 }
  0x7a   : > { %v7673_v48 = vand.u32 4294901760, %v715_v56  ;;  %v7688_v56 = vand.u32 4294901760, %v726_v33 }
  0x7c   : > { %695 = vmatmul.mubr.f32.gmra.mrb[36].mxu1 %v7640_v15  ;;  %1501 = vmatmul.mubr.f32.gmra.mrb[38].mxu0 %v7627_v1  ;;  %9368 = vst [vmem:[#allocation54_spill] sm:$0xff] %v7673_v48  ;;  %v7678_v1 = vand.u32 4294901760, %v7655_v50  ;;  %v7682_v15 = vsub.f32 %v7425_v55, %v7667_v31  ;;  %9370 = vst [vmem:[#allocation56_spill] sm:$0xff] %v7688_v56  ;;  %v7700_v55 = vld [vmem:[%s9320_s1 + $0x10] sm:$0xff] }
  0x7d   : > { %700 = vmatprep.mubr.f32.mxu1 %v9349_v54  ;;  %1506 = vmatprep.mubr.f32.mxu0 %v9349_v54  ;;  %v338_v4 = vcombine.high %v7700_v55, %v7700_v55 }
  0x7e   : > { %9369 = vst [vmem:[#allocation55_spill] sm:$0xff] %v7678_v1 }
  0x80   : > { %706 = vmatmul.mubr.f32.gmra.mrb[38].mxu1 %v7659_v41  ;;  %1510 = vmatmul.mubr.f32.gmra.mrb[40].mxu0 %v7645_v49  ;;  %v737_v49 = vsub.f32 %v7655_v50, %v7678_v1  ;;  %v7693_v41 = vand.u32 4294901760, %v7682_v15 }
  0x81   : > { %711 = vmatprep.mubr.f32.mxu1 %v9349_v54  ;;  %1515 = vmatprep.mubr.f32.mxu0 %v9349_v54 }
  0x82   : > { %9371 = vst [vmem:[#allocation57_spill] sm:$0xff] %v7693_v41  ;;  %v7704_v33 = vand.u32 4294901760, %v737_v49 }
  0x84   : > { %717 = vmatmul.mubr.f32.gmra.mrb[40].mxu1 %v7673_v48  ;;  %1519 = vmatmul.mubr.f32.gmra.mrb[42].mxu0 %v7664_v37  ;;  %v748_v37 = vsub.f32 %v7682_v15, %v7693_v41  ;;  %v7711_v48 = vld [vmem:[%s9320_s1 + $0x8] sm:$0xff] }
  0x85   : > { %722 = vmatprep.mubr.f32.mxu1 %v9349_v54  ;;  %1524 = vmatprep.mubr.f32.mxu0 %v9349_v54 }
  0x86   : > { %v7721_v49 = vand.u32 4294901760, %v748_v37 }
  0x88   : > { %728 = vmatmul.mubr.f32.gmra.mrb[42].mxu1 %v7688_v56  ;;  %1528 = vmatmul.mubr.f32.gmra.mrb[44].mxu0 %v7678_v1  ;;  %v337_v1 = vcombine.high %v7711_v48, %v7711_v48  ;;  %v7724_v56 = vsel %vm412_vm0, %v338_v4, 0 }
  0x89   : > { %733 = vmatprep.mubr.f32.mxu1 %v9349_v54  ;;  %1533 = vmatprep.mubr.f32.mxu0 %v9349_v54  ;;  %v7732_v53 = vand.u32 4294901760, %v7724_v56 }
  0x8a   : > { %v7729_v61 = vsel %vm412_vm0, %v337_v1, 0 }
  0x8b   : > { %9372 = vst [vmem:[#allocation58_spill] sm:$0xff] %v7732_v53  ;;  %v7740_v4 = vand.u32 4294901760, %v7729_v61 }
  0x8c   : > { %739 = vmatmul.mubr.f32.gmra.mrb[44].mxu1 %v7704_v33  ;;  %1537 = vmatmul.mubr.f32.gmra.mrb[46].mxu0 %v7693_v41  ;;  %v7856_v41 = vsel %vm412_vm0, %v7711_v48, 0 }
  0x8d   : > { %744 = vmatprep.mubr.f32.mxu1 %v9349_v54  ;;  %1613 = vmatprep.mubr.f32.mxu0 %v9349_v54  ;;  %9373 = vst [vmem:[#allocation59_spill] sm:$0xff] %v7740_v4 }
  0x90   : > { %750 = vmatmul.mubr.f32.gmra.mrb[46].mxu1 %v7721_v49  ;;  %1615 = vmatmul.mubr.f32.vlgmr.msra.gmra.mrb[0].mxu0 %v7256_v20 }
  0x91   : > { %830 = vmatprep.mubr.f32.mxu1 %v9349_v54  ;;  %1620 = vmatprep.mubr.f32.mxu0 %v9349_v54 }
  0x92   : > { %1785 = vmatpush1.msra.mxu0 %v7232_v5  ;;  %v7827_v5 = vsub.f32 %v7724_v56, %v7732_v53  ;;  %v7845_v56 = vsel %vm412_vm0, %v7700_v55, 0 }
  0x93   : > { %3610 = vmatprep.subr.mxu0 %v7732_v53  ;;  %v7859_v37 = vand.u32 4294901760, %v7845_v56  ;;  %v7869_v53 = vand.u32 4294901760, %v7856_v41 }
  0x94   : > { %832 = vmatmul.mubr.f32.vlgmr.msra.gmra.mrb[0].mxu1 %v7256_v20  ;;  %1622 = vmatmul.mubr.f32.gmra.mrb[2].mxu0 %v7258_v22  ;;  %v9298_v1 = vand.u32 4294901760, %v7827_v5 }
  0x95   : > { %1004 = vmatpush1.msra.mxu1 %v7238_v8  ;;  %837 = vmatprep.mubr.f32.mxu1 %v9349_v54  ;;  %v7835_v8 = vsub.f32 %v7729_v61, %v7740_v4 }
  0x96   : > { %1627 = vmatprep.mubr.f32.mxu0 %v9349_v54  ;;  %2018 = vmatprep.subr.mxu1 %v7740_v4  ;;  %v3943_v61 = vsub.f32 %v7827_v5, %v9298_v1 }
  0x97   : > { %v9374_v55 = vand.u32 4294901760, %v7835_v8 }
  0x98   : > { %839 = vmatmul.mubr.f32.gmra.mrb[2].mxu1 %v7258_v22  ;;  %1629 = vmatmul.mubr.f32.gmra.mrb[4].mxu0 %v7260_v23  ;;  %v3944_v1 = vand.u32 4294901760, %v3943_v61 }
  0x99   : > { %844 = vmatprep.mubr.f32.mxu1 %v9349_v54  ;;  %1634 = vmatprep.mubr.f32.mxu0 %v9349_v54  ;;  %v2351_v4 = vsub.f32 %v7835_v8, %v9374_v55 }
  0x9b   : > { %v2352_v48 = vand.u32 4294901760, %v2351_v4  ;;  %v7955_v4 = vsub.f32 %v7845_v56, %v7859_v37 }
  0x9c   : > { %846 = vmatmul.mubr.f32.gmra.mrb[4].mxu1 %v7260_v23  ;;  %1636 = vmatmul.mubr.f32.gmra.mrb[6].mxu0 %v7273_v29 }
  0x9d   : > { %851 = vmatprep.mubr.f32.mxu1 %v9349_v54  ;;  %1641 = vmatprep.mubr.f32.mxu0 %v9349_v54  ;;  %v9301_v61 = vand.u32 4294901760, %v7955_v4 }
  0xa0   : > { %853 = vmatmul.mubr.f32.gmra.mrb[6].mxu1 %v7273_v29  ;;  %1643 = vmatmul.mubr.f32.gmra.mrb[8].mxu0 %v7283_v34 }
  0xa1   : > { %858 = vmatprep.mubr.f32.mxu1 %v9349_v54  ;;  %1648 = vmatprep.mubr.f32.mxu0 %v9349_v54 }
  0xa4   : > { %860 = vmatmul.mubr.f32.gmra.mrb[8].mxu1 %v7283_v34  ;;  %1650 = vmatmul.mubr.f32.gmra.mrb[10].mxu0 %v7304_v44 }
  0xa5   : > { %865 = vmatprep.mubr.f32.mxu1 %v9349_v54  ;;  %1655 = vmatprep.mubr.f32.mxu0 %v9349_v54 }
  0xa8   : > { %867 = vmatmul.mubr.f32.gmra.mrb[10].mxu1 %v7304_v44  ;;  %1657 = vmatmul.mubr.f32.gmra.mrb[12].mxu0 %v7325_v52 }
  0xa9   : > { %872 = vmatprep.mubr.f32.mxu1 %v9349_v54  ;;  %1662 = vmatprep.mubr.f32.mxu0 %v9349_v54 }
  0xac   : > { %874 = vmatmul.mubr.f32.gmra.mrb[12].mxu1 %v7325_v52  ;;  %1664 = vmatmul.mubr.f32.gmra.mrb[14].mxu0 %v7345_v60 }
  0xad   : > { %879 = vmatprep.mubr.f32.mxu1 %v9349_v54  ;;  %1669 = vmatprep.mubr.f32.mxu0 %v9349_v54 }
  0xb0   : > { %881 = vmatmul.mubr.f32.gmra.mrb[14].mxu1 %v7345_v60  ;;  %1671 = vmatmul.mubr.f32.gmra.mrb[16].mxu0 %v7372_v12 }
  0xb1   : > { %886 = vmatprep.mubr.f32.mxu1 %v9349_v54  ;;  %1676 = vmatprep.mubr.f32.mxu0 %v9349_v54 }
  0xb4   : > { %888 = vmatmul.mubr.f32.gmra.mrb[16].mxu1 %v7372_v12  ;;  %1678 = vmatmul.mubr.f32.gmra.mrb[18].mxu0 %v7407_v36 }
  0xb5   : > { %893 = vmatprep.mubr.f32.mxu1 %v9349_v54  ;;  %1683 = vmatprep.mubr.f32.mxu0 %v9349_v54 }
  0xb8   : > { %895 = vmatmul.mubr.f32.gmra.mrb[18].mxu1 %v7407_v36  ;;  %1685 = vmatmul.mubr.f32.gmra.mrb[20].mxu0 %v7435_v62 }
  0xb9   : > { %900 = vmatprep.mubr.f32.mxu1 %v9349_v54  ;;  %1690 = vmatprep.mubr.f32.mxu0 %v9349_v54 }
  0xbc   : > { %902 = vmatmul.mubr.f32.gmra.mrb[20].mxu1 %v7435_v62  ;;  %1692 = vmatmul.mubr.f32.gmra.mrb[22].mxu0 %v7443_v2 }
  0xbd   : > { %907 = vmatprep.mubr.f32.mxu1 %v9349_v54  ;;  %1697 = vmatprep.mubr.f32.mxu0 %v9349_v54 }
  0xc0   : > { %909 = vmatmul.mubr.f32.gmra.mrb[22].mxu1 %v7443_v2  ;;  %1699 = vmatmul.mubr.f32.gmra.mrb[24].mxu0 %v7459_v18 }
  0xc1   : > { %914 = vmatprep.mubr.f32.mxu1 %v9349_v54  ;;  %1704 = vmatprep.mubr.f32.mxu0 %v9349_v54 }
  0xc4   : > { %916 = vmatmul.mubr.f32.gmra.mrb[24].mxu1 %v7459_v18  ;;  %1706 = vmatmul.mubr.f32.gmra.mrb[26].mxu0 %v7477_v0 }
  0xc5   : > { %921 = vmatprep.mubr.f32.mxu1 %v9349_v54  ;;  %1711 = vmatprep.mubr.f32.mxu0 %v9349_v54 }
  0xc8   : > { %923 = vmatmul.mubr.f32.gmra.mrb[26].mxu1 %v7477_v0  ;;  %1713 = vmatmul.mubr.f32.gmra.mrb[28].mxu0 %v7508_v3 }
  0xc9   : > { %928 = vmatprep.mubr.f32.mxu1 %v9349_v54  ;;  %1718 = vmatprep.mubr.f32.mxu0 %v9349_v54 }
  0xcc   : > { %930 = vmatmul.mubr.f32.gmra.mrb[28].mxu1 %v7508_v3  ;;  %1720 = vmatmul.mubr.f32.gmra.mrb[30].mxu0 %v7512_v24 }
  0xcd   : > { %935 = vmatprep.mubr.f32.mxu1 %v9349_v54  ;;  %1725 = vmatprep.mubr.f32.mxu0 %v9349_v54 }
  0xd0   : > { %937 = vmatmul.mubr.f32.gmra.mrb[30].mxu1 %v7512_v24  ;;  %1727 = vmatmul.mubr.f32.gmra.mrb[32].mxu0 %v7541_v7 }
  0xd1   : > { %942 = vmatprep.mubr.f32.mxu1 %v9349_v54  ;;  %1732 = vmatprep.mubr.f32.mxu0 %v9349_v54 }
  0xd4   : > { %944 = vmatmul.mubr.f32.gmra.mrb[32].mxu1 %v7541_v7  ;;  %1734 = vmatmul.mubr.f32.gmra.mrb[34].mxu0 %v7559_v30 }
  0xd5   : > { %949 = vmatprep.mubr.f32.mxu1 %v9349_v54  ;;  %1739 = vmatprep.mubr.f32.mxu0 %v9349_v54 }
  0xd8   : > { %951 = vmatmul.mubr.f32.gmra.mrb[34].mxu1 %v7559_v30  ;;  %1741 = vmatmul.mubr.f32.gmra.mrb[36].mxu0 %v7577_v58 }
  0xd9   : > { %956 = vmatprep.mubr.f32.mxu1 %v9349_v54  ;;  %1746 = vmatprep.mubr.f32.mxu0 %v9349_v54 }
  0xdc   : > { %958 = vmatmul.mubr.f32.gmra.mrb[36].mxu1 %v7577_v58  ;;  %1748 = vmatmul.mubr.f32.gmra.mrb[38].mxu0 %v7595_v17 }
  0xdd   : > { %963 = vmatprep.mubr.f32.mxu1 %v9349_v54  ;;  %1753 = vmatprep.mubr.f32.mxu0 %v9349_v54 }
  0xe0   : > { %965 = vmatmul.mubr.f32.gmra.mrb[38].mxu1 %v7595_v17  ;;  %1755 = vmatmul.mubr.f32.gmra.mrb[40].mxu0 %v7600_v16 }
  0xe1   : > { %970 = vmatprep.mubr.f32.mxu1 %v9349_v54  ;;  %1760 = vmatprep.mubr.f32.mxu0 %v9349_v54 }
  0xe4   : > { %972 = vmatmul.mubr.f32.gmra.mrb[40].mxu1 %v7600_v16  ;;  %1762 = vmatmul.mubr.f32.gmra.mrb[42].mxu0 %v7618_v6 }
  0xe5   : > { %977 = vmatprep.mubr.f32.mxu1 %v9349_v54  ;;  %1767 = vmatprep.mubr.f32.mxu0 %v9349_v54 }
  0xe8   : > { %979 = vmatmul.mubr.f32.gmra.mrb[42].mxu1 %v7618_v6  ;;  %1769 = vmatmul.mubr.f32.gmra.mrb[44].mxu0 %v7636_v40 }
  0xe9   : > { %984 = vmatprep.mubr.f32.mxu1 %v9349_v54  ;;  %1774 = vmatprep.mubr.f32.mxu0 %v9349_v54 }
  0xec   : > { %986 = vmatmul.mubr.f32.gmra.mrb[44].mxu1 %v7636_v40  ;;  %1776 = vmatmul.mubr.f32.gmra.mrb[46].mxu0 %v7667_v31 }
  0xed   : > { %991 = vmatprep.mubr.f32.mxu1 %v9349_v54  ;;  %1848 = vmatprep.mubr.f32.mxu0 %v9349_v54 }
  0xf0   : > { %993 = vmatmul.mubr.f32.gmra.mrb[46].mxu1 %v7667_v31  ;;  %1850 = vmatmul.mubr.f32.vlgmr.msra.gmra.mrb[0].mxu0 %v7256_v20 }
  0xf1   : > { %1067 = vmatprep.mubr.f32.mxu1 %v9349_v54  ;;  %1855 = vmatprep.mubr.f32.mxu0 %v9349_v54 }
  0xf2   : > { %3612 = vmatpush1.msra.mxu0 %v7859_v37 }
  0xf3   : > { %3945 = vmatprep.subr.mxu0 %v3944_v1  ;;  %v7961_v1 = vsub.f32 %v7856_v41, %v7869_v53  ;;  %v3949_v41 = vsub.f32 %v7955_v4, %v9301_v61 }
  0xf4   : > { %1070 = vmatmul.mubr.f32.vlgmr.msra.gmra.mrb[0].mxu1 %v7265_v26  ;;  %1857 = vmatmul.mubr.f32.gmra.mrb[2].mxu0 %v7258_v22 }
  0xf5   : > { %2020 = vmatpush1.msra.mxu1 %v7869_v53  ;;  %1075 = vmatprep.mubr.f32.mxu1 %v9349_v54  ;;  %v9302_v56 = vand.u32 4294901760, %v7961_v1 }
  0xf6   : > { %1862 = vmatprep.mubr.f32.mxu0 %v9349_v54  ;;  %2353 = vmatprep.subr.mxu1 %v2352_v48  ;;  %v3950_v48 = vand.u32 4294901760, %v3949_v41  ;;  %v9375_v41 = vld [vmem:[#allocation19_spill] sm:$0xff] }
  0xf7   : > { %v2357_v55 = vsub.f32 %v7961_v1, %v9302_v56 }
  0xf8   : > { %1078 = vmatmul.mubr.f32.gmra.mrb[2].mxu1 %v7268_v27  ;;  %1864 = vmatmul.mubr.f32.gmra.mrb[4].mxu0 %v7260_v23 }
  0xf9   : > { %1083 = vmatprep.mubr.f32.mxu1 %v9349_v54  ;;  %1869 = vmatprep.mubr.f32.mxu0 %v9349_v54  ;;  %v2358_v61 = vand.u32 4294901760, %v2357_v55  ;;  %v9379_v55 = vld [vmem:[#allocation26_spill] sm:$0xff] }
  0xfc   : > { %1086 = vmatmul.mubr.f32.gmra.mrb[4].mxu1 %v7271_v28  ;;  %1871 = vmatmul.mubr.f32.gmra.mrb[6].mxu0 %v7273_v29 }
  0xfd   : > { %1091 = vmatprep.mubr.f32.mxu1 %v9349_v54  ;;  %1876 = vmatprep.mubr.f32.mxu0 %v9349_v54 }
 0x100   : > { %1094 = vmatmul.mubr.f32.gmra.mrb[6].mxu1 %v7295_v39  ;;  %1878 = vmatmul.mubr.f32.gmra.mrb[8].mxu0 %v7283_v34 }
 0x101   : > { %1099 = vmatprep.mubr.f32.mxu1 %v9349_v54  ;;  %1883 = vmatprep.mubr.f32.mxu0 %v9349_v54 }
 0x104   : > { %1102 = vmatmul.mubr.f32.gmra.mrb[8].mxu1 %v7302_v43  ;;  %1885 = vmatmul.mubr.f32.gmra.mrb[10].mxu0 %v7304_v44 }
 0x105   : > { %1107 = vmatprep.mubr.f32.mxu1 %v9349_v54  ;;  %1890 = vmatprep.mubr.f32.mxu0 %v9349_v54 }
 0x108   : > { %1110 = vmatmul.mubr.f32.gmra.mrb[10].mxu1 %v7323_v51  ;;  %1892 = vmatmul.mubr.f32.gmra.mrb[12].mxu0 %v7325_v52 }
 0x109   : > { %1115 = vmatprep.mubr.f32.mxu1 %v9349_v54  ;;  %1897 = vmatprep.mubr.f32.mxu0 %v9349_v54 }
 0x10c   : > { %1118 = vmatmul.mubr.f32.gmra.mrb[12].mxu1 %v7343_v59  ;;  %1899 = vmatmul.mubr.f32.gmra.mrb[14].mxu0 %v7345_v60 }
 0x10d   : > { %1123 = vmatprep.mubr.f32.mxu1 %v9349_v54  ;;  %1904 = vmatprep.mubr.f32.mxu0 %v9349_v54 }
 0x110   : > { %1126 = vmatmul.mubr.f32.gmra.mrb[14].mxu1 %v7366_v9  ;;  %1906 = vmatmul.mubr.f32.gmra.mrb[16].mxu0 %v7372_v12 }
 0x111   : > { %1131 = vmatprep.mubr.f32.mxu1 %v9349_v54  ;;  %1911 = vmatprep.mubr.f32.mxu0 %v9349_v54 }
 0x114   : > { %1134 = vmatmul.mubr.f32.gmra.mrb[16].mxu1 %v7405_v35  ;;  %1913 = vmatmul.mubr.f32.gmra.mrb[18].mxu0 %v7407_v36 }
 0x115   : > { %1139 = vmatprep.mubr.f32.mxu1 %v9349_v54  ;;  %1918 = vmatprep.mubr.f32.mxu0 %v9349_v54 }
 0x118   : > { %1142 = vmatmul.mubr.f32.gmra.mrb[18].mxu1 %v7433_v57  ;;  %1920 = vmatmul.mubr.f32.gmra.mrb[20].mxu0 %v7435_v62 }
 0x119   : > { %1147 = vmatprep.mubr.f32.mxu1 %v9349_v54  ;;  %1925 = vmatprep.mubr.f32.mxu0 %v9349_v54 }
 0x11c   : > { %1150 = vmatmul.mubr.f32.gmra.mrb[20].mxu1 %v7453_v11  ;;  %1927 = vmatmul.mubr.f32.gmra.mrb[22].mxu0 %v7443_v2 }
 0x11d   : > { %1155 = vmatprep.mubr.f32.mxu1 %v9349_v54  ;;  %1932 = vmatprep.mubr.f32.mxu0 %v9349_v54 }
 0x120   : > { %1158 = vmatmul.mubr.f32.gmra.mrb[22].mxu1 %v7472_v46  ;;  %1934 = vmatmul.mubr.f32.gmra.mrb[24].mxu0 %v7459_v18 }
 0x121   : > { %1163 = vmatprep.mubr.f32.mxu1 %v9349_v54  ;;  %1939 = vmatprep.mubr.f32.mxu0 %v9349_v54 }
 0x124   : > { %1166 = vmatmul.mubr.f32.gmra.mrb[24].mxu1 %v7489_v63  ;;  %1941 = vmatmul.mubr.f32.gmra.mrb[26].mxu0 %v7477_v0 }
 0x125   : > { %1171 = vmatprep.mubr.f32.mxu1 %v9349_v54  ;;  %1946 = vmatprep.mubr.f32.mxu0 %v9349_v54 }
 0x128   : > { %1174 = vmatmul.mubr.f32.gmra.mrb[26].mxu1 %v7496_v10  ;;  %1948 = vmatmul.mubr.f32.gmra.mrb[28].mxu0 %v7508_v3 }
 0x129   : > { %1179 = vmatprep.mubr.f32.mxu1 %v9349_v54  ;;  %1953 = vmatprep.mubr.f32.mxu0 %v9349_v54 }
 0x12c   : > { %1182 = vmatmul.mubr.f32.gmra.mrb[28].mxu1 %v7524_v47  ;;  %1955 = vmatmul.mubr.f32.gmra.mrb[30].mxu0 %v7512_v24 }
 0x12d   : > { %1187 = vmatprep.mubr.f32.mxu1 %v9349_v54  ;;  %1960 = vmatprep.mubr.f32.mxu0 %v9349_v54 }
 0x130   : > { %1190 = vmatmul.mubr.f32.gmra.mrb[30].mxu1 %v7529_v38  ;;  %1962 = vmatmul.mubr.f32.gmra.mrb[32].mxu0 %v7541_v7 }
 0x131   : > { %1195 = vmatprep.mubr.f32.mxu1 %v9349_v54  ;;  %1967 = vmatprep.mubr.f32.mxu0 %v9349_v54 }
 0x134   : > { %1198 = vmatmul.mubr.f32.gmra.mrb[32].mxu1 %v7556_v32  ;;  %1969 = vmatmul.mubr.f32.gmra.mrb[34].mxu0 %v7559_v30 }
 0x135   : > { %1203 = vmatprep.mubr.f32.mxu1 %v9349_v54  ;;  %1974 = vmatprep.mubr.f32.mxu0 %v9349_v54 }
 0x138   : > { %1206 = vmatmul.mubr.f32.gmra.mrb[34].mxu1 %v7574_v13  ;;  %1976 = vmatmul.mubr.f32.gmra.mrb[36].mxu0 %v7577_v58 }
 0x139   : > { %1211 = vmatprep.mubr.f32.mxu1 %v9349_v54  ;;  %1981 = vmatprep.mubr.f32.mxu0 %v9349_v54 }
 0x13c   : > { %1214 = vmatmul.mubr.f32.gmra.mrb[36].mxu1 %v7592_v14  ;;  %1983 = vmatmul.mubr.f32.gmra.mrb[38].mxu0 %v7595_v17 }
 0x13d   : > { %1219 = vmatprep.mubr.f32.mxu1 %v9349_v54  ;;  %1988 = vmatprep.mubr.f32.mxu0 %v9349_v54 }
 0x140   : > { %1222 = vmatmul.mubr.f32.gmra.mrb[38].mxu1 %v7613_v25  ;;  %1990 = vmatmul.mubr.f32.gmra.mrb[40].mxu0 %v7600_v16 }
 0x141   : > { %1227 = vmatprep.mubr.f32.mxu1 %v9349_v54  ;;  %1995 = vmatprep.mubr.f32.mxu0 %v9349_v54 }
 0x144   : > { %1230 = vmatmul.mubr.f32.gmra.mrb[40].mxu1 %v7631_v19  ;;  %1997 = vmatmul.mubr.f32.gmra.mrb[42].mxu0 %v7618_v6 }
 0x145   : > { %1235 = vmatprep.mubr.f32.mxu1 %v9349_v54  ;;  %2002 = vmatprep.mubr.f32.mxu0 %v9349_v54 }
 0x148   : > { %1238 = vmatmul.mubr.f32.gmra.mrb[42].mxu1 %v7649_v21  ;;  %2004 = vmatmul.mubr.f32.gmra.mrb[44].mxu0 %v7636_v40 }
 0x149   : > { %1243 = vmatprep.mubr.f32.mxu1 %v9349_v54  ;;  %2009 = vmatprep.mubr.f32.mxu0 %v9349_v54 }
 0x14c   : > { %1246 = vmatmul.mubr.f32.gmra.mrb[44].mxu1 %v7655_v50  ;;  %2011 = vmatmul.mubr.f32.gmra.mrb[46].mxu0 %v7667_v31 }
 0x14d   : > { %1251 = vmatprep.mubr.f32.mxu1 %v9349_v54  ;;  %3675 = vmatprep.mubr.f32.mxu0 %v9349_v54 }
 0x150   : > { %1254 = vmatmul.mubr.f32.gmra.mrb[46].mxu1 %v7682_v15  ;;  %3681 = vmatmul.mubr.f32.vlgmr.msra.gmra.mrb[48].mxu0 %v7299_v42 }
 0x151   : > { %2083 = vmatprep.mubr.f32.mxu1 %v9349_v54  ;;  %3686 = vmatprep.mubr.f32.mxu0 %v9349_v54 }
 0x152   : > { %3951 = vmatpush1.msra.mxu0 %v3950_v48  ;;  %v9380_v48 = vld [vmem:[#allocation28_spill] sm:$0xff] }
 0x153   : > { %4185 = vmatprep.subr.mxu0 %v7827_v5 }
 0x154   : > { %2089 = vmatmul.mubr.f32.vlgmr.msra.gmra.mrb[48].mxu1 %v7299_v42  ;;  %3692 = vmatmul.mubr.f32.gmra.mrb[50].mxu0 %v7308_v45  ;;  %v9376_v42 = vld [vmem:[#allocation21_spill] sm:$0xff] }
 0x155   : > { %2359 = vmatpush1.msra.mxu1 %v2358_v61  ;;  %2094 = vmatprep.mubr.f32.mxu1 %v9349_v54  ;;  %v9377_v61 = vld [vmem:[#allocation22_spill] sm:$0xff] }
 0x156   : > { %3697 = vmatprep.mubr.f32.mxu0 %v9349_v54  ;;  %2593 = vmatprep.subr.mxu1 %v7835_v8 }
 0x158   : > { %2100 = vmatmul.mubr.f32.gmra.mrb[50].mxu1 %v7308_v45  ;;  %3703 = vmatmul.mubr.f32.gmra.mrb[52].mxu0 %v9375_v41  ;;  %v9378_v45 = vld [vmem:[#allocation25_spill] sm:$0xff] }
 0x159   : > { %2105 = vmatprep.mubr.f32.mxu1 %v9349_v54  ;;  %3708 = vmatprep.mubr.f32.mxu0 %v9349_v54 }
 0x15c   : > { %2111 = vmatmul.mubr.f32.gmra.mrb[52].mxu1 %v9375_v41  ;;  %3714 = vmatmul.mubr.f32.gmra.mrb[54].mxu0 %v9376_v42  ;;  %v9381_v41 = vld [vmem:[#allocation30_spill] sm:$0xff] }
 0x15d   : > { %2116 = vmatprep.mubr.f32.mxu1 %v9349_v54  ;;  %3719 = vmatprep.mubr.f32.mxu0 %v9349_v54 }
 0x160   : > { %2122 = vmatmul.mubr.f32.gmra.mrb[54].mxu1 %v9376_v42  ;;  %3725 = vmatmul.mubr.f32.gmra.mrb[56].mxu0 %v9377_v61  ;;  %v9382_v42 = vld [vmem:[#allocation32_spill] sm:$0xff] }
 0x161   : > { %2127 = vmatprep.mubr.f32.mxu1 %v9349_v54  ;;  %3730 = vmatprep.mubr.f32.mxu0 %v9349_v54 }
 0x164   : > { %2133 = vmatmul.mubr.f32.gmra.mrb[56].mxu1 %v9377_v61  ;;  %3736 = vmatmul.mubr.f32.gmra.mrb[58].mxu0 %v9378_v45  ;;  %v9383_v61 = vld [vmem:[#allocation34_spill] sm:$0xff] }
 0x165   : > { %2138 = vmatprep.mubr.f32.mxu1 %v9349_v54  ;;  %3741 = vmatprep.mubr.f32.mxu0 %v9349_v54 }
 0x168   : > { %2144 = vmatmul.mubr.f32.gmra.mrb[58].mxu1 %v9378_v45  ;;  %3747 = vmatmul.mubr.f32.gmra.mrb[60].mxu0 %v9379_v55  ;;  %v9384_v45 = vld [vmem:[#allocation36_spill] sm:$0xff] }
 0x169   : > { %2149 = vmatprep.mubr.f32.mxu1 %v9349_v54  ;;  %3752 = vmatprep.mubr.f32.mxu0 %v9349_v54 }
 0x16c   : > { %2155 = vmatmul.mubr.f32.gmra.mrb[60].mxu1 %v9379_v55  ;;  %3758 = vmatmul.mubr.f32.gmra.mrb[62].mxu0 %v9380_v48  ;;  %v9385_v55 = vld [vmem:[#allocation38_spill] sm:$0xff] }
 0x16d   : > { %2160 = vmatprep.mubr.f32.mxu1 %v9349_v54  ;;  %3763 = vmatprep.mubr.f32.mxu0 %v9349_v54 }
 0x170   : > { %2166 = vmatmul.mubr.f32.gmra.mrb[62].mxu1 %v9380_v48  ;;  %3769 = vmatmul.mubr.f32.gmra.mrb[64].mxu0 %v9381_v41  ;;  %v9386_v48 = vld [vmem:[#allocation41_spill] sm:$0xff] }
 0x171   : > { %2171 = vmatprep.mubr.f32.mxu1 %v9349_v54  ;;  %3774 = vmatprep.mubr.f32.mxu0 %v9349_v54 }
 0x174   : > { %2177 = vmatmul.mubr.f32.gmra.mrb[64].mxu1 %v9381_v41  ;;  %3780 = vmatmul.mubr.f32.gmra.mrb[66].mxu0 %v9382_v42  ;;  %v9387_v41 = vld [vmem:[#allocation42_spill] sm:$0xff] }
 0x175   : > { %2182 = vmatprep.mubr.f32.mxu1 %v9349_v54  ;;  %3785 = vmatprep.mubr.f32.mxu0 %v9349_v54 }
 0x178   : > { %2188 = vmatmul.mubr.f32.gmra.mrb[66].mxu1 %v9382_v42  ;;  %3791 = vmatmul.mubr.f32.gmra.mrb[68].mxu0 %v9383_v61  ;;  %v9388_v42 = vld [vmem:[#allocation44_spill] sm:$0xff] }
 0x179   : > { %2193 = vmatprep.mubr.f32.mxu1 %v9349_v54  ;;  %3796 = vmatprep.mubr.f32.mxu0 %v9349_v54 }
 0x17c   : > { %2199 = vmatmul.mubr.f32.gmra.mrb[68].mxu1 %v9383_v61  ;;  %3802 = vmatmul.mubr.f32.gmra.mrb[70].mxu0 %v9384_v45  ;;  %v9389_v61 = vld [vmem:[#allocation46_spill] sm:$0xff] }
 0x17d   : > { %2204 = vmatprep.mubr.f32.mxu1 %v9349_v54  ;;  %3807 = vmatprep.mubr.f32.mxu0 %v9349_v54 }
 0x180   : > { %2210 = vmatmul.mubr.f32.gmra.mrb[70].mxu1 %v9384_v45  ;;  %3813 = vmatmul.mubr.f32.gmra.mrb[72].mxu0 %v9385_v55  ;;  %v9390_v45 = vld [vmem:[#allocation48_spill] sm:$0xff] }
 0x181   : > { %2215 = vmatprep.mubr.f32.mxu1 %v9349_v54  ;;  %3818 = vmatprep.mubr.f32.mxu0 %v9349_v54 }
 0x184   : > { %2221 = vmatmul.mubr.f32.gmra.mrb[72].mxu1 %v9385_v55  ;;  %3824 = vmatmul.mubr.f32.gmra.mrb[74].mxu0 %v9386_v48  ;;  %v9391_v55 = vld [vmem:[#allocation50_spill] sm:$0xff] }
 0x185   : > { %2226 = vmatprep.mubr.f32.mxu1 %v9349_v54  ;;  %3829 = vmatprep.mubr.f32.mxu0 %v9349_v54 }
 0x188   : > { %2232 = vmatmul.mubr.f32.gmra.mrb[74].mxu1 %v9386_v48  ;;  %3835 = vmatmul.mubr.f32.gmra.mrb[76].mxu0 %v9387_v41  ;;  %v9392_v48 = vld [vmem:[#allocation52_spill] sm:$0xff] }
 0x189   : > { %2237 = vmatprep.mubr.f32.mxu1 %v9349_v54  ;;  %3840 = vmatprep.mubr.f32.mxu0 %v9349_v54 }
 0x18c   : > { %2243 = vmatmul.mubr.f32.gmra.mrb[76].mxu1 %v9387_v41  ;;  %3846 = vmatmul.mubr.f32.gmra.mrb[78].mxu0 %v9388_v42  ;;  %v9393_v41 = vld [vmem:[#allocation54_spill] sm:$0xff] }
 0x18d   : > { %2248 = vmatprep.mubr.f32.mxu1 %v9349_v54  ;;  %3851 = vmatprep.mubr.f32.mxu0 %v9349_v54 }
 0x190   : > { %2254 = vmatmul.mubr.f32.gmra.mrb[78].mxu1 %v9388_v42  ;;  %3857 = vmatmul.mubr.f32.gmra.mrb[80].mxu0 %v9389_v61  ;;  %v9394_v42 = vld [vmem:[#allocation56_spill] sm:$0xff] }
 0x191   : > { %2259 = vmatprep.mubr.f32.mxu1 %v9349_v54  ;;  %3862 = vmatprep.mubr.f32.mxu0 %v9349_v54 }
 0x194   : > { %2265 = vmatmul.mubr.f32.gmra.mrb[80].mxu1 %v9389_v61  ;;  %3868 = vmatmul.mubr.f32.gmra.mrb[82].mxu0 %v9390_v45  ;;  %v9395_v61 = vld [vmem:[#allocation58_spill] sm:$0xff] }
 0x195   : > { %2270 = vmatprep.mubr.f32.mxu1 %v9349_v54  ;;  %3873 = vmatprep.mubr.f32.mxu0 %v9349_v54 }
 0x198   : > { %2276 = vmatmul.mubr.f32.gmra.mrb[82].mxu1 %v9390_v45  ;;  %3879 = vmatmul.mubr.f32.gmra.mrb[84].mxu0 %v9391_v55 }
 0x199   : > { %2281 = vmatprep.mubr.f32.mxu1 %v9349_v54  ;;  %3884 = vmatprep.mubr.f32.mxu0 %v9349_v54 }
 0x19c   : > { %2287 = vmatmul.mubr.f32.gmra.mrb[84].mxu1 %v9391_v55  ;;  %3890 = vmatmul.mubr.f32.gmra.mrb[86].mxu0 %v9392_v48 }
 0x19d   : > { %2292 = vmatprep.mubr.f32.mxu1 %v9349_v54  ;;  %3895 = vmatprep.mubr.f32.mxu0 %v9349_v54 }
 0x1a0   : > { %2298 = vmatmul.mubr.f32.gmra.mrb[86].mxu1 %v9392_v48  ;;  %3901 = vmatmul.mubr.f32.gmra.mrb[88].mxu0 %v9393_v41 }
 0x1a1   : > { %2303 = vmatprep.mubr.f32.mxu1 %v9349_v54  ;;  %3906 = vmatprep.mubr.f32.mxu0 %v9349_v54 }
 0x1a4   : > { %2309 = vmatmul.mubr.f32.gmra.mrb[88].mxu1 %v9393_v41  ;;  %3912 = vmatmul.mubr.f32.gmra.mrb[90].mxu0 %v9394_v42 }
 0x1a5   : > { %2314 = vmatprep.mubr.f32.mxu1 %v9349_v54  ;;  %3917 = vmatprep.mubr.f32.mxu0 %v9349_v54 }
 0x1a8   : > { %2320 = vmatmul.mubr.f32.gmra.mrb[90].mxu1 %v9394_v42  ;;  %3923 = vmatmul.mubr.f32.gmra.mrb[92].mxu0 %v7704_v33 }
 0x1a9   : > { %2325 = vmatprep.mubr.f32.mxu1 %v9349_v54  ;;  %3928 = vmatprep.mubr.f32.mxu0 %v9349_v54 }
 0x1ac   : > { %2331 = vmatmul.mubr.f32.gmra.mrb[92].mxu1 %v7704_v33  ;;  %3934 = vmatmul.mubr.f32.gmra.mrb[94].mxu0 %v7721_v49  ;;  %v9396_v33 = vld [vmem:[#allocation59_spill] sm:$0xff] }
 0x1ad   : > { %2336 = vmatprep.mubr.f32.mxu1 %v9349_v54  ;;  %4014 = vmatprep.mubr.f32.mxu0 %v9349_v54 }
 0x1b0   : > { %2342 = vmatmul.mubr.f32.gmra.mrb[94].mxu1 %v7721_v49  ;;  %4016 = vmatmul.mubr.f32.vlgmr.msra.gmra.mrb[48].mxu0 %v7256_v20 }
 0x1b1   : > { %2422 = vmatprep.mubr.f32.mxu1 %v9349_v54  ;;  %4021 = vmatprep.mubr.f32.mxu0 %v9349_v54 }
 0x1b2   : > { %4188 = vmatpush1.msra.mxu0 %v7955_v4 }
 0x1b3   : > { %4445 = vmatprep.subr.mxu0 %v9395_v61 }
 0x1b4   : > { %2424 = vmatmul.mubr.f32.vlgmr.msra.gmra.mrb[48].mxu1 %v7256_v20  ;;  %4023 = vmatmul.mubr.f32.gmra.mrb[50].mxu0 %v7258_v22 }
 0x1b5   : > { %2596 = vmatpush1.msra.mxu1 %v7961_v1  ;;  %2429 = vmatprep.mubr.f32.mxu1 %v9349_v54 }
 0x1b6   : > { %4028 = vmatprep.mubr.f32.mxu0 %v9349_v54  ;;  %2853 = vmatprep.subr.mxu1 %v9396_v33 }
 0x1b8   : > { %2431 = vmatmul.mubr.f32.gmra.mrb[50].mxu1 %v7258_v22  ;;  %4030 = vmatmul.mubr.f32.gmra.mrb[52].mxu0 %v7260_v23 }
 0x1b9   : > { %2436 = vmatprep.mubr.f32.mxu1 %v9349_v54  ;;  %4035 = vmatprep.mubr.f32.mxu0 %v9349_v54 }
 0x1bc   : > { %2438 = vmatmul.mubr.f32.gmra.mrb[52].mxu1 %v7260_v23  ;;  %4037 = vmatmul.mubr.f32.gmra.mrb[54].mxu0 %v7273_v29 }
 0x1bd   : > { %2443 = vmatprep.mubr.f32.mxu1 %v9349_v54  ;;  %4042 = vmatprep.mubr.f32.mxu0 %v9349_v54 }
 0x1c0   : > { %2445 = vmatmul.mubr.f32.gmra.mrb[54].mxu1 %v7273_v29  ;;  %4044 = vmatmul.mubr.f32.gmra.mrb[56].mxu0 %v7283_v34 }
 0x1c1   : > { %2450 = vmatprep.mubr.f32.mxu1 %v9349_v54  ;;  %4049 = vmatprep.mubr.f32.mxu0 %v9349_v54 }
 0x1c3   : > { %v1851_v49 = vpop.f32.mrb[0].mxu0 }
 0x1c4   : > { %v1853_v45 = vpop.f32.mrb[1].mxu0  ;;  %2452 = vmatmul.mubr.f32.gmra.mrb[56].mxu1 %v7283_v34  ;;  %4051 = vmatmul.mubr.f32.gmra.mrb[58].mxu0 %v7304_v44 }
 0x1c5   : > { %2457 = vmatprep.mubr.f32.mxu1 %v9349_v54  ;;  %4056 = vmatprep.mubr.f32.mxu0 %v9349_v54 }
 0x1c7   : > { %v1071_v55 = vpop.f32.mrb[0].mxu1  ;;  %v1858_v48 = vpop.f32.mrb[2].mxu0 }
 0x1c8   : > { %v6122_v41 = vadd.f32 %v1851_v49, %v1071_v55  ;;  %v1073_v42 = vpop.f32.mrb[1].mxu1  ;;  %v1860_v56 = vpop.f32.mrb[3].mxu0  ;;  %2459 = vmatmul.mubr.f32.gmra.mrb[58].mxu1 %v7304_v44  ;;  %4058 = vmatmul.mubr.f32.gmra.mrb[60].mxu0 %v7325_v52 }
 0x1c9   : > { %v6123_v29 = vadd.f32 %v1853_v45, %v1073_v42  ;;  %2464 = vmatprep.mubr.f32.mxu1 %v9349_v54  ;;  %4063 = vmatprep.mubr.f32.mxu0 %v9349_v54 }
 0x1ca   : > { %5201 = vst [vmem:[%s8117_s9] sm:$0xff] %v6122_v41 }
 0x1cb   : > { %5225 = vst [vmem:[%s8121_s10] sm:$0xff] %v6123_v29  ;;  %v1079_v49 = vpop.f32.mrb[2].mxu1  ;;  %v1865_v55 = vpop.f32.mrb[4].mxu0 }
 0x1cc   : > { %v6124_v44 = vadd.f32 %v1858_v48, %v1079_v49  ;;  %v1081_v34 = vpop.f32.mrb[3].mxu1  ;;  %v1867_v23 = vpop.f32.mrb[5].mxu0  ;;  %2466 = vmatmul.mubr.f32.gmra.mrb[60].mxu1 %v7325_v52  ;;  %4065 = vmatmul.mubr.f32.gmra.mrb[62].mxu0 %v7345_v60 }
 0x1cd   : > { %v6125_v45 = vadd.f32 %v1860_v56, %v1081_v34  ;;  %2471 = vmatprep.mubr.f32.mxu1 %v9349_v54  ;;  %4070 = vmatprep.mubr.f32.mxu0 %v9349_v54 }
 0x1ce   : > { %5202 = vst [vmem:[%s8117_s9 + $0x8] sm:$0xff] %v6124_v44 }
 0x1cf   : > { %5226 = vst [vmem:[%s8121_s10 + $0x8] sm:$0xff] %v6125_v45  ;;  %v1087_v41 = vpop.f32.mrb[4].mxu1  ;;  %v1872_v29 = vpop.f32.mrb[6].mxu0 }
 0x1d0   : > { %v6126_v42 = vadd.f32 %v1865_v55, %v1087_v41  ;;  %v1089_v22 = vpop.f32.mrb[5].mxu1  ;;  %v1874_v48 = vpop.f32.mrb[7].mxu0  ;;  %2473 = vmatmul.mubr.f32.gmra.mrb[62].mxu1 %v7345_v60  ;;  %4072 = vmatmul.mubr.f32.gmra.mrb[64].mxu0 %v7372_v12 }
 0x1d1   : > { %v6127_v49 = vadd.f32 %v1867_v23, %v1089_v22  ;;  %2478 = vmatprep.mubr.f32.mxu1 %v9349_v54  ;;  %4077 = vmatprep.mubr.f32.mxu0 %v9349_v54 }
 0x1d2   : > { %5203 = vst [vmem:[%s8117_s9 + $0x10] sm:$0xff] %v6126_v42 }
 0x1d3   : > { %5227 = vst [vmem:[%s8121_s10 + $0x10] sm:$0xff] %v6127_v49  ;;  %v1095_v34 = vpop.f32.mrb[6].mxu1  ;;  %v1879_v44 = vpop.f32.mrb[8].mxu0 }
 0x1d4   : > { %v6128_v56 = vadd.f32 %v1872_v29, %v1095_v34  ;;  %v1097_v45 = vpop.f32.mrb[7].mxu1  ;;  %v1881_v55 = vpop.f32.mrb[9].mxu0  ;;  %2480 = vmatmul.mubr.f32.gmra.mrb[64].mxu1 %v7372_v12  ;;  %4079 = vmatmul.mubr.f32.gmra.mrb[66].mxu0 %v7407_v36 }
 0x1d5   : > { %v6129_v41 = vadd.f32 %v1874_v48, %v1097_v45  ;;  %2485 = vmatprep.mubr.f32.mxu1 %v9349_v54  ;;  %4084 = vmatprep.mubr.f32.mxu0 %v9349_v54 }
 0x1d6   : > { %5204 = vst [vmem:[%s8117_s9 + $0x18] sm:$0xff] %v6128_v56 }
 0x1d7   : > { %5228 = vst [vmem:[%s8121_s10 + $0x18] sm:$0xff] %v6129_v41  ;;  %v1103_v22 = vpop.f32.mrb[8].mxu1  ;;  %v1886_v23 = vpop.f32.mrb[10].mxu0 }
 0x1d8   : > { %v6130_v42 = vadd.f32 %v1879_v44, %v1103_v22  ;;  %v1105_v49 = vpop.f32.mrb[9].mxu1  ;;  %v1888_v29 = vpop.f32.mrb[11].mxu0  ;;  %2487 = vmatmul.mubr.f32.gmra.mrb[66].mxu1 %v7407_v36  ;;  %4086 = vmatmul.mubr.f32.gmra.mrb[68].mxu0 %v7435_v62 }
 0x1d9   : > { %v6131_v34 = vadd.f32 %v1881_v55, %v1105_v49  ;;  %2492 = vmatprep.mubr.f32.mxu1 %v9349_v54  ;;  %4091 = vmatprep.mubr.f32.mxu0 %v9349_v54 }
 0x1da   : > { %5205 = vst [vmem:[%s8117_s9 + $0x20] sm:$0xff] %v6130_v42 }
 0x1db   : > { %5229 = vst [vmem:[%s8121_s10 + $0x20] sm:$0xff] %v6131_v34  ;;  %v1111_v48 = vpop.f32.mrb[10].mxu1  ;;  %v1893_v56 = vpop.f32.mrb[12].mxu0 }
 0x1dc   : > { %v6132_v45 = vadd.f32 %v1886_v23, %v1111_v48  ;;  %v1113_v41 = vpop.f32.mrb[11].mxu1  ;;  %v1895_v44 = vpop.f32.mrb[13].mxu0  ;;  %2494 = vmatmul.mubr.f32.gmra.mrb[68].mxu1 %v7435_v62  ;;  %4093 = vmatmul.mubr.f32.gmra.mrb[70].mxu0 %v7443_v2 }
 0x1dd   : > { %v6133_v22 = vadd.f32 %v1888_v29, %v1113_v41  ;;  %2499 = vmatprep.mubr.f32.mxu1 %v9349_v54  ;;  %4098 = vmatprep.mubr.f32.mxu0 %v9349_v54 }
 0x1de   : > { %5206 = vst [vmem:[%s8117_s9 + $0x28] sm:$0xff] %v6132_v45 }
 0x1df   : > { %5230 = vst [vmem:[%s8121_s10 + $0x28] sm:$0xff] %v6133_v22  ;;  %v1119_v55 = vpop.f32.mrb[12].mxu1  ;;  %v1900_v42 = vpop.f32.mrb[14].mxu0 }
 0x1e0   : > { %v6134_v49 = vadd.f32 %v1893_v56, %v1119_v55  ;;  %v1121_v34 = vpop.f32.mrb[13].mxu1  ;;  %v1902_v23 = vpop.f32.mrb[15].mxu0  ;;  %2501 = vmatmul.mubr.f32.gmra.mrb[70].mxu1 %v7443_v2  ;;  %4100 = vmatmul.mubr.f32.gmra.mrb[72].mxu0 %v7459_v18 }
 0x1e1   : > { %v6135_v48 = vadd.f32 %v1895_v44, %v1121_v34  ;;  %2506 = vmatprep.mubr.f32.mxu1 %v9349_v54  ;;  %4105 = vmatprep.mubr.f32.mxu0 %v9349_v54 }
 0x1e2   : > { %5207 = vst [vmem:[%s8117_s9 + $0x30] sm:$0xff] %v6134_v49 }
 0x1e3   : > { %5231 = vst [vmem:[%s8121_s10 + $0x30] sm:$0xff] %v6135_v48  ;;  %v1127_v29 = vpop.f32.mrb[14].mxu1  ;;  %v1907_v45 = vpop.f32.mrb[16].mxu0 }
 0x1e4   : > { %v6136_v41 = vadd.f32 %v1900_v42, %v1127_v29  ;;  %v1129_v22 = vpop.f32.mrb[15].mxu1  ;;  %v1909_v56 = vpop.f32.mrb[17].mxu0  ;;  %2508 = vmatmul.mubr.f32.gmra.mrb[72].mxu1 %v7459_v18  ;;  %4107 = vmatmul.mubr.f32.gmra.mrb[74].mxu0 %v7477_v0 }
 0x1e5   : > { %v6137_v55 = vadd.f32 %v1902_v23, %v1129_v22  ;;  %2513 = vmatprep.mubr.f32.mxu1 %v9349_v54  ;;  %4112 = vmatprep.mubr.f32.mxu0 %v9349_v54 }
 0x1e6   : > { %5208 = vst [vmem:[%s8117_s9 + $0x38] sm:$0xff] %v6136_v41 }
 0x1e7   : > { %5232 = vst [vmem:[%s8121_s10 + $0x38] sm:$0xff] %v6137_v55  ;;  %v1135_v44 = vpop.f32.mrb[16].mxu1  ;;  %v1914_v49 = vpop.f32.mrb[18].mxu0 }
 0x1e8   : > { %v6138_v34 = vadd.f32 %v1907_v45, %v1135_v44  ;;  %v1137_v48 = vpop.f32.mrb[17].mxu1  ;;  %v1916_v42 = vpop.f32.mrb[19].mxu0  ;;  %2515 = vmatmul.mubr.f32.gmra.mrb[74].mxu1 %v7477_v0  ;;  %4114 = vmatmul.mubr.f32.gmra.mrb[76].mxu0 %v7508_v3 }
 0x1e9   : > { %v6139_v29 = vadd.f32 %v1909_v56, %v1137_v48  ;;  %2520 = vmatprep.mubr.f32.mxu1 %v9349_v54  ;;  %4119 = vmatprep.mubr.f32.mxu0 %v9349_v54 }
 0x1ea   : > { %5209 = vst [vmem:[%s8117_s9 + $0x40] sm:$0xff] %v6138_v34 }
 0x1eb   : > { %5233 = vst [vmem:[%s8121_s10 + $0x40] sm:$0xff] %v6139_v29  ;;  %v1143_v23 = vpop.f32.mrb[18].mxu1  ;;  %v1921_v41 = vpop.f32.mrb[20].mxu0 }
 0x1ec   : > { %v6140_v22 = vadd.f32 %v1914_v49, %v1143_v23  ;;  %v1145_v55 = vpop.f32.mrb[19].mxu1  ;;  %v1923_v45 = vpop.f32.mrb[21].mxu0  ;;  %2522 = vmatmul.mubr.f32.gmra.mrb[76].mxu1 %v7508_v3  ;;  %4121 = vmatmul.mubr.f32.gmra.mrb[78].mxu0 %v7512_v24 }
 0x1ed   : > { %v6141_v44 = vadd.f32 %v1916_v42, %v1145_v55  ;;  %2527 = vmatprep.mubr.f32.mxu1 %v9349_v54  ;;  %4126 = vmatprep.mubr.f32.mxu0 %v9349_v54 }
 0x1ee   : > { %5210 = vst [vmem:[%s8117_s9 + $0x48] sm:$0xff] %v6140_v22 }
 0x1ef   : > { %5234 = vst [vmem:[%s8121_s10 + $0x48] sm:$0xff] %v6141_v44  ;;  %v1151_v56 = vpop.f32.mrb[20].mxu1  ;;  %v1928_v34 = vpop.f32.mrb[22].mxu0 }
 0x1f0   : > { %v6142_v48 = vadd.f32 %v1921_v41, %v1151_v56  ;;  %v1153_v29 = vpop.f32.mrb[21].mxu1  ;;  %v1930_v49 = vpop.f32.mrb[23].mxu0  ;;  %2529 = vmatmul.mubr.f32.gmra.mrb[78].mxu1 %v7512_v24  ;;  %4128 = vmatmul.mubr.f32.gmra.mrb[80].mxu0 %v7541_v7 }
 0x1f1   : > { %v6143_v23 = vadd.f32 %v1923_v45, %v1153_v29  ;;  %2534 = vmatprep.mubr.f32.mxu1 %v9349_v54  ;;  %4133 = vmatprep.mubr.f32.mxu0 %v9349_v54 }
 0x1f2   : > { %5211 = vst [vmem:[%s8117_s9 + $0x50] sm:$0xff] %v6142_v48 }
 0x1f3   : > { %5235 = vst [vmem:[%s8121_s10 + $0x50] sm:$0xff] %v6143_v23  ;;  %v1159_v42 = vpop.f32.mrb[22].mxu1  ;;  %v1935_v22 = vpop.f32.mrb[24].mxu0 }
 0x1f4   : > { %v6144_v55 = vadd.f32 %v1928_v34, %v1159_v42  ;;  %v1161_v44 = vpop.f32.mrb[23].mxu1  ;;  %v1937_v41 = vpop.f32.mrb[25].mxu0  ;;  %2536 = vmatmul.mubr.f32.gmra.mrb[80].mxu1 %v7541_v7  ;;  %4135 = vmatmul.mubr.f32.gmra.mrb[82].mxu0 %v7559_v30 }
 0x1f5   : > { %v6145_v56 = vadd.f32 %v1930_v49, %v1161_v44  ;;  %2541 = vmatprep.mubr.f32.mxu1 %v9349_v54  ;;  %4140 = vmatprep.mubr.f32.mxu0 %v9349_v54 }
 0x1f6   : > { %5212 = vst [vmem:[%s8117_s9 + $0x58] sm:$0xff] %v6144_v55 }
 0x1f7   : > { %5236 = vst [vmem:[%s8121_s10 + $0x58] sm:$0xff] %v6145_v56  ;;  %v1167_v45 = vpop.f32.mrb[24].mxu1  ;;  %v1942_v48 = vpop.f32.mrb[26].mxu0 }
 0x1f8   : > { %v6146_v29 = vadd.f32 %v1935_v22, %v1167_v45  ;;  %v1169_v23 = vpop.f32.mrb[25].mxu1  ;;  %v1944_v34 = vpop.f32.mrb[27].mxu0  ;;  %2543 = vmatmul.mubr.f32.gmra.mrb[82].mxu1 %v7559_v30  ;;  %4142 = vmatmul.mubr.f32.gmra.mrb[84].mxu0 %v7577_v58 }
 0x1f9   : > { %v6147_v42 = vadd.f32 %v1937_v41, %v1169_v23  ;;  %2548 = vmatprep.mubr.f32.mxu1 %v9349_v54  ;;  %4147 = vmatprep.mubr.f32.mxu0 %v9349_v54 }
 0x1fa   : > { %5213 = vst [vmem:[%s8117_s9 + $0x60] sm:$0xff] %v6146_v29 }
 0x1fb   : > { %5237 = vst [vmem:[%s8121_s10 + $0x60] sm:$0xff] %v6147_v42  ;;  %v1175_v49 = vpop.f32.mrb[26].mxu1  ;;  %v1949_v55 = vpop.f32.mrb[28].mxu0 }
 0x1fc   : > { %v6148_v44 = vadd.f32 %v1942_v48, %v1175_v49  ;;  %v1177_v56 = vpop.f32.mrb[27].mxu1  ;;  %v1951_v22 = vpop.f32.mrb[29].mxu0  ;;  %2550 = vmatmul.mubr.f32.gmra.mrb[84].mxu1 %v7577_v58  ;;  %4149 = vmatmul.mubr.f32.gmra.mrb[86].mxu0 %v7595_v17 }
 0x1fd   : > { %v6149_v45 = vadd.f32 %v1944_v34, %v1177_v56  ;;  %2555 = vmatprep.mubr.f32.mxu1 %v9349_v54  ;;  %4154 = vmatprep.mubr.f32.mxu0 %v9349_v54 }
 0x1fe   : > { %5214 = vst [vmem:[%s8117_s9 + $0x68] sm:$0xff] %v6148_v44 }
 0x1ff   : > { %5238 = vst [vmem:[%s8121_s10 + $0x68] sm:$0xff] %v6149_v45  ;;  %v1183_v41 = vpop.f32.mrb[28].mxu1  ;;  %v1956_v29 = vpop.f32.mrb[30].mxu0 }
 0x200   : > { %v6150_v23 = vadd.f32 %v1949_v55, %v1183_v41  ;;  %v1185_v42 = vpop.f32.mrb[29].mxu1  ;;  %v1958_v48 = vpop.f32.mrb[31].mxu0  ;;  %2557 = vmatmul.mubr.f32.gmra.mrb[86].mxu1 %v7595_v17  ;;  %4156 = vmatmul.mubr.f32.gmra.mrb[88].mxu0 %v7600_v16 }
 0x201   : > { %v6151_v49 = vadd.f32 %v1951_v22, %v1185_v42  ;;  %2562 = vmatprep.mubr.f32.mxu1 %v9349_v54  ;;  %4161 = vmatprep.mubr.f32.mxu0 %v9349_v54 }
 0x202   : > { %5215 = vst [vmem:[%s8117_s9 + $0x70] sm:$0xff] %v6150_v23 }
 0x203   : > { %5239 = vst [vmem:[%s8121_s10 + $0x70] sm:$0xff] %v6151_v49  ;;  %v1191_v34 = vpop.f32.mrb[30].mxu1  ;;  %v1963_v44 = vpop.f32.mrb[32].mxu0 }
 0x204   : > { %v6152_v56 = vadd.f32 %v1956_v29, %v1191_v34  ;;  %v1193_v45 = vpop.f32.mrb[31].mxu1  ;;  %v1965_v55 = vpop.f32.mrb[33].mxu0  ;;  %2564 = vmatmul.mubr.f32.gmra.mrb[88].mxu1 %v7600_v16  ;;  %4163 = vmatmul.mubr.f32.gmra.mrb[90].mxu0 %v7618_v6 }
 0x205   : > { %v6153_v41 = vadd.f32 %v1958_v48, %v1193_v45  ;;  %2569 = vmatprep.mubr.f32.mxu1 %v9349_v54  ;;  %4168 = vmatprep.mubr.f32.mxu0 %v9349_v54 }
 0x206   : > { %5216 = vst [vmem:[%s8117_s9 + $0x78] sm:$0xff] %v6152_v56 }
 0x207   : > { %5240 = vst [vmem:[%s8121_s10 + $0x78] sm:$0xff] %v6153_v41  ;;  %v1199_v22 = vpop.f32.mrb[32].mxu1  ;;  %v1970_v23 = vpop.f32.mrb[34].mxu0 }
 0x208   : > { %v6154_v42 = vadd.f32 %v1963_v44, %v1199_v22  ;;  %v1201_v49 = vpop.f32.mrb[33].mxu1  ;;  %v1972_v29 = vpop.f32.mrb[35].mxu0  ;;  %2571 = vmatmul.mubr.f32.gmra.mrb[90].mxu1 %v7618_v6  ;;  %4170 = vmatmul.mubr.f32.gmra.mrb[92].mxu0 %v7636_v40 }
 0x209   : > { %v6155_v34 = vadd.f32 %v1965_v55, %v1201_v49  ;;  %2576 = vmatprep.mubr.f32.mxu1 %v9349_v54  ;;  %4175 = vmatprep.mubr.f32.mxu0 %v9349_v54 }
 0x20a   : > { %5217 = vst [vmem:[%s8117_s9 + $0x80] sm:$0xff] %v6154_v42 }
 0x20b   : > { %5241 = vst [vmem:[%s8121_s10 + $0x80] sm:$0xff] %v6155_v34  ;;  %v1207_v48 = vpop.f32.mrb[34].mxu1  ;;  %v1977_v56 = vpop.f32.mrb[36].mxu0 }
 0x20c   : > { %v6156_v45 = vadd.f32 %v1970_v23, %v1207_v48  ;;  %v1209_v41 = vpop.f32.mrb[35].mxu1  ;;  %v1979_v44 = vpop.f32.mrb[37].mxu0  ;;  %2578 = vmatmul.mubr.f32.gmra.mrb[92].mxu1 %v7636_v40  ;;  %4177 = vmatmul.mubr.f32.gmra.mrb[94].mxu0 %v7667_v31 }
 0x20d   : > { %v6157_v22 = vadd.f32 %v1972_v29, %v1209_v41  ;;  %2583 = vmatprep.mubr.f32.mxu1 %v9349_v54  ;;  %4251 = vmatprep.mubr.f32.mxu0 %v9349_v54 }
 0x20e   : > { %5218 = vst [vmem:[%s8117_s9 + $0x88] sm:$0xff] %v6156_v45 }
 0x20f   : > { %5242 = vst [vmem:[%s8121_s10 + $0x88] sm:$0xff] %v6157_v22  ;;  %v1215_v55 = vpop.f32.mrb[36].mxu1  ;;  %v1984_v42 = vpop.f32.mrb[38].mxu0 }
 0x210   : > { %v6158_v49 = vadd.f32 %v1977_v56, %v1215_v55  ;;  %v1217_v34 = vpop.f32.mrb[37].mxu1  ;;  %v1986_v23 = vpop.f32.mrb[39].mxu0  ;;  %2585 = vmatmul.mubr.f32.gmra.mrb[94].mxu1 %v7667_v31  ;;  %4254 = vmatmul.mubr.f32.vlgmr.msra.gmra.mrb[48].mxu0 %v7265_v26  ;;  %v9397_v56 = vand.u32 4294901760, %v7827_v5  ;;  %v9398_v5 = vand.u32 4294901760, %v7835_v8 }
 0x211   : > { %v6159_v48 = vadd.f32 %v1979_v44, %v1217_v34  ;;  %2659 = vmatprep.mubr.f32.mxu1 %v9349_v54  ;;  %4259 = vmatprep.mubr.f32.mxu0 %v9349_v54 }
 0x212   : > { %5219 = vst [vmem:[%s8117_s9 + $0x90] sm:$0xff] %v6158_v49  ;;  %4447 = vmatpush1.msra.mxu0 %v7859_v37 }
 0x213   : > { %5243 = vst [vmem:[%s8121_s10 + $0x90] sm:$0xff] %v6159_v48  ;;  %v1223_v29 = vpop.f32.mrb[38].mxu1  ;;  %v1991_v45 = vpop.f32.mrb[40].mxu0  ;;  %4730 = vmatprep.subr.mxu0 %v9397_v56 }
 0x214   : > { %v6160_v41 = vadd.f32 %v1984_v42, %v1223_v29  ;;  %v1225_v22 = vpop.f32.mrb[39].mxu1  ;;  %v1993_v55 = vpop.f32.mrb[41].mxu0  ;;  %2662 = vmatmul.mubr.f32.vlgmr.msra.gmra.mrb[48].mxu1 %v7265_v26  ;;  %4262 = vmatmul.mubr.f32.gmra.mrb[50].mxu0 %v7268_v27 }
 0x215   : > { %v6161_v44 = vadd.f32 %v1986_v23, %v1225_v22  ;;  %2855 = vmatpush1.msra.mxu1 %v7869_v53  ;;  %2667 = vmatprep.mubr.f32.mxu1 %v9349_v54 }
 0x216   : > { %5220 = vst [vmem:[%s8117_s9 + $0x98] sm:$0xff] %v6160_v41  ;;  %4267 = vmatprep.mubr.f32.mxu0 %v9349_v54  ;;  %3138 = vmatprep.subr.mxu1 %v9398_v5 }
 0x217   : > { %5244 = vst [vmem:[%s8121_s10 + $0x98] sm:$0xff] %v6161_v44  ;;  %v1231_v42 = vpop.f32.mrb[40].mxu1  ;;  %v1998_v49 = vpop.f32.mrb[42].mxu0 }
 0x218   : > { %v6162_v34 = vadd.f32 %v1991_v45, %v1231_v42  ;;  %v1233_v26 = vpop.f32.mrb[41].mxu1  ;;  %v2000_v48 = vpop.f32.mrb[43].mxu0  ;;  %2670 = vmatmul.mubr.f32.gmra.mrb[50].mxu1 %v7268_v27  ;;  %4270 = vmatmul.mubr.f32.gmra.mrb[52].mxu0 %v7271_v28 }
 0x219   : > { %v6163_v23 = vadd.f32 %v1993_v55, %v1233_v26  ;;  %2675 = vmatprep.mubr.f32.mxu1 %v9349_v54  ;;  %4275 = vmatprep.mubr.f32.mxu0 %v9349_v54 }
 0x21a   : > { %5221 = vst [vmem:[%s8117_s9 + $0xa0] sm:$0xff] %v6162_v34 }
 0x21b   : > { %5245 = vst [vmem:[%s8121_s10 + $0xa0] sm:$0xff] %v6163_v23  ;;  %v1239_v8 = vpop.f32.mrb[42].mxu1  ;;  %v2005_v29 = vpop.f32.mrb[44].mxu0  ;;  %v8441_v23 = vld [vmem:[%s8346_s16 + $0x60] sm:$0xff] }
 0x21c   : > { %v6164_v56 = vadd.f32 %v1998_v49, %v1239_v8  ;;  %v1241_v41 = vpop.f32.mrb[43].mxu1  ;;  %v2007_v45 = vpop.f32.mrb[45].mxu0  ;;  %2678 = vmatmul.mubr.f32.gmra.mrb[52].mxu1 %v7271_v28  ;;  %4278 = vmatmul.mubr.f32.gmra.mrb[54].mxu0 %v7295_v39  ;;  %v9409_v8 = vld [vmem:[#allocation27_spill] sm:$0xff] }
 0x21d   : > { %v6165_v27 = vadd.f32 %v2000_v48, %v1241_v41  ;;  %2683 = vmatprep.mubr.f32.mxu1 %v9349_v54  ;;  %4283 = vmatprep.mubr.f32.mxu0 %v9349_v54  ;;  %v9410_v41 = vld [vmem:[#allocation29_spill] sm:$0xff] }
 0x21e   : > { %5222 = vst [vmem:[%s8117_s9 + $0xa8] sm:$0xff] %v6164_v56  ;;  %v8453_v56 = vld [vmem:[%s8346_s16 + $0x70] sm:$0xff] }
 0x21f   : > { %5246 = vst [vmem:[%s8121_s10 + $0xa8] sm:$0xff] %v6165_v27  ;;  %v1247_v22 = vpop.f32.mrb[44].mxu1  ;;  %v2012_v55 = vpop.f32.mrb[46].mxu0  ;;  %v8465_v27 = vld [vmem:[%s8346_s16 + $0x80] sm:$0xff] }
 0x220   : > { %v6166_v44 = vadd.f32 %v2005_v29, %v1247_v22  ;;  %v1249_v5 = vpop.f32.mrb[45].mxu1  ;;  %v2014_v42 = vpop.f32.mrb[47].mxu0  ;;  %2686 = vmatmul.mubr.f32.gmra.mrb[54].mxu1 %v7295_v39  ;;  %4286 = vmatmul.mubr.f32.gmra.mrb[56].mxu0 %v7302_v43  ;;  %v9400_v39 = vand.u32 4294901760, %v7955_v4  ;;  %v8422_v4 = vld [vmem:[%s8346_s16 + $0x68] sm:$0xff]  ;;  %v9411_v22 = vld [vmem:[#allocation31_spill] sm:$0xff] }
 0x221   : > { %v6167_v28 = vadd.f32 %v2007_v45, %v1249_v5  ;;  %2691 = vmatprep.mubr.f32.mxu1 %v9349_v54  ;;  %4291 = vmatprep.mubr.f32.mxu0 %v9349_v54  ;;  %v8446_v29 = vld [vmem:[%s8346_s16 + $0x88] sm:$0xff]  ;;  %v8458_v45 = vld [vmem:[%s8346_s16 + $0x98] sm:$0xff]  ;;  %v9412_v5 = vld [vmem:[#allocation33_spill] sm:$0xff] }
 0x222   : > { %5223 = vst [vmem:[%s8117_s9 + $0xb0] sm:$0xff] %v6166_v44  ;;  %v8477_v44 = vld [vmem:[%s8346_s16 + $0x90] sm:$0xff] }
 0x223   : > { %5247 = vst [vmem:[%s8121_s10 + $0xb0] sm:$0xff] %v6167_v28  ;;  %v1255_v49 = vpop.f32.mrb[46].mxu1  ;;  %v8489_v28 = vld [vmem:[%s8346_s16 + $0xa0] sm:$0xff] }
 0x224   : > { %v6168_v34 = vadd.f32 %v2012_v55, %v1255_v49  ;;  %v1257_v26 = vpop.f32.mrb[47].mxu1  ;;  %2694 = vmatmul.mubr.f32.gmra.mrb[56].mxu1 %v7302_v43  ;;  %4294 = vmatmul.mubr.f32.gmra.mrb[58].mxu0 %v7323_v51  ;;  %v7108_v43 = vmov 0   ;;  %v8470_v55 = vld [vmem:[%s8346_s16 + $0xa8] sm:$0xff]  ;;  %v9413_v49 = vld [vmem:[#allocation35_spill] sm:$0xff] }
 0x225   : > { %v6169_v48 = vadd.f32 %v2014_v42, %v1257_v26  ;;  %2699 = vmatprep.mubr.f32.mxu1 %v9349_v54  ;;  %4299 = vmatprep.mubr.f32.mxu0 %v9349_v54  ;;  %v8482_v42 = vld [vmem:[%s8346_s16 + $0xb8] sm:$0xff]  ;;  %v8497_v26 = vld [vmem:[%s8346_s16 + $0xb0] sm:$0xff] }
 0x226   : > { %5224 = vst [vmem:[%s8117_s9 + $0xb8] sm:$0xff] %v6168_v34  ;;  %6941 = vset.pattern.permute.xlu1 %v7108_v43  ;;  %6940 = vset.pattern.permute.xlu0 %v7108_v43  ;;  %v7109_v34 = vmov 1   ;;  %v9417_v43 = vld [vmem:[#allocation43_spill] sm:$0xff] }
 0x227   : > { %5248 = vst [vmem:[%s8121_s10 + $0xb8] sm:$0xff] %v6169_v48  ;;  %v9414_v48 = vld [vmem:[#allocation37_spill] sm:$0xff] }
 0x228   : > { %2702 = vmatmul.mubr.f32.gmra.mrb[58].mxu1 %v7323_v51  ;;  %4302 = vmatmul.mubr.f32.gmra.mrb[60].mxu0 %v7343_v59  ;;  %v8360_v51 = vld [vmem:[%s8346_s16 + $0x18] sm:$0xff] }
 0x229   : > { %2707 = vmatprep.mubr.f32.mxu1 %v9349_v54  ;;  %4307 = vmatprep.mubr.f32.mxu0 %v9349_v54 }
 0x22c   : > { %2710 = vmatmul.mubr.f32.gmra.mrb[60].mxu1 %v7343_v59  ;;  %4310 = vmatmul.mubr.f32.gmra.mrb[62].mxu0 %v7366_v9  ;;  %v9402_v59 = vand.u32 4294901760, %v7961_v1  ;;  %v8429_v1 = vld [vmem:[%s8346_s16 + $0x50] sm:$0xff] }
 0x22d   : > { %2715 = vmatprep.mubr.f32.mxu1 %v9349_v54  ;;  %4315 = vmatprep.mubr.f32.mxu0 %v9349_v54 }
 0x230   : > { %2718 = vmatmul.mubr.f32.gmra.mrb[62].mxu1 %v7366_v9  ;;  %4318 = vmatmul.mubr.f32.gmra.mrb[64].mxu0 %v7405_v35  ;;  %v8369_v9 = vld [vmem:[%s8346_s16] sm:$0xff] }
 0x231   : > { %2723 = vmatprep.mubr.f32.mxu1 %v9349_v54  ;;  %4323 = vmatprep.mubr.f32.mxu0 %v9349_v54 }
 0x232   : > { %5275 = vperm.xlu0 %6940, %v8369_v9  }
 0x234   : > { %2726 = vmatmul.mubr.f32.gmra.mrb[64].mxu1 %v7405_v35  ;;  %4326 = vmatmul.mubr.f32.gmra.mrb[66].mxu0 %v7433_v57  ;;  %v9403_v35 = vld [vmem:[#allocation15_spill] sm:$0xff] }
 0x235   : > { %2731 = vmatprep.mubr.f32.mxu1 %v9349_v54  ;;  %4331 = vmatprep.mubr.f32.mxu0 %v9349_v54 }
 0x238   : > { %2734 = vmatmul.mubr.f32.gmra.mrb[66].mxu1 %v7433_v57  ;;  %4334 = vmatmul.mubr.f32.gmra.mrb[68].mxu0 %v7453_v11  ;;  %v8374_v57 = vld [vmem:[%s8346_s16 + $0x28] sm:$0xff] }
 0x239   : > { %2739 = vmatprep.mubr.f32.mxu1 %v9349_v54  ;;  %4339 = vmatprep.mubr.f32.mxu0 %v9349_v54 }
 0x23c   : > { %2742 = vmatmul.mubr.f32.gmra.mrb[68].mxu1 %v7453_v11  ;;  %4342 = vmatmul.mubr.f32.gmra.mrb[70].mxu0 %v7472_v46  ;;  %v9404_v11 = vld [vmem:[#allocation17_spill] sm:$0xff] }
 0x23d   : > { %2747 = vmatprep.mubr.f32.mxu1 %v9349_v54  ;;  %4347 = vmatprep.mubr.f32.mxu0 %v9349_v54 }
 0x240   : > { %2750 = vmatmul.mubr.f32.gmra.mrb[70].mxu1 %v7472_v46  ;;  %4350 = vmatmul.mubr.f32.gmra.mrb[72].mxu0 %v7489_v63  ;;  %v8393_v46 = vld [vmem:[%s8346_s16 + $0x20] sm:$0xff] }
 0x241   : > { %2755 = vmatprep.mubr.f32.mxu1 %v9349_v54  ;;  %4355 = vmatprep.mubr.f32.mxu0 %v9349_v54 }
 0x244   : > { %2758 = vmatmul.mubr.f32.gmra.mrb[72].mxu1 %v7489_v63  ;;  %4358 = vmatmul.mubr.f32.gmra.mrb[74].mxu0 %v7496_v10  ;;  %v9405_v63 = vld [vmem:[#allocation18_spill] sm:$0xff] }
 0x245   : > { %2763 = vmatprep.mubr.f32.mxu1 %v9349_v54  ;;  %4363 = vmatprep.mubr.f32.mxu0 %v9349_v54 }
 0x248   : > { %2766 = vmatmul.mubr.f32.gmra.mrb[74].mxu1 %v7496_v10  ;;  %4366 = vmatmul.mubr.f32.gmra.mrb[76].mxu0 %v7524_v47  ;;  %v8381_v10 = vld [vmem:[%s8346_s16 + $0x8] sm:$0xff] }
 0x249   : > { %2771 = vmatprep.mubr.f32.mxu1 %v9349_v54  ;;  %4371 = vmatprep.mubr.f32.mxu0 %v9349_v54 }
 0x24a   : > { %5280 = vperm.xlu0 %6940, %v8381_v10  }
 0x24c   : > { %2774 = vmatmul.mubr.f32.gmra.mrb[76].mxu1 %v7524_v47  ;;  %4374 = vmatmul.mubr.f32.gmra.mrb[78].mxu0 %v7529_v38  ;;  %v9401_v47 = vld [vmem:[#allocation13_spill] sm:$0xff] }
 0x24d   : > { %2779 = vmatprep.mubr.f32.mxu1 %v9349_v54  ;;  %4379 = vmatprep.mubr.f32.mxu0 %v9349_v54 }
 0x24e   : > { %5295 = vperm.xlu0 %6940, %v8393_v46  }
 0x250   : > { %2782 = vmatmul.mubr.f32.gmra.mrb[78].mxu1 %v7529_v38  ;;  %4382 = vmatmul.mubr.f32.gmra.mrb[80].mxu0 %v7556_v32  ;;  %v8351_v38 = vld [vmem:[%s8346_s16 + $0x10] sm:$0xff] }
 0x251   : > { %2787 = vmatprep.mubr.f32.mxu1 %v9349_v54  ;;  %4387 = vmatprep.mubr.f32.mxu0 %v9349_v54 }
 0x252   : > { %5285 = vperm.xlu1 %6941, %v8351_v38  }
 0x254   : > { %2790 = vmatmul.mubr.f32.gmra.mrb[80].mxu1 %v7556_v32  ;;  %4390 = vmatmul.mubr.f32.gmra.mrb[82].mxu0 %v7574_v13  ;;  %v9399_v32 = vld [vmem:[#allocation12_spill] sm:$0xff] }
 0x255   : > { %2795 = vmatprep.mubr.f32.mxu1 %v9349_v54  ;;  %4395 = vmatprep.mubr.f32.mxu0 %v9349_v54 }
 0x256   : > { %5290 = vperm.xlu1 %6941, %v8360_v51  }
 0x258   : > { %2798 = vmatmul.mubr.f32.gmra.mrb[82].mxu1 %v7574_v13  ;;  %4398 = vmatmul.mubr.f32.gmra.mrb[84].mxu0 %v7592_v14  ;;  %v8398_v13 = vld [vmem:[%s8346_s16 + $0x48] sm:$0xff] }
 0x259   : > { %2803 = vmatprep.mubr.f32.mxu1 %v9349_v54  ;;  %4403 = vmatprep.mubr.f32.mxu0 %v9349_v54 }
 0x25a   : > { %5300 = vperm.xlu1 %6941, %v8374_v57  }
 0x25c   : > { %2806 = vmatmul.mubr.f32.gmra.mrb[84].mxu1 %v7592_v14  ;;  %4406 = vmatmul.mubr.f32.gmra.mrb[86].mxu0 %v7613_v25  ;;  %v8405_v14 = vld [vmem:[%s8346_s16 + $0x30] sm:$0xff] }
 0x25d   : > { %2811 = vmatprep.mubr.f32.mxu1 %v9349_v54  ;;  %4411 = vmatprep.mubr.f32.mxu0 %v9349_v54 }
 0x25e   : > { %5305 = vperm.xlu0 %6940, %v8405_v14  }
 0x260   : > { %2814 = vmatmul.mubr.f32.gmra.mrb[86].mxu1 %v7613_v25  ;;  %4414 = vmatmul.mubr.f32.gmra.mrb[88].mxu0 %v7631_v19  ;;  %v8386_v25 = vld [vmem:[%s8346_s16 + $0x38] sm:$0xff] }
 0x261   : > { %2819 = vmatprep.mubr.f32.mxu1 %v9349_v54  ;;  %4419 = vmatprep.mubr.f32.mxu0 %v9349_v54 }
 0x262   : > { %5310 = vperm.xlu1 %6941, %v8386_v25  }
 0x264   : > { %2822 = vmatmul.mubr.f32.gmra.mrb[88].mxu1 %v7631_v19  ;;  %4422 = vmatmul.mubr.f32.gmra.mrb[90].mxu0 %v7649_v21  ;;  %v8410_v19 = vld [vmem:[%s8346_s16 + $0x58] sm:$0xff] }
 0x265   : > { %2827 = vmatprep.mubr.f32.mxu1 %v9349_v54  ;;  %4427 = vmatprep.mubr.f32.mxu0 %v9349_v54 }
 0x266   : > { %5320 = vperm.xlu1 %6941, %v8398_v13  }
 0x268   : > { %2830 = vmatmul.mubr.f32.gmra.mrb[90].mxu1 %v7649_v21  ;;  %4430 = vmatmul.mubr.f32.gmra.mrb[92].mxu0 %v7655_v50  ;;  %v9407_v21 = vld [vmem:[#allocation23_spill] sm:$0xff] }
 0x269   : > { %2835 = vmatprep.mubr.f32.mxu1 %v9349_v54  ;;  %4435 = vmatprep.mubr.f32.mxu0 %v9349_v54 }
 0x26a   : > { %5330 = vperm.xlu1 %6941, %v8410_v19  }
 0x26c   : > { %2838 = vmatmul.mubr.f32.gmra.mrb[92].mxu1 %v7655_v50  ;;  %4438 = vmatmul.mubr.f32.gmra.mrb[94].mxu0 %v7682_v15  ;;  %v9406_v50 = vld [vmem:[#allocation20_spill] sm:$0xff] }
 0x26d   : > { %2843 = vmatprep.mubr.f32.mxu1 %v9349_v54  ;;  %4510 = vmatprep.mubr.f32.mxu0 %v9349_v54 }
 0x26e   : > { %5340 = vperm.xlu1 %6941, %v8422_v4  }
 0x270   : > { %2846 = vmatmul.mubr.f32.gmra.mrb[94].mxu1 %v7682_v15  ;;  %4514 = vmatmul.mubr.f32.vlgmr.msra.gmra.mrb[48].mxu0 %v9399_v32  ;;  %v8417_v15 = vld [vmem:[%s8346_s16 + $0x40] sm:$0xff] }
 0x271   : > { %2918 = vmatprep.mubr.f32.mxu1 %v9349_v54  ;;  %4519 = vmatprep.mubr.f32.mxu0 %v9349_v54 }
 0x272   : > { %4734 = vmatpush1.msra.mxu0 %v9400_v39  ;;  %5315 = vperm.xlu0 %6940, %v8417_v15   ;;  %v9416_v39 = vld [vmem:[#allocation40_spill] sm:$0xff] }
 0x273   : > { %4967 = vmatprep.subr.mxu0 %v9395_v61  ;;  %v9408_v61 = vld [vmem:[#allocation24_spill] sm:$0xff] }
 0x274   : > { %2922 = vmatmul.mubr.f32.vlgmr.msra.gmra.mrb[48].mxu1 %v9399_v32  ;;  %4523 = vmatmul.mubr.f32.gmra.mrb[50].mxu0 %v9401_v47  ;;  %v9415_v32 = vld [vmem:[#allocation39_spill] sm:$0xff] }
 0x275   : > { %3142 = vmatpush1.msra.mxu1 %v9402_v59  ;;  %2927 = vmatprep.mubr.f32.mxu1 %v9349_v54  ;;  %v9419_v59 = vld [vmem:[#allocation47_spill] sm:$0xff] }
 0x276   : > { %4528 = vmatprep.mubr.f32.mxu0 %v9349_v54  ;;  %3375 = vmatprep.subr.mxu1 %v9396_v33  ;;  %v8434_v33 = vld [vmem:[%s8346_s16 + $0x78] sm:$0xff] }
 0x277   : > { %5325 = vperm.xlu0 %6940, %v8429_v1   ;;  %5350 = vperm.xlu1 %6941, %v8434_v33  }
 0x278   : > { %2931 = vmatmul.mubr.f32.gmra.mrb[50].mxu1 %v9401_v47  ;;  %4532 = vmatmul.mubr.f32.gmra.mrb[52].mxu0 %v9403_v35  ;;  %v9418_v47 = vld [vmem:[#allocation45_spill] sm:$0xff] }
 0x279   : > { %2936 = vmatprep.mubr.f32.mxu1 %v9349_v54  ;;  %4537 = vmatprep.mubr.f32.mxu0 %v9349_v54 }
 0x27b   : > { %5335 = vperm.xlu0 %6940, %v8441_v23   ;;  %5360 = vperm.xlu1 %6941, %v8446_v29  }
 0x27c   : > { %2940 = vmatmul.mubr.f32.gmra.mrb[52].mxu1 %v9403_v35  ;;  %4541 = vmatmul.mubr.f32.gmra.mrb[54].mxu0 %v9404_v11  ;;  %v9420_v35 = vld [vmem:[#allocation49_spill] sm:$0xff] }
 0x27d   : > { %2945 = vmatprep.mubr.f32.mxu1 %v9349_v54  ;;  %4546 = vmatprep.mubr.f32.mxu0 %v9349_v54 }
 0x27f   : > { %5345 = vperm.xlu0 %6940, %v8453_v56   ;;  %5370 = vperm.xlu1 %6941, %v8458_v45  }
 0x280   : > { %2949 = vmatmul.mubr.f32.gmra.mrb[54].mxu1 %v9404_v11  ;;  %4550 = vmatmul.mubr.f32.gmra.mrb[56].mxu0 %v9405_v63  ;;  %v9421_v11 = vld [vmem:[#allocation51_spill] sm:$0xff] }
 0x281   : > { %2954 = vmatprep.mubr.f32.mxu1 %v9349_v54  ;;  %4555 = vmatprep.mubr.f32.mxu0 %v9349_v54 }
 0x283   : > { %5355 = vperm.xlu0 %6940, %v8465_v27   ;;  %5380 = vperm.xlu1 %6941, %v8470_v55  }
 0x284   : > { %2958 = vmatmul.mubr.f32.gmra.mrb[56].mxu1 %v9405_v63  ;;  %4559 = vmatmul.mubr.f32.gmra.mrb[58].mxu0 %v9406_v50  ;;  %v9422_v63 = vld [vmem:[#allocation53_spill] sm:$0xff] }
 0x285   : > { %2963 = vmatprep.mubr.f32.mxu1 %v9349_v54  ;;  %4564 = vmatprep.mubr.f32.mxu0 %v9349_v54 }
 0x287   : > { %5365 = vperm.xlu0 %6940, %v8477_v44   ;;  %5390 = vperm.xlu1 %6941, %v8482_v42  }
 0x288   : > { %2967 = vmatmul.mubr.f32.gmra.mrb[58].mxu1 %v9406_v50  ;;  %4568 = vmatmul.mubr.f32.gmra.mrb[60].mxu0 %v9407_v21  ;;  %v9423_v50 = vld [vmem:[#allocation55_spill] sm:$0xff] }
 0x289   : > { %2972 = vmatprep.mubr.f32.mxu1 %v9349_v54  ;;  %4573 = vmatprep.mubr.f32.mxu0 %v9349_v54 }
 0x28b   : > { %5375 = vperm.xlu0 %6940, %v8489_v28   ;;  %6943 = vset.pattern.permute.xlu1 %v7109_v34 }
 0x28c   : > { %2976 = vmatmul.mubr.f32.gmra.mrb[60].mxu1 %v9407_v21  ;;  %4577 = vmatmul.mubr.f32.gmra.mrb[62].mxu0 %v9408_v61  ;;  %v9424_v21 = vld [vmem:[#allocation57_spill] sm:$0xff] }
 0x28d   : > { %2981 = vmatprep.mubr.f32.mxu1 %v9349_v54  ;;  %4582 = vmatprep.mubr.f32.mxu0 %v9349_v54 }
 0x28e   : > { %5422 = vperm.xlu1 %6943, %v8381_v10  }
 0x28f   : > { %5385 = vperm.xlu0 %6940, %v8497_v26  }
 0x290   : > { %2985 = vmatmul.mubr.f32.gmra.mrb[62].mxu1 %v9408_v61  ;;  %4586 = vmatmul.mubr.f32.gmra.mrb[64].mxu0 %v9409_v8  ;;  %v9425_v61 = vld [vmem:[#allocation9_spill] sm:$0xff] }
 0x291   : > { %2990 = vmatprep.mubr.f32.mxu1 %v9349_v54  ;;  %4591 = vmatprep.mubr.f32.mxu0 %v9349_v54 }
 0x292   : > { %5426 = vperm.xlu1 %6943, %v8351_v38  }
 0x293   : > { %6942 = vset.pattern.permute.xlu0 %v7109_v34 }
 0x294   : > { %2994 = vmatmul.mubr.f32.gmra.mrb[64].mxu1 %v9409_v8  ;;  %4595 = vmatmul.mubr.f32.gmra.mrb[66].mxu0 %v9410_v41  ;;  %v7110_v8 = vmov 2  }
 0x295   : > { %2999 = vmatprep.mubr.f32.mxu1 %v9349_v54  ;;  %4600 = vmatprep.mubr.f32.mxu0 %v9349_v54 }
 0x296   : > { %5418 = vperm.xlu0 %6942, %v8369_v9   ;;  %5434 = vperm.xlu1 %6943, %v8393_v46  }
 0x298   : > { %3003 = vmatmul.mubr.f32.gmra.mrb[66].mxu1 %v9410_v41  ;;  %4604 = vmatmul.mubr.f32.gmra.mrb[68].mxu0 %v9411_v22  ;;  %v9428_v41 = vld [vmem:[#allocation14_spill] sm:$0xff] }
 0x299   : > { %3008 = vmatprep.mubr.f32.mxu1 %v9349_v54  ;;  %4609 = vmatprep.mubr.f32.mxu0 %v9349_v54 }
 0x29a   : > { %5430 = vperm.xlu0 %6942, %v8360_v51   ;;  %5442 = vperm.xlu1 %6943, %v8405_v14  }
 0x29c   : > { %3012 = vmatmul.mubr.f32.gmra.mrb[68].mxu1 %v9411_v22  ;;  %4613 = vmatmul.mubr.f32.gmra.mrb[70].mxu0 %v9412_v5  ;;  %v9429_v22 = vld [vmem:[#allocation16_spill] sm:$0xff] }
 0x29d   : > { %3017 = vmatprep.mubr.f32.mxu1 %v9349_v54  ;;  %4618 = vmatprep.mubr.f32.mxu0 %v9349_v54 }
 0x29e   : > { %5438 = vperm.xlu0 %6942, %v8374_v57   ;;  %5450 = vperm.xlu1 %6943, %v8417_v15  }
 0x2a0   : > { %3021 = vmatmul.mubr.f32.gmra.mrb[70].mxu1 %v9412_v5  ;;  %4622 = vmatmul.mubr.f32.gmra.mrb[72].mxu0 %v9413_v49  ;;  %v7111_v5 = vmov 3  }
 0x2a1   : > { %3026 = vmatprep.mubr.f32.mxu1 %v9349_v54  ;;  %4627 = vmatprep.mubr.f32.mxu0 %v9349_v54 }
 0x2a2   : > { %5446 = vperm.xlu0 %6942, %v8386_v25   ;;  %5458 = vperm.xlu1 %6943, %v8429_v1  }
 0x2a4   : > { %3030 = vmatmul.mubr.f32.gmra.mrb[72].mxu1 %v9413_v49  ;;  %4631 = vmatmul.mubr.f32.gmra.mrb[74].mxu0 %v9414_v48 }
 0x2a5   : > { %3035 = vmatprep.mubr.f32.mxu1 %v9349_v54  ;;  %4636 = vmatprep.mubr.f32.mxu0 %v9349_v54 }
 0x2a6   : > { %5454 = vperm.xlu0 %6942, %v8398_v13   ;;  %5466 = vperm.xlu1 %6943, %v8441_v23  }
 0x2a8   : > { %3039 = vmatmul.mubr.f32.gmra.mrb[74].mxu1 %v9414_v48  ;;  %4640 = vmatmul.mubr.f32.gmra.mrb[76].mxu0 %v9415_v32 }
 0x2a9   : > { %3044 = vmatprep.mubr.f32.mxu1 %v9349_v54  ;;  %4645 = vmatprep.mubr.f32.mxu0 %v9349_v54 }
 0x2aa   : > { %5462 = vperm.xlu0 %6942, %v8410_v19   ;;  %5474 = vperm.xlu1 %6943, %v8453_v56  }
 0x2ac   : > { %3048 = vmatmul.mubr.f32.gmra.mrb[76].mxu1 %v9415_v32  ;;  %4649 = vmatmul.mubr.f32.gmra.mrb[78].mxu0 %v9416_v39 }
 0x2ad   : > { %3053 = vmatprep.mubr.f32.mxu1 %v9349_v54  ;;  %4654 = vmatprep.mubr.f32.mxu0 %v9349_v54 }
 0x2ae   : > { %5470 = vperm.xlu0 %6942, %v8422_v4   ;;  %5482 = vperm.xlu1 %6943, %v8465_v27  }
 0x2b0   : > { %3057 = vmatmul.mubr.f32.gmra.mrb[78].mxu1 %v9416_v39  ;;  %4658 = vmatmul.mubr.f32.gmra.mrb[80].mxu0 %v9417_v43 }
 0x2b1   : > { %3062 = vmatprep.mubr.f32.mxu1 %v9349_v54  ;;  %4663 = vmatprep.mubr.f32.mxu0 %v9349_v54 }
 0x2b2   : > { %5478 = vperm.xlu0 %6942, %v8434_v33   ;;  %5490 = vperm.xlu1 %6943, %v8477_v44  }
 0x2b4   : > { %3066 = vmatmul.mubr.f32.gmra.mrb[80].mxu1 %v9417_v43  ;;  %4667 = vmatmul.mubr.f32.gmra.mrb[82].mxu0 %v9418_v47 }
 0x2b5   : > { %3071 = vmatprep.mubr.f32.mxu1 %v9349_v54  ;;  %4672 = vmatprep.mubr.f32.mxu0 %v9349_v54 }
 0x2b6   : > { %5486 = vperm.xlu0 %6942, %v8446_v29   ;;  %5498 = vperm.xlu1 %6943, %v8489_v28  }
 0x2b8   : > { %3075 = vmatmul.mubr.f32.gmra.mrb[82].mxu1 %v9418_v47  ;;  %4676 = vmatmul.mubr.f32.gmra.mrb[84].mxu0 %v9419_v59 }
 0x2b9   : > { %3080 = vmatprep.mubr.f32.mxu1 %v9349_v54  ;;  %4681 = vmatprep.mubr.f32.mxu0 %v9349_v54 }
 0x2ba   : > { %5494 = vperm.xlu0 %6942, %v8458_v45   ;;  %5506 = vperm.xlu1 %6943, %v8497_v26  }
 0x2bc   : > { %3084 = vmatmul.mubr.f32.gmra.mrb[84].mxu1 %v9419_v59  ;;  %4685 = vmatmul.mubr.f32.gmra.mrb[86].mxu0 %v9420_v35 }
 0x2bd   : > { %3089 = vmatprep.mubr.f32.mxu1 %v9349_v54  ;;  %4690 = vmatprep.mubr.f32.mxu0 %v9349_v54 }
 0x2be   : > { %5502 = vperm.xlu0 %6942, %v8470_v55   ;;  %6944 = vset.pattern.permute.xlu1 %v7110_v8 }
 0x2bf   : > { %5562 = vperm.xlu1 %6944, %v8369_v9  }
 0x2c0   : > { %3093 = vmatmul.mubr.f32.gmra.mrb[86].mxu1 %v9420_v35  ;;  %4694 = vmatmul.mubr.f32.gmra.mrb[88].mxu0 %v9421_v11 }
 0x2c1   : > { %3098 = vmatprep.mubr.f32.mxu1 %v9349_v54  ;;  %4699 = vmatprep.mubr.f32.mxu0 %v9349_v54 }
 0x2c2   : > { %5510 = vperm.xlu0 %6942, %v8482_v42  }
 0x2c3   : > { %5570 = vperm.xlu1 %6944, %v8351_v38  }
 0x2c4   : > { %3102 = vmatmul.mubr.f32.gmra.mrb[88].mxu1 %v9421_v11  ;;  %4703 = vmatmul.mubr.f32.gmra.mrb[90].mxu0 %v9422_v63 }
 0x2c5   : > { %3107 = vmatprep.mubr.f32.mxu1 %v9349_v54  ;;  %4708 = vmatprep.mubr.f32.mxu0 %v9349_v54 }
 0x2c6   : > { %6945 = vset.pattern.permute.xlu0 %v7110_v8 }
 0x2c7   : > { %5566 = vperm.xlu0 %6945, %v8381_v10   ;;  %5574 = vperm.xlu1 %6944, %v8360_v51  }
 0x2c8   : > { %3111 = vmatmul.mubr.f32.gmra.mrb[90].mxu1 %v9422_v63  ;;  %4712 = vmatmul.mubr.f32.gmra.mrb[92].mxu0 %v9423_v50 }
 0x2c9   : > { %3116 = vmatprep.mubr.f32.mxu1 %v9349_v54  ;;  %4717 = vmatprep.mubr.f32.mxu0 %v9349_v54 }
 0x2cb   : > { %5578 = vperm.xlu0 %6945, %v8393_v46   ;;  %5582 = vperm.xlu1 %6944, %v8374_v57  }
 0x2cc   : > { %3120 = vmatmul.mubr.f32.gmra.mrb[92].mxu1 %v9423_v50  ;;  %4721 = vmatmul.mubr.f32.gmra.mrb[94].mxu0 %v9424_v21 }
 0x2cd   : > { %3125 = vmatprep.mubr.f32.mxu1 %v9349_v54  ;;  %4797 = vmatprep.mubr.f32.mxu0 %v9349_v54 }
 0x2cf   : > { %5586 = vperm.xlu0 %6945, %v8405_v14   ;;  %5590 = vperm.xlu1 %6944, %v8386_v25  }
 0x2d0   : > { %3129 = vmatmul.mubr.f32.gmra.mrb[94].mxu1 %v9424_v21  ;;  %4799 = vmatmul.mubr.f32.vlgmr.msra.gmra.mrb[48].mxu0 %v7256_v20 }
 0x2d1   : > { %3205 = vmatprep.mubr.f32.mxu1 %v9349_v54  ;;  %4804 = vmatprep.mubr.f32.mxu0 %v9349_v54 }
 0x2d2   : > { %4969 = vmatpush1.msra.mxu0 %v7859_v37  ;;  %v9426_v37 = vld [vmem:[#allocation10_spill] sm:$0xff] }
 0x2d3   : > { %5594 = vperm.xlu0 %6945, %v8417_v15   ;;  %5598 = vperm.xlu1 %6944, %v8398_v13  }
 0x2d4   : > { %3207 = vmatmul.mubr.f32.vlgmr.msra.gmra.mrb[48].mxu1 %v7256_v20  ;;  %4806 = vmatmul.mubr.f32.gmra.mrb[50].mxu0 %v9425_v61 }
 0x2d5   : > { %3377 = vmatpush1.msra.mxu1 %v7869_v53  ;;  %3212 = vmatprep.mubr.f32.mxu1 %v9349_v54  ;;  %v9427_v53 = vld [vmem:[#allocation11_spill] sm:$0xff] }
 0x2d6   : > { %4811 = vmatprep.mubr.f32.mxu0 %v9349_v54 }
 0x2d7   : > { %5602 = vperm.xlu0 %6945, %v8429_v1   ;;  %5606 = vperm.xlu1 %6944, %v8410_v19  }
 0x2d8   : > { %3214 = vmatmul.mubr.f32.gmra.mrb[50].mxu1 %v9425_v61  ;;  %4813 = vmatmul.mubr.f32.gmra.mrb[52].mxu0 %v9426_v37 }
 0x2d9   : > { %3219 = vmatprep.mubr.f32.mxu1 %v9349_v54  ;;  %4818 = vmatprep.mubr.f32.mxu0 %v9349_v54 }
 0x2db   : > { %5610 = vperm.xlu0 %6945, %v8441_v23   ;;  %5614 = vperm.xlu1 %6944, %v8422_v4  }
 0x2dc   : > { %3221 = vmatmul.mubr.f32.gmra.mrb[52].mxu1 %v9426_v37  ;;  %4820 = vmatmul.mubr.f32.gmra.mrb[54].mxu0 %v9427_v53 }
 0x2dd   : > { %3226 = vmatprep.mubr.f32.mxu1 %v9349_v54  ;;  %4825 = vmatprep.mubr.f32.mxu0 %v9349_v54 }
 0x2df   : > { %5618 = vperm.xlu0 %6945, %v8453_v56   ;;  %5622 = vperm.xlu1 %6944, %v8434_v33  }
 0x2e0   : > { %3228 = vmatmul.mubr.f32.gmra.mrb[54].mxu1 %v9427_v53  ;;  %4827 = vmatmul.mubr.f32.gmra.mrb[56].mxu0 %v9428_v41 }
 0x2e1   : > { %3233 = vmatprep.mubr.f32.mxu1 %v9349_v54  ;;  %4832 = vmatprep.mubr.f32.mxu0 %v9349_v54 }
 0x2e3   : > { %5626 = vperm.xlu0 %6945, %v8465_v27   ;;  %5630 = vperm.xlu1 %6944, %v8446_v29  }
 0x2e4   : > { %3235 = vmatmul.mubr.f32.gmra.mrb[56].mxu1 %v9428_v41  ;;  %4834 = vmatmul.mubr.f32.gmra.mrb[58].mxu0 %v9429_v22 }
 0x2e5   : > { %3240 = vmatprep.mubr.f32.mxu1 %v9349_v54  ;;  %4839 = vmatprep.mubr.f32.mxu0 %v9349_v54 }
 0x2e7   : > { %5634 = vperm.xlu0 %6945, %v8477_v44   ;;  %5638 = vperm.xlu1 %6944, %v8458_v45  }
 0x2e8   : > { %3242 = vmatmul.mubr.f32.gmra.mrb[58].mxu1 %v9429_v22  ;;  %4841 = vmatmul.mubr.f32.gmra.mrb[60].mxu0 %v7325_v52 }
 0x2e9   : > { %3247 = vmatprep.mubr.f32.mxu1 %v9349_v54  ;;  %4846 = vmatprep.mubr.f32.mxu0 %v9349_v54 }
 0x2eb   : > { %5642 = vperm.xlu0 %6945, %v8489_v28   ;;  %5646 = vperm.xlu1 %6944, %v8470_v55  }
 0x2ec   : > { %3249 = vmatmul.mubr.f32.gmra.mrb[60].mxu1 %v7325_v52  ;;  %4848 = vmatmul.mubr.f32.gmra.mrb[62].mxu0 %v7345_v60 }
 0x2ed   : > { %3254 = vmatprep.mubr.f32.mxu1 %v9349_v54  ;;  %4853 = vmatprep.mubr.f32.mxu0 %v9349_v54 }
 0x2ef   : > { %5650 = vperm.xlu0 %6945, %v8497_v26   ;;  %5654 = vperm.xlu1 %6944, %v8482_v42  }
 0x2f0   : > { %3256 = vmatmul.mubr.f32.gmra.mrb[62].mxu1 %v7345_v60  ;;  %4855 = vmatmul.mubr.f32.gmra.mrb[64].mxu0 %v7372_v12 }
 0x2f1   : > { %3261 = vmatprep.mubr.f32.mxu1 %v9349_v54  ;;  %4860 = vmatprep.mubr.f32.mxu0 %v9349_v54 }
 0x2f3   : > { %6946 = vset.pattern.permute.xlu0 %v7111_v5  ;;  %6947 = vset.pattern.permute.xlu1 %v7111_v5 }
 0x2f4   : > { %3263 = vmatmul.mubr.f32.gmra.mrb[64].mxu1 %v7372_v12  ;;  %4862 = vmatmul.mubr.f32.gmra.mrb[66].mxu0 %v7407_v36 }
 0x2f5   : > { %3268 = vmatprep.mubr.f32.mxu1 %v9349_v54  ;;  %4867 = vmatprep.mubr.f32.mxu0 %v9349_v54 }
 0x2f6   : > { %5706 = vperm.xlu0 %6946, %v8369_v9   ;;  %5710 = vperm.xlu1 %6947, %v8381_v10   ;;  %v8724_v9 = vpop.permute.xlu0 %5275 }
 0x2f8   : > { %3270 = vmatmul.mubr.f32.gmra.mrb[66].mxu1 %v7407_v36  ;;  %4869 = vmatmul.mubr.f32.gmra.mrb[68].mxu0 %v7435_v62 }
 0x2f9   : > { %3275 = vmatprep.mubr.f32.mxu1 %v9349_v54  ;;  %4874 = vmatprep.mubr.f32.mxu0 %v9349_v54 }
 0x2fa   : > { %5718 = vperm.xlu0 %6946, %v8360_v51   ;;  %5714 = vperm.xlu1 %6947, %v8351_v38   ;;  %v8705_v38 = vpop.permute.xlu1 %5285 }
 0x2fc   : > { %3277 = vmatmul.mubr.f32.gmra.mrb[68].mxu1 %v7435_v62  ;;  %4876 = vmatmul.mubr.f32.gmra.mrb[70].mxu0 %v7443_v2 }
 0x2fd   : > { %3282 = vmatprep.mubr.f32.mxu1 %v9349_v54  ;;  %4881 = vmatprep.mubr.f32.mxu0 %v9349_v54 }
 0x2fe   : > { %5726 = vperm.xlu0 %6946, %v8374_v57   ;;  %5722 = vperm.xlu1 %6947, %v8393_v46   ;;  %v8715_v51 = vpop.permute.xlu1 %5290 }
 0x300   : > { %3284 = vmatmul.mubr.f32.gmra.mrb[70].mxu1 %v7443_v2  ;;  %4883 = vmatmul.mubr.f32.gmra.mrb[72].mxu0 %v7459_v18 }
 0x301   : > { %3289 = vmatprep.mubr.f32.mxu1 %v9349_v54  ;;  %4888 = vmatprep.mubr.f32.mxu0 %v9349_v54 }
 0x302   : > { %5734 = vperm.xlu0 %6946, %v8386_v25   ;;  %5730 = vperm.xlu1 %6947, %v8405_v14   ;;  %v8729_v57 = vpop.permute.xlu1 %5300 }
 0x304   : > { %3291 = vmatmul.mubr.f32.gmra.mrb[72].mxu1 %v7459_v18  ;;  %4890 = vmatmul.mubr.f32.gmra.mrb[74].mxu0 %v7477_v0 }
 0x305   : > { %3296 = vmatprep.mubr.f32.mxu1 %v9349_v54  ;;  %4895 = vmatprep.mubr.f32.mxu0 %v9349_v54 }
 0x306   : > { %5742 = vperm.xlu0 %6946, %v8398_v13   ;;  %5738 = vperm.xlu1 %6947, %v8417_v15   ;;  %v8740_v10 = vpop.permute.xlu1 %5310 }
 0x308   : > { %3298 = vmatmul.mubr.f32.gmra.mrb[74].mxu1 %v7477_v0  ;;  %4897 = vmatmul.mubr.f32.gmra.mrb[76].mxu0 %v7508_v3 }
 0x309   : > { %3303 = vmatprep.mubr.f32.mxu1 %v9349_v54  ;;  %4902 = vmatprep.mubr.f32.mxu0 %v9349_v54 }
 0x30a   : > { %5750 = vperm.xlu0 %6946, %v8410_v19   ;;  %5746 = vperm.xlu1 %6947, %v8429_v1   ;;  %v8750_v46 = vpop.permute.xlu1 %5320 }
 0x30c   : > { %3305 = vmatmul.mubr.f32.gmra.mrb[76].mxu1 %v7508_v3  ;;  %4904 = vmatmul.mubr.f32.gmra.mrb[78].mxu0 %v7512_v24 }
 0x30d   : > { %3310 = vmatprep.mubr.f32.mxu1 %v9349_v54  ;;  %4909 = vmatprep.mubr.f32.mxu0 %v9349_v54 }
 0x30e   : > { %5758 = vperm.xlu0 %6946, %v8422_v4   ;;  %5754 = vperm.xlu1 %6947, %v8441_v23   ;;  %v8760_v14 = vpop.permute.xlu1 %5330 }
 0x310   : > { %3312 = vmatmul.mubr.f32.gmra.mrb[78].mxu1 %v7512_v24  ;;  %4911 = vmatmul.mubr.f32.gmra.mrb[80].mxu0 %v7541_v7 }
 0x311   : > { %3317 = vmatprep.mubr.f32.mxu1 %v9349_v54  ;;  %4916 = vmatprep.mubr.f32.mxu0 %v9349_v54 }
 0x312   : > { %5766 = vperm.xlu0 %6946, %v8434_v33   ;;  %5762 = vperm.xlu1 %6947, %v8453_v56   ;;  %v8770_v15 = vpop.permute.xlu1 %5340 }
 0x314   : > { %3319 = vmatmul.mubr.f32.gmra.mrb[80].mxu1 %v7541_v7  ;;  %4918 = vmatmul.mubr.f32.gmra.mrb[82].mxu0 %v7559_v30 }
 0x315   : > { %3324 = vmatprep.mubr.f32.mxu1 %v9349_v54  ;;  %4923 = vmatprep.mubr.f32.mxu0 %v9349_v54 }
 0x316   : > { %5774 = vperm.xlu0 %6946, %v8446_v29   ;;  %5770 = vperm.xlu1 %6947, %v8465_v27   ;;  %v8780_v4 = vpop.permute.xlu1 %5350 }
 0x317   : > { %9430 = vst [vmem:[#allocation19_spill] sm:$0xff] %v8780_v4 }
 0x318   : > { %3326 = vmatmul.mubr.f32.gmra.mrb[82].mxu1 %v7559_v30  ;;  %4925 = vmatmul.mubr.f32.gmra.mrb[84].mxu0 %v7577_v58 }
 0x319   : > { %3331 = vmatprep.mubr.f32.mxu1 %v9349_v54  ;;  %4930 = vmatprep.mubr.f32.mxu0 %v9349_v54 }
 0x31a   : > { %5782 = vperm.xlu0 %6946, %v8458_v45   ;;  %5778 = vperm.xlu1 %6947, %v8477_v44  }
 0x31c   : > { %3333 = vmatmul.mubr.f32.gmra.mrb[84].mxu1 %v7577_v58  ;;  %4932 = vmatmul.mubr.f32.gmra.mrb[86].mxu0 %v7595_v17 }
 0x31d   : > { %3338 = vmatprep.mubr.f32.mxu1 %v9349_v54  ;;  %4937 = vmatprep.mubr.f32.mxu0 %v9349_v54 }
 0x31e   : > { %5790 = vperm.xlu0 %6946, %v8470_v55   ;;  %5786 = vperm.xlu1 %6947, %v8489_v28  }
 0x320   : > { %3340 = vmatmul.mubr.f32.gmra.mrb[86].mxu1 %v7595_v17  ;;  %4939 = vmatmul.mubr.f32.gmra.mrb[88].mxu0 %v7600_v16 }
 0x321   : > { %3345 = vmatprep.mubr.f32.mxu1 %v9349_v54  ;;  %4944 = vmatprep.mubr.f32.mxu0 %v9349_v54 }
 0x322   : > { %5798 = vperm.xlu0 %6946, %v8482_v42   ;;  %5794 = vperm.xlu1 %6947, %v8497_v26  }
 0x324   : > { %3347 = vmatmul.mubr.f32.gmra.mrb[88].mxu1 %v7600_v16  ;;  %4946 = vmatmul.mubr.f32.gmra.mrb[90].mxu0 %v7618_v6 }
 0x325   : > { %3352 = vmatprep.mubr.f32.mxu1 %v9349_v54  ;;  %4951 = vmatprep.mubr.f32.mxu0 %v9349_v54 }
 0x328   : > { %3354 = vmatmul.mubr.f32.gmra.mrb[90].mxu1 %v7618_v6  ;;  %4953 = vmatmul.mubr.f32.gmra.mrb[92].mxu0 %v7636_v40 }
 0x329   : > { %3359 = vmatprep.mubr.f32.mxu1 %v9349_v54  ;;  %4958 = vmatprep.mubr.f32.mxu0 %v9349_v54 }
 0x32c   : > { %3361 = vmatmul.mubr.f32.gmra.mrb[92].mxu1 %v7636_v40  ;;  %4960 = vmatmul.mubr.f32.gmra.mrb[94].mxu0 %v7667_v31 }
 0x32d   : > { %3366 = vmatprep.mubr.f32.mxu1 %v9349_v54  ;;  %5032 = vmatprep.mubr.f32.mxu0 %v9349_v54 }
 0x330   : > { %3368 = vmatmul.mubr.f32.gmra.mrb[94].mxu1 %v7667_v31  ;;  %5034 = vmatmul.mubr.f32.vlgmr.msra.gmra.mrb[48].mxu0 %v7256_v20 }
 0x331   : > { %3440 = vmatprep.mubr.f32.mxu1 %v9349_v54  ;;  %5039 = vmatprep.mubr.f32.mxu0 %v9349_v54 }
 0x334   : > { %3442 = vmatmul.mubr.f32.vlgmr.msra.gmra.mrb[48].mxu1 %v7256_v20  ;;  %5041 = vmatmul.mubr.f32.gmra.mrb[50].mxu0 %v9425_v61  ;;  %v8738_v20 = vpop.permute.xlu0 %5280 }
 0x335   : > { %3447 = vmatprep.mubr.f32.mxu1 %v9349_v54  ;;  %5046 = vmatprep.mubr.f32.mxu0 %v9349_v54 }
 0x338   : > { %3449 = vmatmul.mubr.f32.gmra.mrb[50].mxu1 %v9425_v61  ;;  %5048 = vmatmul.mubr.f32.gmra.mrb[52].mxu0 %v9426_v37  ;;  %v8746_v25 = vpop.permute.xlu0 %5295 }
 0x339   : > { %3454 = vmatprep.mubr.f32.mxu1 %v9349_v54  ;;  %5053 = vmatprep.mubr.f32.mxu0 %v9349_v54 }
 0x33c   : > { %3456 = vmatmul.mubr.f32.gmra.mrb[52].mxu1 %v9426_v37  ;;  %5055 = vmatmul.mubr.f32.gmra.mrb[54].mxu0 %v9427_v53  ;;  %v8758_v13 = vpop.permute.xlu0 %5305 }
 0x33d   : > { %3461 = vmatprep.mubr.f32.mxu1 %v9349_v54  ;;  %5060 = vmatprep.mubr.f32.mxu0 %v9349_v54 }
 0x340   : > { %3463 = vmatmul.mubr.f32.gmra.mrb[54].mxu1 %v9427_v53  ;;  %5062 = vmatmul.mubr.f32.gmra.mrb[56].mxu0 %v9428_v41  ;;  %v8766_v19 = vpop.permute.xlu0 %5315 }
 0x341   : > { %3468 = vmatprep.mubr.f32.mxu1 %v9349_v54  ;;  %5067 = vmatprep.mubr.f32.mxu0 %v9349_v54 }
 0x344   : > { %3470 = vmatmul.mubr.f32.gmra.mrb[56].mxu1 %v9428_v41  ;;  %5069 = vmatmul.mubr.f32.gmra.mrb[58].mxu0 %v9429_v22 }
 0x345   : > { %3475 = vmatprep.mubr.f32.mxu1 %v9349_v54  ;;  %5074 = vmatprep.mubr.f32.mxu0 %v9349_v54 }
 0x348   : > { %3477 = vmatmul.mubr.f32.gmra.mrb[58].mxu1 %v9429_v22  ;;  %5076 = vmatmul.mubr.f32.gmra.mrb[60].mxu0 %v7325_v52 }
 0x349   : > { %3482 = vmatprep.mubr.f32.mxu1 %v9349_v54  ;;  %5081 = vmatprep.mubr.f32.mxu0 %v9349_v54 }
 0x34c   : > { %3484 = vmatmul.mubr.f32.gmra.mrb[60].mxu1 %v7325_v52  ;;  %5083 = vmatmul.mubr.f32.gmra.mrb[62].mxu0 %v7345_v60  ;;  %v8778_v52 = vpop.permute.xlu0 %5325 }
 0x34d   : > { %3489 = vmatprep.mubr.f32.mxu1 %v9349_v54  ;;  %5088 = vmatprep.mubr.f32.mxu0 %v9349_v54 }
 0x350   : > { %3491 = vmatmul.mubr.f32.gmra.mrb[62].mxu1 %v7345_v60  ;;  %5090 = vmatmul.mubr.f32.gmra.mrb[64].mxu0 %v7372_v12  ;;  %v8786_v60 = vpop.permute.xlu0 %5335 }
 0x351   : > { %3496 = vmatprep.mubr.f32.mxu1 %v9349_v54  ;;  %5095 = vmatprep.mubr.f32.mxu0 %v9349_v54 }
 0x354   : > { %3498 = vmatmul.mubr.f32.gmra.mrb[64].mxu1 %v7372_v12  ;;  %5097 = vmatmul.mubr.f32.gmra.mrb[66].mxu0 %v7407_v36  ;;  %v8790_v12 = vpop.permute.xlu1 %5360 }
 0x355   : > { %3503 = vmatprep.mubr.f32.mxu1 %v9349_v54  ;;  %5102 = vmatprep.mubr.f32.mxu0 %v9349_v54  ;;  %9431 = vst [vmem:[#allocation21_spill] sm:$0xff] %v8790_v12 }
 0x358   : > { %3505 = vmatmul.mubr.f32.gmra.mrb[66].mxu1 %v7407_v36  ;;  %5104 = vmatmul.mubr.f32.gmra.mrb[68].mxu0 %v7435_v62  ;;  %v8798_v36 = vpop.permute.xlu0 %5345  ;;  %v8800_v1 = vpop.permute.xlu1 %5370 }
 0x359   : > { %3510 = vmatprep.mubr.f32.mxu1 %v9349_v54  ;;  %5109 = vmatprep.mubr.f32.mxu0 %v9349_v54  ;;  %9432 = vst [vmem:[#allocation22_spill] sm:$0xff] %v8800_v1 }
 0x35c   : > { %3512 = vmatmul.mubr.f32.gmra.mrb[68].mxu1 %v7435_v62  ;;  %5111 = vmatmul.mubr.f32.gmra.mrb[70].mxu0 %v7443_v2  ;;  %v8806_v62 = vpop.permute.xlu0 %5355 }
 0x35d   : > { %3517 = vmatprep.mubr.f32.mxu1 %v9349_v54  ;;  %5116 = vmatprep.mubr.f32.mxu0 %v9349_v54  ;;  %9433 = vst [vmem:[#allocation25_spill] sm:$0xff] %v8806_v62 }
 0x360   : > { %3519 = vmatmul.mubr.f32.gmra.mrb[70].mxu1 %v7443_v2  ;;  %5118 = vmatmul.mubr.f32.gmra.mrb[72].mxu0 %v7459_v18  ;;  %v8810_v2 = vpop.permute.xlu1 %5380 }
 0x361   : > { %3524 = vmatprep.mubr.f32.mxu1 %v9349_v54  ;;  %5123 = vmatprep.mubr.f32.mxu0 %v9349_v54  ;;  %9434 = vst [vmem:[#allocation26_spill] sm:$0xff] %v8810_v2 }
 0x364   : > { %3526 = vmatmul.mubr.f32.gmra.mrb[72].mxu1 %v7459_v18  ;;  %5125 = vmatmul.mubr.f32.gmra.mrb[74].mxu0 %v7477_v0  ;;  %v8818_v18 = vpop.permute.xlu0 %5365  ;;  %v8820_v33 = vpop.permute.xlu1 %5390 }
 0x365   : > { %3531 = vmatprep.mubr.f32.mxu1 %v9349_v54  ;;  %5130 = vmatprep.mubr.f32.mxu0 %v9349_v54  ;;  %9435 = vst [vmem:[#allocation28_spill] sm:$0xff] %v8818_v18  ;;  %9436 = vst [vmem:[#allocation30_spill] sm:$0xff] %v8820_v33 }
 0x368   : > { %3533 = vmatmul.mubr.f32.gmra.mrb[74].mxu1 %v7477_v0  ;;  %5132 = vmatmul.mubr.f32.gmra.mrb[76].mxu0 %v7508_v3  ;;  %v8826_v0 = vpop.permute.xlu0 %5375 }
 0x369   : > { %3538 = vmatprep.mubr.f32.mxu1 %v9349_v54  ;;  %5137 = vmatprep.mubr.f32.mxu0 %v9349_v54  ;;  %9437 = vst [vmem:[#allocation32_spill] sm:$0xff] %v8826_v0 }
 0x36c   : > { %3540 = vmatmul.mubr.f32.gmra.mrb[76].mxu1 %v7508_v3  ;;  %5139 = vmatmul.mubr.f32.gmra.mrb[78].mxu0 %v7512_v24  ;;  %v8830_v3 = vpop.permute.xlu1 %5422 }
 0x36d   : > { %3545 = vmatprep.mubr.f32.mxu1 %v9349_v54  ;;  %5144 = vmatprep.mubr.f32.mxu0 %v9349_v54 }
 0x370   : > { %3547 = vmatmul.mubr.f32.gmra.mrb[78].mxu1 %v7512_v24  ;;  %5146 = vmatmul.mubr.f32.gmra.mrb[80].mxu0 %v7541_v7  ;;  %v8838_v24 = vpop.permute.xlu0 %5385  ;;  %v8840_v23 = vpop.permute.xlu1 %5426 }
 0x371   : > { %3552 = vmatprep.mubr.f32.mxu1 %v9349_v54  ;;  %5151 = vmatprep.mubr.f32.mxu0 %v9349_v54  ;;  %9438 = vst [vmem:[#allocation34_spill] sm:$0xff] %v8838_v24 }
 0x374   : > { %3554 = vmatmul.mubr.f32.gmra.mrb[80].mxu1 %v7541_v7  ;;  %5153 = vmatmul.mubr.f32.gmra.mrb[82].mxu0 %v7559_v30  ;;  %v8846_v7 = vpop.permute.xlu0 %5418 }
 0x375   : > { %3559 = vmatprep.mubr.f32.mxu1 %v9349_v54  ;;  %5158 = vmatprep.mubr.f32.mxu0 %v9349_v54 }
 0x378   : > { %3561 = vmatmul.mubr.f32.gmra.mrb[82].mxu1 %v7559_v30  ;;  %5160 = vmatmul.mubr.f32.gmra.mrb[84].mxu0 %v7577_v58  ;;  %v8850_v30 = vpop.permute.xlu1 %5434 }
 0x379   : > { %3566 = vmatprep.mubr.f32.mxu1 %v9349_v54  ;;  %5165 = vmatprep.mubr.f32.mxu0 %v9349_v54 }
 0x37c   : > { %3568 = vmatmul.mubr.f32.gmra.mrb[84].mxu1 %v7577_v58  ;;  %5167 = vmatmul.mubr.f32.gmra.mrb[86].mxu0 %v7595_v17  ;;  %v8858_v58 = vpop.permute.xlu0 %5430  ;;  %v8860_v29 = vpop.permute.xlu1 %5442 }
 0x37d   : > { %3573 = vmatprep.mubr.f32.mxu1 %v9349_v54  ;;  %5172 = vmatprep.mubr.f32.mxu0 %v9349_v54 }
 0x380   : > { %3575 = vmatmul.mubr.f32.gmra.mrb[86].mxu1 %v7595_v17  ;;  %5174 = vmatmul.mubr.f32.gmra.mrb[88].mxu0 %v7600_v16  ;;  %v8866_v17 = vpop.permute.xlu0 %5438 }
 0x381   : > { %3580 = vmatprep.mubr.f32.mxu1 %v9349_v54  ;;  %5179 = vmatprep.mubr.f32.mxu0 %v9349_v54 }
 0x384   : > { %3582 = vmatmul.mubr.f32.gmra.mrb[88].mxu1 %v7600_v16  ;;  %5181 = vmatmul.mubr.f32.gmra.mrb[90].mxu0 %v7618_v6  ;;  %v8870_v16 = vpop.permute.xlu1 %5450  ;;  %v8874_v56 = vpop.permute.xlu0 %5446 }
 0x385   : > { %3587 = vmatprep.mubr.f32.mxu1 %v9349_v54  ;;  %5186 = vmatprep.mubr.f32.mxu0 %v9349_v54 }
 0x388   : > { %3589 = vmatmul.mubr.f32.gmra.mrb[90].mxu1 %v7618_v6  ;;  %5188 = vmatmul.mubr.f32.gmra.mrb[92].mxu0 %v7636_v40  ;;  %v8876_v6 = vpop.permute.xlu1 %5458  ;;  %v8878_v45 = vpop.permute.xlu0 %5454 }
 0x389   : > { %3594 = vmatprep.mubr.f32.mxu1 %v9349_v54  ;;  %5193 = vmatprep.mubr.f32.mxu0 %v9349_v54 }
 0x38c   : > { %3596 = vmatmul.mubr.f32.gmra.mrb[92].mxu1 %v7636_v40  ;;  %5195 = vmatmul.mubr.f32.gmra.mrb[94].mxu0 %v7667_v31  ;;  %v8880_v27 = vpop.permute.xlu1 %5466  ;;  %v8882_v55 = vpop.permute.xlu0 %5462 }
 0x38d   : > { %3601 = vmatprep.mubr.f32.mxu1 %v9349_v54 }
 0x390   : > { %3603 = vmatmul.mubr.f32.gmra.mrb[94].mxu1 %v7667_v31  ;;  %v8884_v44 = vpop.permute.xlu1 %5474  ;;  %v8886_v40 = vpop.permute.xlu0 %5470 }
 0x391   : > { %9439 = vst [vmem:[#allocation36_spill] sm:$0xff] %v8884_v44 }
 0x394   : > { %v8888_v42 = vpop.permute.xlu1 %5482  ;;  %v8890_v28 = vpop.permute.xlu0 %5478 }
 0x395   : > { %9440 = vst [vmem:[#allocation38_spill] sm:$0xff] %v8888_v42  ;;  %9441 = vst [vmem:[#allocation41_spill] sm:$0xff] %v8890_v28 }
 0x398   : > { %v8892_v54 = vpop.permute.xlu1 %5490  ;;  %v8894_v31 = vpop.permute.xlu0 %5486 }
 0x399   : > { %9442 = vst [vmem:[#allocation42_spill] sm:$0xff] %v8892_v54  ;;  %9443 = vst [vmem:[#allocation44_spill] sm:$0xff] %v8894_v31 }
 0x39c   : > { %v8896_v49 = vpop.permute.xlu1 %5498  ;;  %v8898_v34 = vpop.permute.xlu0 %5494 }
 0x39d   : > { %9444 = vst [vmem:[#allocation46_spill] sm:$0xff] %v8896_v49  ;;  %9445 = vst [vmem:[#allocation48_spill] sm:$0xff] %v8898_v34 }
 0x3a0   : > { %v8900_v26 = vpop.permute.xlu1 %5506  ;;  %v8902_v48 = vpop.permute.xlu0 %5502 }
 0x3a1   : > { %9446 = vst [vmem:[#allocation50_spill] sm:$0xff] %v8900_v26  ;;  %9447 = vst [vmem:[#allocation52_spill] sm:$0xff] %v8902_v48 }
 0x3a4   : > { %v8904_v32 = vpop.permute.xlu1 %5562  ;;  %v8906_v39 = vpop.permute.xlu0 %5510 }
 0x3a5   : > { %9448 = vst [vmem:[#allocation54_spill] sm:$0xff] %v8906_v39 }
 0x3a8   : > { %v8908_v43 = vpop.permute.xlu1 %5570  ;;  %v8910_v47 = vpop.permute.xlu0 %5566 }
 0x3ac   : > { %v8912_v59 = vpop.permute.xlu1 %5574  ;;  %v8914_v35 = vpop.permute.xlu0 %5578 }
 0x3b0   : > { %v8916_v11 = vpop.permute.xlu1 %5582  ;;  %v8918_v63 = vpop.permute.xlu0 %5586 }
 0x3b4   : > { %v8920_v50 = vpop.permute.xlu1 %5590  ;;  %v8922_v21 = vpop.permute.xlu0 %5594 }
 0x3b8   : > { %v8924_v61 = vpop.permute.xlu1 %5598  ;;  %v8926_v8 = vpop.permute.xlu0 %5602 }
 0x3bc   : > { %v8928_v37 = vpop.permute.xlu1 %5606  ;;  %v8930_v53 = vpop.permute.xlu0 %5610 }
 0x3c0   : > { %v8932_v41 = vpop.permute.xlu1 %5614  ;;  %v8936_v22 = vpop.permute.xlu0 %5618 }
 0x3c1   : > { %9449 = vst [vmem:[#allocation56_spill] sm:$0xff] %v8936_v22 }
 0x3c4   : > { %v8942_v5 = vpop.permute.xlu1 %5622 }
 0x3c5   : > { %9450 = vst [vmem:[#allocation58_spill] sm:$0xff] %v8942_v5 }
 0x3c6   : > { %6964 = shalt.err (!%p6961_p7)
}
 0x3c7   : > { %s6965_s27 = scalar_lea.hbm %s8950_s30, 3072  ;;  %s6969_s16 = scalar_lea.hbm %s9204_s4, 18432 }
 0x3c8   : > { %p6966_p9 = scmp.ne.s32.totalorder %s8950_s30, %s6965_s27  ;;  %p6970_p12 = scmp.lt.u32.totalorder %s8950_s30, %s9204_s4 }
 0x3c9   : > { %p6971_p13 = scmp.lt.u32.totalorder %s6969_s16, %s6965_s27  ;;  %p6973_p1 = scmp.lt.u32.totalorder %s6965_s27, %s8950_s30 }
 0x3ca   : > { %p6967_p10 = pnand %p6966_p9, %p7200_p3 }
 0x3cb   : > { %p6972_p0 = por %p6971_p13, %p6970_p12 }
 0x3cc   : > { %p6968_p11 = pneg %p6967_p10 }
 0x3cd   : > { %p6974_p2 = por %p6973_p1, %p6972_p0 }
 0x3cf   : > { %p6975_p4 = pnand %p6974_p2, %p6968_p11 }
 0x3d1   : > { %6978 = shalt.err (!%p6975_p4)
}
 0x3d2   : > { %s7113_s22 = smov 128   ;;  %s7114_s17 = smov 8   ;;  %v8982_v39 = vpop.permute.xlu0 %5626  ;;  %v8991_v33 = vpop.permute.xlu1 %5630 }
 0x3d3   : > { %6853 = dma.vmem_to_hbm [thread:$0]  (%p7200_p3), %s8953_s0, 3072, %s8950_s30, %s9315_s21, %s7113_s22, %s7113_s22, %s7114_s17   ;;  %9451 = vst [vmem:[#allocation59_spill] sm:$0xff] %v8982_v39  ;;  %9452 = vst [vmem:[#allocation12_spill] sm:$0xff] %v8991_v33 }
 0x3d4   : > { %s8988_s13 = scalar_lea.hbm %s9203_s3, %s8944_s15  ;;  %s5900_s16 = sshll.u32 %s8117_s9, 4  ;;  %s8993_s16 = int_to_ptr.vmem [resolvable:$true] %s5900_s16 }
 0x3d5   : > { %s9453_s26 = sand.u32 1, %s7081_s19   ;;  %s6979_s1 = scalar_lea.vmem %s8993_s16, 3072 }
 0x3d6   : > { %s8997_s14 = scalar_lea.sflag [#allocation3], %s9453_s26  ;;  %p6980_p5 = scmp.ne.s32.totalorder %s8993_s16, %s6979_s1 }
 0x3d7   : > { %s7115_s0 = smov [#allocation2]  }
 0x3d8   : > { %p6981_p6 = pnand %p6980_p5, %p7200_p3  ;;  %s6983_s30 = sshll.u32 %s7115_s0, 4  ;;  %s6984_s30 = int_to_ptr.vmem [resolvable:$false] %s6983_s30 }
 0x3d9   : > { %s6985_s27 = scalar_lea.vmem %s6984_s30, 6144  ;;  %p6986_p9 = scmp.lt.s32.totalorder %s8993_s16, %s6984_s30 }
 0x3da   : > { %p6982_p7 = pneg %p6981_p6  ;;  %p6987_p10 = scmp.lt.s32.totalorder %s6985_s27, %s6979_s1 }
 0x3dc   : > { %p6988_p11 = por %p6987_p10, %p6986_p9 }
 0x3de   : > { %p6989_p12 = pnand %p6988_p11, %p6982_p7 }
 0x3e0   : > { %6992 = shalt.err (!%p6989_p12)
}
 0x3e1   : > { %s6993_s9 = scalar_lea.hbm %s8988_s13, 3072  ;;  %s6997_s0 = scalar_lea.hbm %s9203_s3, 18432 }
 0x3e2   : > { %p6994_p13 = scmp.ne.s32.totalorder %s8988_s13, %s6993_s9  ;;  %p6998_p2 = scmp.lt.u32.totalorder %s8988_s13, %s9203_s3 }
 0x3e3   : > { %p6999_p4 = scmp.lt.u32.totalorder %s6997_s0, %s6993_s9  ;;  %p7001_p6 = scmp.lt.u32.totalorder %s6993_s9, %s8988_s13 }
 0x3e4   : > { %p6995_p0 = pnand %p6994_p13, %p7200_p3 }
 0x3e5   : > { %p7000_p5 = por %p6999_p4, %p6998_p2 }
 0x3e6   : > { %p6996_p1 = pneg %p6995_p0 }
 0x3e7   : > { %p7002_p7 = por %p7001_p6, %p7000_p5 }
 0x3e9   : > { %p7003_p9 = pnand %p7002_p7, %p6996_p1 }
 0x3eb   : > { %7006 = shalt.err (!%p7003_p9)
}
 0x3ec   : > { %6852 = dma.vmem_to_hbm [thread:$0]  (%p7200_p3), %s8993_s16, 3072, %s8988_s13, %s8997_s14, %s7113_s22, %s7113_s22, %s7114_s17   ;;  %v9024_v26 = vpop.permute.xlu0 %5634  ;;  %v9026_v24 = vpop.permute.xlu1 %5638 }
 0x3ed   : > { %9454 = vst [vmem:[#allocation13_spill] sm:$0xff] %v9024_v26  ;;  %9455 = vst [vmem:[#allocation15_spill] sm:$0xff] %v9026_v24  ;;  %s9044_s1 = scalar_lea.vmem [#allocation6], %s8106_s8  ;;  %s9139_s16 = scalar_lea.hbm %s9205_s5, %s8944_s15 }
 0x3ee   : > { %s5938_s8 = sshll.u32 %s9044_s1, 4  ;;  %s7116_s27 = smov [#allocation6]   ;;  %s9141_s8 = int_to_ptr.vmem [resolvable:$true] %s5938_s8 }
 0x3ef   : > { %s7007_s14 = scalar_lea.vmem %s9141_s8, 3072  ;;  %s7011_s9 = sshll.u32 %s7116_s27, 4  ;;  %s7012_s9 = int_to_ptr.vmem [resolvable:$false] %s7011_s9 }
 0x3f0   : > { %v9028_v48 = vpop.permute.xlu0 %5642  ;;  %v9030_v2 = vpop.permute.xlu1 %5646  ;;  %p7008_p10 = scmp.ne.s32.totalorder %s9141_s8, %s7007_s14  ;;  %s7013_s10 = scalar_lea.vmem %s7012_s9, 6144 }
 0x3f1   : > { %9456 = vst [vmem:[#allocation17_spill] sm:$0xff] %v9028_v48  ;;  %9457 = vst [vmem:[#allocation18_spill] sm:$0xff] %v9030_v2  ;;  %p7014_p13 = scmp.lt.s32.totalorder %s9141_s8, %s7012_s9  ;;  %p7015_p0 = scmp.lt.s32.totalorder %s7013_s10, %s7007_s14 }
 0x3f2   : > { %p7009_p11 = pnand %p7008_p10, %p7200_p3 }
 0x3f3   : > { %p7016_p1 = por %p7015_p0, %p7014_p13 }
 0x3f4   : > { %v9032_v49 = vpop.permute.xlu0 %5650  ;;  %v9034_v34 = vpop.permute.xlu1 %5654  ;;  %p7010_p12 = pneg %p7009_p11 }
 0x3f5   : > { %9458 = vst [vmem:[#allocation20_spill] sm:$0xff] %v9032_v49  ;;  %9459 = vst [vmem:[#allocation23_spill] sm:$0xff] %v9034_v34 }
 0x3f6   : > { %p7017_p2 = pnand %p7016_p1, %p7010_p12 }
 0x3f8   : > { %v5707_v39 = vpop.permute.xlu0 %5706  ;;  %v5711_v24 = vpop.permute.xlu1 %5710 }
 0x403   : > { %v5035_v0 = vpop.f32.mrb[48].mxu0 }
 0x404   : > { %v5037_v1 = vpop.f32.mrb[49].mxu0  ;;  %v5657_v48 = vmul.f32 %v8904_v32, %v5035_v0 }
 0x405   : > { %v5801_v28 = vmul.f32 %v5707_v39, %v5037_v1 }
 0x407   : > { %v3443_v54 = vpop.f32.mrb[48].mxu1  ;;  %v5042_v18 = vpop.f32.mrb[50].mxu0 }
 0x408   : > { %v5393_v33 = vmul.f32 %v8724_v9, %v3443_v54  ;;  %v3445_v31 = vpop.f32.mrb[49].mxu1  ;;  %v5044_v12 = vpop.f32.mrb[51].mxu0  ;;  %v5658_v54 = vmul.f32 %v8910_v47, %v5042_v18 }
 0x409   : > { %v5513_v26 = vmul.f32 %v8846_v7, %v3445_v31 }
 0x40b   : > { %v5537_v42 = vadd.f32 %v5513_v26, %v5393_v33  ;;  %v3450_v2 = vpop.f32.mrb[50].mxu1  ;;  %v5049_v49 = vpop.f32.mrb[52].mxu0 }
 0x40c   : > { %v5394_v62 = vmul.f32 %v8738_v20, %v3450_v2  ;;  %v3452_v34 = vpop.f32.mrb[51].mxu1  ;;  %v5051_v5 = vpop.f32.mrb[53].mxu0  ;;  %v5802_v20 = vmul.f32 %v5711_v24, %v5044_v12  ;;  %v5659_v18 = vmul.f32 %v8908_v43, %v5049_v49 }
 0x40d   : > { %v5681_v4 = vadd.f32 %v5657_v48, %v5537_v42  ;;  %v5514_v9 = vmul.f32 %v8830_v3, %v3452_v34  ;;  %v5715_v3 = vpop.permute.xlu1 %5714  ;;  %v5719_v24 = vpop.permute.xlu0 %5718 }
 0x40e   : > { %v5803_v32 = vmul.f32 %v5715_v3, %v5051_v5 }
 0x40f   : > { %v5825_v22 = vadd.f32 %v5801_v28, %v5681_v4  ;;  %v5538_v7 = vadd.f32 %v5514_v9, %v5394_v62  ;;  %v3457_v31 = vpop.f32.mrb[52].mxu1  ;;  %v5056_v44 = vpop.f32.mrb[54].mxu0 }
 0x410   : > { %v5395_v0 = vmul.f32 %v8705_v38, %v3457_v31  ;;  %v3459_v33 = vpop.f32.mrb[53].mxu1  ;;  %v5058_v26 = vpop.f32.mrb[55].mxu0 }
 0x411   : > { %5849 = vst [vmem:[%s9044_s1] sm:$0xff] %v5825_v22  ;;  %v5682_v1 = vadd.f32 %v5658_v54, %v5538_v7  ;;  %v5515_v2 = vmul.f32 %v8840_v23, %v3459_v33  ;;  %v5660_v23 = vmul.f32 %v8912_v59, %v5056_v44  ;;  %v5804_v7 = vmul.f32 %v5719_v24, %v5058_v26 }
 0x413   : > { %v5826_v4 = vadd.f32 %v5802_v20, %v5682_v1  ;;  %v5539_v62 = vadd.f32 %v5515_v2, %v5395_v0  ;;  %v3464_v42 = vpop.f32.mrb[54].mxu1  ;;  %v5063_v28 = vpop.f32.mrb[56].mxu0 }
 0x414   : > { %v5396_v38 = vmul.f32 %v8715_v51, %v3464_v42  ;;  %v3466_v34 = vpop.f32.mrb[55].mxu1  ;;  %v5065_v48 = vpop.f32.mrb[57].mxu0 }
 0x415   : > { %5850 = vst [vmem:[%s9044_s1 + $0x8] sm:$0xff] %v5826_v4  ;;  %v5683_v39 = vadd.f32 %v5659_v18, %v5539_v62  ;;  %v5516_v12 = vmul.f32 %v8858_v58, %v3466_v34  ;;  %v5723_v0 = vpop.permute.xlu1 %5722  ;;  %v5661_v58 = vmul.f32 %v8914_v35, %v5063_v28  ;;  %v5727_v4 = vpop.permute.xlu0 %5726 }
 0x416   : > { %v5805_v3 = vmul.f32 %v5723_v0, %v5065_v48 }
 0x417   : > { %v5827_v47 = vadd.f32 %v5803_v32, %v5683_v39  ;;  %v5540_v22 = vadd.f32 %v5516_v12, %v5396_v38  ;;  %v3471_v49 = vpop.f32.mrb[56].mxu1  ;;  %v5070_v43 = vpop.f32.mrb[58].mxu0 }
 0x418   : > { %v5397_v9 = vmul.f32 %v8746_v25, %v3471_v49  ;;  %v3473_v54 = vpop.f32.mrb[57].mxu1  ;;  %v5072_v51 = vpop.f32.mrb[59].mxu0 }
 0x419   : > { %5851 = vst [vmem:[%s9044_s1 + $0x10] sm:$0xff] %v5827_v47  ;;  %v5684_v31 = vadd.f32 %v5660_v23, %v5540_v22  ;;  %v5517_v5 = vmul.f32 %v8850_v30, %v3473_v54  ;;  %v5662_v30 = vmul.f32 %v8916_v11, %v5070_v43  ;;  %v5806_v32 = vmul.f32 %v5727_v4, %v5072_v51  ;;  %v5731_v12 = vpop.permute.xlu1 %5730  ;;  %v5735_v51 = vpop.permute.xlu0 %5734 }
 0x41b   : > { %v5828_v33 = vadd.f32 %v5804_v7, %v5684_v31  ;;  %v5541_v20 = vadd.f32 %v5517_v5, %v5397_v9  ;;  %v3478_v44 = vpop.f32.mrb[58].mxu1  ;;  %v5077_v59 = vpop.f32.mrb[60].mxu0 }
 0x41c   : > { %v5398_v1 = vmul.f32 %v8729_v57, %v3478_v44  ;;  %v3480_v2 = vpop.f32.mrb[59].mxu1  ;;  %v5079_v25 = vpop.f32.mrb[61].mxu0 }
 0x41d   : > { %5852 = vst [vmem:[%s9044_s1 + $0x18] sm:$0xff] %v5828_v33  ;;  %v5685_v18 = vadd.f32 %v5661_v58, %v5541_v20  ;;  %v5518_v26 = vmul.f32 %v8866_v17, %v3480_v2  ;;  %v5663_v17 = vmul.f32 %v8918_v63, %v5077_v59  ;;  %v5807_v43 = vmul.f32 %v5731_v12, %v5079_v25  ;;  %v5739_v59 = vpop.permute.xlu1 %5738 }
 0x41f   : > { %v5829_v62 = vadd.f32 %v5805_v3, %v5685_v18  ;;  %v5542_v42 = vadd.f32 %v5518_v26, %v5398_v1  ;;  %v3485_v35 = vpop.f32.mrb[60].mxu1  ;;  %v5084_v28 = vpop.f32.mrb[62].mxu0 }
 0x420   : > { %v5399_v38 = vmul.f32 %v8758_v13, %v3485_v35  ;;  %v3487_v34 = vpop.f32.mrb[61].mxu1  ;;  %v5086_v57 = vpop.f32.mrb[63].mxu0 }
 0x421   : > { %5853 = vst [vmem:[%s9044_s1 + $0x20] sm:$0xff] %v5829_v62  ;;  %v5686_v39 = vadd.f32 %v5662_v30, %v5542_v42  ;;  %v5519_v48 = vmul.f32 %v8860_v29, %v3487_v34  ;;  %v5664_v29 = vmul.f32 %v8920_v50, %v5084_v28  ;;  %v5808_v33 = vmul.f32 %v5735_v51, %v5086_v57 }
 0x423   : > { %v5830_v24 = vadd.f32 %v5806_v32, %v5686_v39  ;;  %v5543_v23 = vadd.f32 %v5519_v48, %v5399_v38  ;;  %v3492_v11 = vpop.f32.mrb[62].mxu1  ;;  %v5091_v47 = vpop.f32.mrb[64].mxu0 }
 0x424   : > { %v5400_v22 = vmul.f32 %v8740_v10, %v3492_v11  ;;  %v3494_v49 = vpop.f32.mrb[63].mxu1  ;;  %v5093_v13 = vpop.f32.mrb[65].mxu0 }
 0x425   : > { %5854 = vst [vmem:[%s9044_s1 + $0x28] sm:$0xff] %v5830_v24  ;;  %v5687_v9 = vadd.f32 %v5663_v17, %v5543_v23  ;;  %v5520_v54 = vmul.f32 %v8874_v56, %v3494_v49  ;;  %v5665_v56 = vmul.f32 %v8922_v21, %v5091_v47  ;;  %v5809_v4 = vmul.f32 %v5739_v59, %v5093_v13 }
 0x427   : > { %v5831_v7 = vadd.f32 %v5807_v43, %v5687_v9  ;;  %v5544_v31 = vadd.f32 %v5520_v54, %v5400_v22  ;;  %v3499_v63 = vpop.f32.mrb[64].mxu1  ;;  %v5098_v5 = vpop.f32.mrb[66].mxu0 }
 0x428   : > { %v5401_v0 = vmul.f32 %v8766_v19, %v3499_v63  ;;  %v3501_v58 = vpop.f32.mrb[65].mxu1  ;;  %v5100_v10 = vpop.f32.mrb[67].mxu0  ;;  %v5666_v42 = vmul.f32 %v8924_v61, %v5098_v5 }
 0x429   : > { %5855 = vst [vmem:[%s9044_s1 + $0x30] sm:$0xff] %v5831_v7  ;;  %v5688_v20 = vadd.f32 %v5664_v29, %v5544_v31  ;;  %v5521_v44 = vmul.f32 %v8870_v16, %v3501_v58  ;;  %v5743_v16 = vpop.permute.xlu0 %5742 }
 0x42a   : > { %v5810_v32 = vmul.f32 %v5743_v16, %v5100_v10  ;;  %v9461_v16 = vld [vmem:[#allocation56_spill] sm:$0xff] }
 0x42b   : > { %v5832_v1 = vadd.f32 %v5808_v33, %v5688_v20  ;;  %v5545_v2 = vadd.f32 %v5521_v44, %v5401_v0  ;;  %v3506_v50 = vpop.f32.mrb[66].mxu1  ;;  %v5105_v25 = vpop.f32.mrb[68].mxu0 }
 0x42c   : > { %v5402_v3 = vmul.f32 %v8750_v46, %v3506_v50  ;;  %v5667_v18 = vmul.f32 %v8926_v8, %v5105_v25  ;;  %v3508_v19 = vpop.f32.mrb[67].mxu1  ;;  %v5107_v26 = vpop.f32.mrb[69].mxu0 }
 0x42d   : > { %5856 = vst [vmem:[%s9044_s1 + $0x38] sm:$0xff] %v5832_v1  ;;  %v5689_v30 = vadd.f32 %v5665_v56, %v5545_v2  ;;  %v5522_v62 = vmul.f32 %v8878_v45, %v3508_v19  ;;  %v5747_v45 = vpop.permute.xlu1 %5746  ;;  %v5751_v49 = vpop.permute.xlu0 %5750 }
 0x42e   : > { %v5811_v47 = vmul.f32 %v5747_v45, %v5107_v26 }
 0x42f   : > { %v5833_v21 = vadd.f32 %v5809_v4, %v5689_v30  ;;  %v5546_v35 = vadd.f32 %v5522_v62, %v5402_v3  ;;  %v3513_v28 = vpop.f32.mrb[68].mxu1  ;;  %v5112_v38 = vpop.f32.mrb[70].mxu0  ;;  %v9460_v4 = vld [vmem:[#allocation36_spill] sm:$0xff] }
 0x430   : > { %v5403_v34 = vmul.f32 %v8778_v52, %v3513_v28  ;;  %v5668_v46 = vmul.f32 %v8928_v37, %v5112_v38  ;;  %v3515_v8 = vpop.f32.mrb[69].mxu1  ;;  %v5114_v57 = vpop.f32.mrb[71].mxu0  ;;  %v9462_v28 = vld [vmem:[#allocation19_spill] sm:$0xff] }
 0x431   : > { %5857 = vst [vmem:[%s9044_s1 + $0x40] sm:$0xff] %v5833_v21  ;;  %v5690_v39 = vadd.f32 %v5666_v42, %v5546_v35  ;;  %v5523_v48 = vmul.f32 %v8876_v6, %v3515_v8  ;;  %v5812_v7 = vmul.f32 %v5751_v49, %v5114_v57  ;;  %v5755_v63 = vpop.permute.xlu1 %5754  ;;  %v5759_v1 = vpop.permute.xlu0 %5758  ;;  %v9463_v57 = vld [vmem:[#allocation41_spill] sm:$0xff]  ;;  %v9466_v49 = vld [vmem:[#allocation38_spill] sm:$0xff] }
 0x433   : > { %v5834_v12 = vadd.f32 %v5810_v32, %v5690_v39  ;;  %v5547_v17 = vadd.f32 %v5523_v48, %v5403_v34  ;;  %v3520_v61 = vpop.f32.mrb[70].mxu1  ;;  %v5119_v24 = vpop.f32.mrb[72].mxu0  ;;  %v9464_v48 = vld [vmem:[#allocation58_spill] sm:$0xff] }
 0x434   : > { %v5404_v23 = vmul.f32 %v8760_v14, %v3520_v61  ;;  %v3522_v11 = vpop.f32.mrb[71].mxu1  ;;  %v5121_v52 = vpop.f32.mrb[73].mxu0  ;;  %v5669_v5 = vmul.f32 %v8930_v53, %v5119_v24 }
 0x435   : > { %5858 = vst [vmem:[%s9044_s1 + $0x48] sm:$0xff] %v5834_v12  ;;  %v5691_v37 = vadd.f32 %v5667_v18, %v5547_v17  ;;  %v5524_v22 = vmul.f32 %v8882_v55, %v3522_v11  ;;  %v5813_v44 = vmul.f32 %v5755_v63, %v5121_v52  ;;  %v5763_v62 = vpop.permute.xlu1 %5762  ;;  %v5767_v39 = vpop.permute.xlu0 %5766 }
 0x437   : > { %v5835_v13 = vadd.f32 %v5811_v47, %v5691_v37  ;;  %v5548_v43 = vadd.f32 %v5524_v22, %v5404_v23  ;;  %v3527_v9 = vpop.f32.mrb[72].mxu1  ;;  %v5126_v6 = vpop.f32.mrb[74].mxu0  ;;  %v9465_v23 = vld [vmem:[#allocation25_spill] sm:$0xff] }
 0x438   : > { %v5405_v54 = vmul.f32 %v8786_v60, %v3527_v9  ;;  %v3529_v51 = vpop.f32.mrb[73].mxu1  ;;  %v5128_v29 = vpop.f32.mrb[75].mxu0  ;;  %v9467_v9 = vld [vmem:[#allocation59_spill] sm:$0xff] }
 0x439   : > { %5859 = vst [vmem:[%s9044_s1 + $0x50] sm:$0xff] %v5835_v13  ;;  %v5692_v14 = vadd.f32 %v5668_v46, %v5548_v43  ;;  %v5525_v31 = vmul.f32 %v8880_v27, %v3529_v51  ;;  %v5670_v27 = vmul.f32 %v8932_v41, %v5126_v6  ;;  %v5814_v19 = vmul.f32 %v5759_v1, %v5128_v29  ;;  %v5771_v43 = vpop.permute.xlu1 %5770 }
 0x43b   : > { %v5836_v0 = vadd.f32 %v5812_v7, %v5692_v14  ;;  %v5549_v55 = vadd.f32 %v5525_v31, %v5405_v54  ;;  %v3534_v58 = vpop.f32.mrb[74].mxu1  ;;  %v5133_v10 = vpop.f32.mrb[76].mxu0  ;;  %v9468_v14 = vld [vmem:[#allocation21_spill] sm:$0xff] }
 0x43c   : > { %v5406_v33 = vmul.f32 %v8770_v15, %v3534_v58  ;;  %v3536_v20 = vpop.f32.mrb[75].mxu1  ;;  %v5135_v60 = vpop.f32.mrb[77].mxu0  ;;  %v9469_v58 = vld [vmem:[#allocation44_spill] sm:$0xff] }
 0x43d   : > { %5860 = vst [vmem:[%s9044_s1 + $0x58] sm:$0xff] %v5836_v0  ;;  %v5693_v59 = vadd.f32 %v5669_v5, %v5549_v55  ;;  %v5526_v56 = vmul.f32 %v8886_v40, %v3536_v20  ;;  %v5671_v40 = vmul.f32 %v9461_v16, %v5133_v10  ;;  %v5815_v46 = vmul.f32 %v5763_v62, %v5135_v60  ;;  %v9470_v20 = vld [vmem:[#allocation12_spill] sm:$0xff] }
 0x43f   : > { %v5837_v2 = vadd.f32 %v5813_v44, %v5693_v59  ;;  %v5550_v50 = vadd.f32 %v5526_v56, %v5406_v33  ;;  %v3541_v53 = vpop.f32.mrb[76].mxu1  ;;  %v5140_v25 = vpop.f32.mrb[78].mxu0 }
 0x440   : > { %v5407_v3 = vmul.f32 %v8798_v36, %v3541_v53  ;;  %v3543_v18 = vpop.f32.mrb[77].mxu1  ;;  %v5142_v15 = vpop.f32.mrb[79].mxu0  ;;  %v5672_v45 = vmul.f32 %v9464_v48, %v5140_v25 }
 0x441   : > { %5861 = vst [vmem:[%s9044_s1 + $0x60] sm:$0xff] %v5837_v2  ;;  %v5694_v26 = vadd.f32 %v5670_v27, %v5550_v50  ;;  %v5527_v30 = vmul.f32 %v9460_v4, %v3543_v18  ;;  %v5816_v37 = vmul.f32 %v5767_v39, %v5142_v15  ;;  %v5775_v33 = vpop.permute.xlu0 %5774  ;;  %v9471_v27 = vld [vmem:[#allocation28_spill] sm:$0xff]  ;;  %v9472_v18 = vld [vmem:[#allocation42_spill] sm:$0xff] }
 0x443   : > { %v5838_v42 = vadd.f32 %v5814_v19, %v5694_v26  ;;  %v5551_v21 = vadd.f32 %v5527_v30, %v5407_v3  ;;  %v3548_v41 = vpop.f32.mrb[78].mxu1  ;;  %v5147_v35 = vpop.f32.mrb[80].mxu0  ;;  %v9473_v26 = vld [vmem:[#allocation13_spill] sm:$0xff] }
 0x444   : > { %v5408_v38 = vmul.f32 %v9462_v28, %v3548_v41  ;;  %v3550_v34 = vpop.f32.mrb[79].mxu1  ;;  %v5149_v36 = vpop.f32.mrb[81].mxu0  ;;  %v5673_v6 = vmul.f32 %v9467_v9, %v5147_v35 }
 0x445   : > { %5862 = vst [vmem:[%s9044_s1 + $0x68] sm:$0xff] %v5838_v42  ;;  %v5695_v8 = vadd.f32 %v5671_v40, %v5551_v21  ;;  %v5528_v32 = vmul.f32 %v9463_v57, %v3550_v34  ;;  %v5817_v0 = vmul.f32 %v5771_v43, %v5149_v36  ;;  %v5779_v19 = vpop.permute.xlu1 %5778  ;;  %v9474_v42 = vld [vmem:[#allocation22_spill] sm:$0xff]  ;;  %v9475_v34 = vld [vmem:[#allocation48_spill] sm:$0xff] }
 0x447   : > { %v5839_v12 = vadd.f32 %v5815_v46, %v5695_v8  ;;  %v5552_v17 = vadd.f32 %v5528_v32, %v5408_v38  ;;  %v3555_v61 = vpop.f32.mrb[80].mxu1  ;;  %v5154_v24 = vpop.f32.mrb[82].mxu0  ;;  %v9476_v8 = vld [vmem:[#allocation15_spill] sm:$0xff] }
 0x448   : > { %v5409_v11 = vmul.f32 %v9465_v23, %v3555_v61  ;;  %v3557_v52 = vpop.f32.mrb[81].mxu1  ;;  %v5156_v47 = vpop.f32.mrb[83].mxu0  ;;  %v5674_v60 = vmul.f32 %v9470_v20, %v5154_v24 }
 0x449   : > { %5863 = vst [vmem:[%s9044_s1 + $0x70] sm:$0xff] %v5839_v12  ;;  %v5696_v22 = vadd.f32 %v5672_v45, %v5552_v17  ;;  %v5529_v13 = vmul.f32 %v9466_v49, %v3557_v52  ;;  %v5818_v25 = vmul.f32 %v5775_v33, %v5156_v47  ;;  %v5783_v46 = vpop.permute.xlu0 %5782  ;;  %v9477_v12 = vld [vmem:[#allocation32_spill] sm:$0xff]  ;;  %v9478_v52 = vld [vmem:[#allocation46_spill] sm:$0xff] }
 0x44b   : > { %v5840_v54 = vadd.f32 %v5816_v37, %v5696_v22  ;;  %v5553_v51 = vadd.f32 %v5529_v13, %v5409_v11  ;;  %v3562_v29 = vpop.f32.mrb[82].mxu1  ;;  %v5161_v7 = vpop.f32.mrb[84].mxu0  ;;  %v9479_v22 = vld [vmem:[#allocation17_spill] sm:$0xff] }
 0x44c   : > { %v5410_v31 = vmul.f32 %v9468_v14, %v3562_v29  ;;  %v3564_v63 = vpop.f32.mrb[83].mxu1  ;;  %v5163_v5 = vpop.f32.mrb[85].mxu0  ;;  %v5675_v4 = vmul.f32 %v9473_v26, %v5161_v7 }
 0x44d   : > { %5864 = vst [vmem:[%s9044_s1 + $0x78] sm:$0xff] %v5840_v54  ;;  %v5697_v55 = vadd.f32 %v5673_v6, %v5553_v51  ;;  %v5530_v10 = vmul.f32 %v9469_v58, %v3564_v63  ;;  %v5819_v28 = vmul.f32 %v5779_v19, %v5163_v5  ;;  %v5787_v37 = vpop.permute.xlu1 %5786  ;;  %v9480_v54 = vld [vmem:[#allocation26_spill] sm:$0xff]  ;;  %v9481_v63 = vld [vmem:[#allocation52_spill] sm:$0xff] }
 0x44f   : > { %v5841_v44 = vadd.f32 %v5817_v0, %v5697_v55  ;;  %v5554_v59 = vadd.f32 %v5530_v10, %v5410_v31  ;;  %v3569_v56 = vpop.f32.mrb[84].mxu1  ;;  %v5168_v1 = vpop.f32.mrb[86].mxu0  ;;  %v9482_v55 = vld [vmem:[#allocation18_spill] sm:$0xff] }
 0x450   : > { %v5411_v2 = vmul.f32 %v9471_v27, %v3569_v56  ;;  %v3571_v50 = vpop.f32.mrb[85].mxu1  ;;  %v5170_v53 = vpop.f32.mrb[87].mxu0  ;;  %v5676_v57 = vmul.f32 %v9476_v8, %v5168_v1 }
 0x451   : > { %5865 = vst [vmem:[%s9044_s1 + $0x80] sm:$0xff] %v5841_v44  ;;  %v5698_v3 = vadd.f32 %v5674_v60, %v5554_v59  ;;  %v5531_v15 = vmul.f32 %v9472_v18, %v3571_v50  ;;  %v5820_v23 = vmul.f32 %v5783_v46, %v5170_v53  ;;  %v5791_v0 = vpop.permute.xlu0 %5790  ;;  %v9483_v44 = vld [vmem:[#allocation34_spill] sm:$0xff]  ;;  %v5795_v26 = vpop.permute.xlu1 %5794 }
 0x452   : > { %v9484_v50 = vld [vmem:[#allocation50_spill] sm:$0xff] }
 0x453   : > { %v5842_v30 = vadd.f32 %v5818_v25, %v5698_v3  ;;  %v5555_v62 = vadd.f32 %v5531_v15, %v5411_v2  ;;  %v3576_v16 = vpop.f32.mrb[86].mxu1  ;;  %v5175_v40 = vpop.f32.mrb[88].mxu0  ;;  %v9485_v25 = vld [vmem:[#allocation20_spill] sm:$0xff] }
 0x454   : > { %v5412_v21 = vmul.f32 %v9474_v42, %v3576_v16  ;;  %v3578_v41 = vpop.f32.mrb[87].mxu1  ;;  %v5177_v35 = vpop.f32.mrb[89].mxu0  ;;  %v5677_v49 = vmul.f32 %v9479_v22, %v5175_v40  ;;  %v9487_v42 = vld [vmem:[#allocation54_spill] sm:$0xff] }
 0x455   : > { %5866 = vst [vmem:[%s9044_s1 + $0x88] sm:$0xff] %v5842_v30  ;;  %v5699_v38 = vadd.f32 %v5675_v4, %v5555_v62  ;;  %v5532_v36 = vmul.f32 %v9475_v34, %v3578_v41  ;;  %v5821_v14 = vmul.f32 %v5787_v37, %v5177_v35  ;;  %v9486_v4 = vld [vmem:[#allocation30_spill] sm:$0xff]  ;;  %v9488_v41 = vld [vmem:[#allocation23_spill] sm:$0xff]  ;;  %v5799_v34 = vpop.permute.xlu0 %5798 }
 0x457   : > { %v5843_v32 = vadd.f32 %v5819_v28, %v5699_v38  ;;  %v5556_v39 = vadd.f32 %v5532_v36, %v5412_v21  ;;  %v3583_v48 = vpop.f32.mrb[88].mxu1  ;;  %v5182_v45 = vpop.f32.mrb[90].mxu0 }
 0x458   : > { %v5413_v17 = vmul.f32 %v9477_v12, %v3583_v48  ;;  %v3585_v61 = vpop.f32.mrb[89].mxu1  ;;  %v5184_v24 = vpop.f32.mrb[91].mxu0  ;;  %v5678_v58 = vmul.f32 %v9482_v55, %v5182_v45 }
 0x459   : > { %5867 = vst [vmem:[%s9044_s1 + $0x90] sm:$0xff] %v5843_v32  ;;  %v5700_v11 = vadd.f32 %v5676_v57, %v5556_v39  ;;  %v5533_v47 = vmul.f32 %v9478_v52, %v3585_v61  ;;  %v5822_v27 = vmul.f32 %v5791_v0, %v5184_v24 }
 0x45b   : > { %v5844_v13 = vadd.f32 %v5820_v23, %v5700_v11  ;;  %v5557_v43 = vadd.f32 %v5533_v47, %v5413_v17  ;;  %v3590_v9 = vpop.f32.mrb[90].mxu1  ;;  %v5189_v6 = vpop.f32.mrb[92].mxu0 }
 0x45c   : > { %v5414_v51 = vmul.f32 %v9480_v54, %v3590_v9  ;;  %v3592_v29 = vpop.f32.mrb[91].mxu1  ;;  %v5191_v7 = vpop.f32.mrb[93].mxu0  ;;  %v5679_v3 = vmul.f32 %v9485_v25, %v5189_v6 }
 0x45d   : > { %5868 = vst [vmem:[%s9044_s1 + $0x98] sm:$0xff] %v5844_v13  ;;  %v5701_v31 = vadd.f32 %v5677_v49, %v5557_v43  ;;  %v5534_v5 = vmul.f32 %v9481_v63, %v3592_v29  ;;  %v5823_v16 = vmul.f32 %v5795_v26, %v5191_v7 }
 0x45f   : > { %v5845_v10 = vadd.f32 %v5821_v14, %v5701_v31  ;;  %v5558_v33 = vadd.f32 %v5534_v5, %v5414_v51  ;;  %v3597_v20 = vpop.f32.mrb[92].mxu1  ;;  %v5196_v60 = vpop.f32.mrb[94].mxu0 }
 0x460   : > { %v5415_v59 = vmul.f32 %v9483_v44, %v3597_v20  ;;  %v3599_v56 = vpop.f32.mrb[93].mxu1  ;;  %v5198_v1 = vpop.f32.mrb[95].mxu0  ;;  %v5680_v35 = vmul.f32 %v9488_v41, %v5196_v60 }
 0x461   : > { %5869 = vst [vmem:[%s9044_s1 + $0xa0] sm:$0xff] %v5845_v10  ;;  %v5702_v2 = vadd.f32 %v5678_v58, %v5558_v33  ;;  %v5535_v53 = vmul.f32 %v9484_v50, %v3599_v56  ;;  %v5824_v36 = vmul.f32 %v5799_v34, %v5198_v1 }
 0x463   : > { %v5846_v18 = vadd.f32 %v5822_v27, %v5702_v2  ;;  %v5559_v15 = vadd.f32 %v5535_v53, %v5415_v59  ;;  %v3604_v19 = vpop.f32.mrb[94].mxu1 }
 0x464   : > { %v5416_v30 = vmul.f32 %v9486_v4, %v3604_v19  ;;  %v3606_v62 = vpop.f32.mrb[95].mxu1 }
 0x465   : > { %5870 = vst [vmem:[%s9044_s1 + $0xa8] sm:$0xff] %v5846_v18  ;;  %v5703_v40 = vadd.f32 %v5679_v3, %v5559_v15  ;;  %v5536_v21 = vmul.f32 %v9487_v42, %v3606_v62 }
 0x467   : > { %v5847_v28 = vadd.f32 %v5823_v16, %v5703_v40  ;;  %v5560_v38 = vadd.f32 %v5536_v21, %v5416_v30 }
 0x469   : > { %5871 = vst [vmem:[%s9044_s1 + $0xb0] sm:$0xff] %v5847_v28  ;;  %v5704_v46 = vadd.f32 %v5680_v35, %v5560_v38 }
 0x46b   : > { %v5848_v8 = vadd.f32 %v5824_v36, %v5704_v46 }
 0x46d   : > { %5872 = vst [vmem:[%s9044_s1 + $0xb8] sm:$0xff] %v5848_v8 }
 0x46e   : > { %7020 = shalt.err (!%p7017_p2)
}
 0x46f   : > { %s7021_s15 = scalar_lea.hbm %s9139_s16, 3072  ;;  %s7025_s30 = scalar_lea.hbm %s9205_s5, 18432 }
 0x470   : > { %p7022_p4 = scmp.ne.s32.totalorder %s9139_s16, %s7021_s15  ;;  %p7026_p7 = scmp.lt.u32.totalorder %s9139_s16, %s9205_s5 }
 0x471   : > { %p7027_p9 = scmp.lt.u32.totalorder %s7025_s30, %s7021_s15  ;;  %p7029_p11 = scmp.lt.u32.totalorder %s7021_s15, %s9139_s16 }
 0x472   : > { %p7023_p5 = pnand %p7022_p4, %p7200_p3 }
 0x473   : > { %p7028_p10 = por %p7027_p9, %p7026_p7 }
 0x474   : > { %p7024_p6 = pneg %p7023_p5 }
 0x475   : > { %p7030_p12 = por %p7029_p11, %p7028_p10 }
 0x477   : > { %p7031_p13 = pnand %p7030_p12, %p7024_p6 }
 0x479   : > { %7034 = shalt.err (!%p7031_p13)
}
 0x47a   : > { %s9489_s13 = scalar_lea.sflag [#allocation5], %s8940_s12 }
 0x47b   : > { %6854 = dma.vmem_to_hbm [thread:$0]  (%p7200_p3), %s9141_s8, 3072, %s9139_s16, %s9489_s13, %s7113_s22, %s7113_s22, %s7114_s17  }
 0x47c PF: > { %p6868_p0 = scmp.ge.s32.totalorder %s7105_s25, 2  ;;  %s5953_s14 = sand.u32 1, %s7077_s18  }
 0x47d   : > { %s5954_s27 = scalar_lea.sflag [#allocation3], %s5953_s14 }
 0x47e   : > { %p6859_p1 = pnand %p6868_p0, %p7211_p8 }
 0x480   : > { %7068 = dma.done.wait (!%p6859_p1), %s5954_s27, 3072  }
 0x481   : > { %7070 = vsyncadd (!%p6859_p1), %s5954_s27, 4294964224  ;;  %s9490_s6 = sadd.s32 4294967294, %s7105_s25  }
 0x482   : > { %s5962_s9 = sand.u32 1, %s9490_s6  }
 0x483   : > { %s5963_s10 = scalar_lea.sflag [#allocation5], %s5962_s9 }
 0x484   : > { %7072 = dma.done.wait (!%p6859_p1), %s5963_s10, 6144  }
 0x485   : > { %7074 = vsyncadd (!%p6859_p1), %s5963_s10, 4294961152  ;;  %s22_s25 = sadd.s32 1, %s7105_s25   ;;  %s9491_s18 = smov %s7081_s19 }
 0x486   : > { %p19_p3 = scmp.ge.s32.totalorder %s22_s25, 8   ;;  %s9492_s19 = smov %s7085_s20 }
 0x487   : > { %s9493_s20 = smov %s7220_s11  ;;  %s9494_s21 = smov %s7097_s23 }
 0x488   : > { %s9495_s22 = smov %s7101_s24  ;;  %s9496_s23 = smov %s9499_s28 }
 0x489   : > { %s9497_s24 = smov %s9503_s29  ;;  %21 = sbr.rel (!%p19_p3) target bundleno = 10 (0xa), region = 102 }
 0x490   :  { %5977 = vsyncpa [#allocation3], 1 }
 0x491   :  { %5979 = vsyncpa [#allocation3 + $0x1], 1 }
 0x492   :  { %5980 = vsyncpa [#allocation5], 1 }
 0x493   :  { %5982 = vsyncpa [#allocation5 + $0x1], 1 }

</bundles_post_ra>
